<compile_context>
chip_gen: v7x
topology: tpu7x:2x2x1
jax: 0.10.0
libtpu: 0.0.40
codegen_flags: <defaults>
</compile_context>

<pallas_src>
import functools

import jax
import jax.numpy as jnp
from jax import lax
from jax.experimental import pallas as pl
from jax.experimental.pallas import tpu as pltpu

_LN_EPS = 1e-5
_BN_EPS = 1e-5
_VMEM_LIMIT = 64 * 1024 * 1024      # <= v7x physical; well above the default scoped limit


# ----------------------------- Pallas kernels -----------------------------

def _conv_transpose_kernel(x_ref, w_ref, b_ref, o_ref):
    """(4*Cout, Cin) @ (Cin, TL) + bias: the four ConvTranspose2d(k=2,s=2) taps."""
    acc = jnp.dot(w_ref[...], x_ref[...], preferred_element_type=jnp.float32)
    o_ref[...] = (acc + b_ref[...]).astype(o_ref.dtype)


def _double_conv_kernel(xcat_ref, w1_ref, s1_ref, t1_ref, mask_ref,
                        w2_ref, s2_ref, t2_ref, o_ref, h_ref, *, wp, mg, pcols):
    """Fused (concat -> conv3x3+BN+ReLU -> conv3x3+BN+ReLU) for one batch element.

    xcat_ref: (2*C2, R) bf16, channel-major concat([skip, upsampled]).  Columns
    [mg, mg+pcols) hold the zero-padded (Hp x Wp) image in row-major order; the mg
    margin columns on either side are zero, so the 3x3 tap (dy, dx) is the contiguous
    lane window starting at mg + (dy-1)*wp + (dx-1).  Border (frame) columns of the
    output are forced to zero with `mask` so the result can feed conv2 / EFB directly.
    """
    offs = [mg + (dy - 1) * wp + (dx - 1) for dy in range(3) for dx in range(3)]

    # ---- conv1: single big-K MXU dot on a staged (9*2*C2, P) bf16 im2col ----
    im2col1 = jnp.concatenate([xcat_ref[:, o:o + pcols] for o in offs], axis=0)
    acc1 = jnp.dot(w1_ref[...], im2col1, preferred_element_type=jnp.float32)
    h = jnp.maximum(acc1 * s1_ref[...] + t1_ref[...], 0.0) * mask_ref[...]

    # stage intermediate (bf16) in VMEM; only the margins get re-zeroed (interior is
    # fully overwritten; per-iteration so it is safe under megacore grid sharding).
    zmargin = jnp.zeros((h_ref.shape[0], mg), h_ref.dtype)
    h_ref[:, 0:mg] = zmargin
    h_ref[:, mg + pcols:mg + pcols + mg] = zmargin
    h_ref[:, mg:mg + pcols] = h.astype(h_ref.dtype)

    # ---- conv2: single big-K MXU dot on a (9*mid, P) bf16 im2col of the scratch ----
    im2col2 = jnp.concatenate([h_ref[:, o:o + pcols] for o in offs], axis=0)
    acc2 = jnp.dot(w2_ref[...], im2col2, preferred_element_type=jnp.float32)
    y = jnp.maximum(acc2 * s2_ref[...] + t2_ref[...], 0.0) * mask_ref[...]
    o_ref[...] = y.astype(o_ref.dtype)


def _softmax_rows(s):
    """Exact f32 row-softmax of a small (hc, hc) logits tile."""
    s = s - jnp.max(s, axis=-1, keepdims=True)
    e = jnp.exp(s)
    return e / jnp.sum(e, axis=-1, keepdims=True)


def _ln_ch(y, gamma, beta):
    """LayerNorm over the channel axis (axis 0) of a (C, L) tile; gamma/beta are (C, 1)."""
    mu = jnp.mean(y, axis=0, keepdims=True)
    var = jnp.mean(jnp.square(y - mu), axis=0, keepdims=True)
    return (y - mu) * lax.rsqrt(var + _LN_EPS) * gamma + beta


def _efb_kernel(x_ref, ln1_ref, ln2_ref, w2_ref, gb2_ref, w1_ref, gb1_ref,
                wo_ref, gbo_ref, o_ref, *, hc, scale):
    """Whole EFB block for one batch element, channel-major (C, L) layout.

    bf16 MXU operands, f32 accumulation; LN/softmax/sigmoid epilogues in f32.
    Frame (zero) columns of the input stay inert in both L-reductions.
    """
    f32, bf16 = jnp.float32, jnp.bfloat16
    inv_scale = 1.0 / scale
    x1 = x_ref[:hc, :]                                    # (hc, L) bf16 (original x1)
    x2 = x_ref[hc:, :]                                    # (hc, L) bf16 (original x2)

    # ln_1 / ln_2 (bias-free); q/k/v from one merged (3*hc, hc) @ (hc, L) dot
    nd1 = jnp.dot(ln1_ref[...], x1, preferred_element_type=f32)        # (hc, L)
    qkv = jnp.dot(ln2_ref[...], x2, preferred_element_type=f32)        # (3*hc, L)
    q, k, v = qkv[:hc], qkv[hc:2 * hc], qkv[2 * hc:]

    # channel attention on x2: softmax(q k^T / (h*w*hc)) v
    s = lax.dot_general(q.astype(bf16), k.astype(bf16), (((1,), (1,)), ((), ())),
                        preferred_element_type=f32) * inv_scale        # (hc, hc)
    attn = jnp.dot(_softmax_rows(s).astype(bf16), v.astype(bf16),
                   preferred_element_type=f32)                         # (hc, L)

    # out_2: Linear over cat([x2, attn]) (single K = C dot) + channel LayerNorm
    y2 = jnp.dot(w2_ref[...], jnp.concatenate([x2, attn.astype(bf16)], axis=0),
                 preferred_element_type=f32)
    x2n = _ln_ch(y2, gb2_ref[0], gb2_ref[1])                           # (hc, L) f32
    x2n_b = x2n.astype(bf16)

    # correlation gate on x1
    s2 = lax.dot_general(nd1.astype(bf16), x2n_b, (((1,), (1,)), ((), ())),
                         preferred_element_type=f32) * inv_scale       # (hc, hc)
    corr = jax.nn.sigmoid(jnp.dot(_softmax_rows(s2).astype(bf16), x2n_b,
                                  preferred_element_type=f32))         # (hc, L)
    x1f = x1.astype(f32)
    x1g = x1f * corr + x1f

    # out_1: Linear + LayerNorm
    x1n = _ln_ch(jnp.dot(w1_ref[...], x1g.astype(bf16), preferred_element_type=f32),
                 gb1_ref[0], gb1_ref[1])                               # (hc, L)

    # out: Linear over cat([x1n, x2n]) (single K = C dot) + LayerNorm + ReLU + residual
    yo = jnp.dot(wo_ref[...], jnp.concatenate([x1n.astype(bf16), x2n_b], axis=0),
                 preferred_element_type=f32)                           # (C, L)
    yo = _ln_ch(yo, gbo_ref[0], gbo_ref[1])
    o_ref[...] = jnp.maximum(yo, 0.0) + x_ref[...].astype(f32)


# ----------------------------- wrappers -----------------------------

def _pick_lane_tile(L):
    """Largest convenient lane tile: whole dim when small, else a 128-multiple divisor."""
    if L <= 1024:
        return L
    for t in (1024, 512, 384, 256, 128):
        if L % t == 0:
            return t
    return L                      # fallback: single block


def conv_transpose2x2(x_nchw, w, bias):
    """ConvTranspose2d(k=2, s=2), channel-major.  x: NCHW, w: torch (Cin, Cout, 2, 2)."""
    B, Cin, H1, W1 = x_nchw.shape
    Cu = w.shape[1]
    L1 = H1 * W1
    x = x_nchw.reshape(B, Cin, L1).astype(jnp.bfloat16)
    wmat = jnp.transpose(w, (2, 3, 1, 0)).reshape(4 * Cu, Cin).astype(jnp.bfloat16)
    b_col = jnp.tile(bias, 4).reshape(4 * Cu, 1).astype(jnp.float32)   # rows = (ki,kj,co)
    tl = _pick_lane_tile(L1)

    y = pl.pallas_call(
        _conv_transpose_kernel,
        out_shape=jax.ShapeDtypeStruct((B, 4 * Cu, L1), jnp.bfloat16),
        grid=(B, L1 // tl),
        in_specs=[pl.BlockSpec((None, Cin, tl), lambda b, l: (b, 0, l)),
                  pl.BlockSpec((4 * Cu, Cin), lambda b, l: (0, 0)),
                  pl.BlockSpec((4 * Cu, 1), lambda b, l: (0, 0))],
        out_specs=pl.BlockSpec((None, 4 * Cu, tl), lambda b, l: (b, 0, l)),
        compiler_params=pltpu.CompilerParams(
            dimension_semantics=("parallel", "parallel"),
            vmem_limit_bytes=_VMEM_LIMIT),
    )(x, wmat, b_col)

    # interleave the stride-2 taps back into the upsampled NCHW plane (cheap, bf16)
    y = y.reshape(B, 2, 2, Cu, H1, W1).transpose(0, 3, 4, 1, 5, 2)
    return y.reshape(B, Cu, 2 * H1, 2 * W1)


def double_conv(x2_nchw, x1u_nchw, p, *, pad_h, pad_w):
    """Fused concat([x2, x1], ch) -> Conv3x3+BN+ReLU -> Conv3x3+BN+ReLU (eval-mode BN).

    Emits lane-dense channel-major (B, cout, Hp*Wp) bf16 with a zeroed border frame,
    ready to feed EFB directly.
    """
    B, C2, H, W = x2_nchw.shape
    mid = p['conv1_w'].shape[0]
    cout = p['conv2_w'].shape[0]
    cin = p['conv1_w'].shape[1]                    # = 2 * C2 (concat)
    Hp, Wp = H + 2, W + 2
    P = Hp * Wp
    Mg = Wp + 1                  # margin so every 3x3 tap is an in-bounds lane window
    R = P + 2 * Mg

    def prep(t, ph, pw):         # F.pad delta + conv padding=1, flatten, add zero margin
        t = t.astype(jnp.bfloat16)
        t = jnp.pad(t, ((0, 0), (0, 0), (1 + ph[0], 1 + ph[1]), (1 + pw[0], 1 + pw[1])))
        return jnp.pad(t.reshape(B, t.shape[1], P), ((0, 0), (0, 0), (Mg, Mg)))

    # torch concat order is [x2_skip, x1_up]; concat once here (channel axis, bf16)
    xcat = jnp.concatenate([prep(x2_nchw, (0, 0), (0, 0)),
                            prep(x1u_nchw, pad_h, pad_w)], axis=1)     # (B, 2*C2, R)

    # weights flattened to (Cout, 9*Cin) matching the in-kernel im2col K order (dy,dx,c)
    w1 = jnp.transpose(p['conv1_w'], (0, 2, 3, 1)).reshape(mid, 9 * cin)
    w2 = jnp.transpose(p['conv2_w'], (0, 2, 3, 1)).reshape(cout, 9 * mid)

    mask = jnp.zeros((Hp, Wp), jnp.float32).at[1:-1, 1:-1].set(1.0).reshape(1, P)
    col = lambda v: v.reshape(-1, 1).astype(jnp.float32)

    return pl.pallas_call(
        functools.partial(_double_conv_kernel, wp=Wp, mg=Mg, pcols=P),
        out_shape=jax.ShapeDtypeStruct((B, cout, P), jnp.bfloat16),
        grid=(B,),
        in_specs=[
            pl.BlockSpec((None, cin, R), lambda b: (b, 0, 0)),
            pl.BlockSpec((mid, 9 * cin), lambda b: (0, 0)),
            pl.BlockSpec((mid, 1), lambda b: (0, 0)),
            pl.BlockSpec((mid, 1), lambda b: (0, 0)),
            pl.BlockSpec((1, P), lambda b: (0, 0)),
            pl.BlockSpec((cout, 9 * mid), lambda b: (0, 0)),
            pl.BlockSpec((cout, 1), lambda b: (0, 0)),
            pl.BlockSpec((cout, 1), lambda b: (0, 0)),
        ],
        out_specs=pl.BlockSpec((None, cout, P), lambda b: (b, 0, 0)),
        scratch_shapes=[pltpu.VMEM((mid, R), jnp.bfloat16)],
        compiler_params=pltpu.CompilerParams(
            dimension_semantics=("parallel",), vmem_limit_bytes=_VMEM_LIMIT),
    )(xcat, w1.astype(jnp.bfloat16),
      col(p['bn1_scale']), col(p['bn1_shift']), mask,
      w2.astype(jnp.bfloat16), col(p['bn2_scale']), col(p['bn2_shift']))


def efb(x_cp, p, *, h_img, w_img):
    """EFB block, single fused per-batch kernel, channel-major (C, P) in / (C, P) out."""
    B, C, P = x_cp.shape
    hc = C // 2
    bf16, f32 = jnp.bfloat16, jnp.float32
    gb = lambda g, b: jnp.stack([g, b]).reshape(2, -1, 1).astype(f32)

    return pl.pallas_call(
        functools.partial(_efb_kernel, hc=hc, scale=float(h_img * w_img * hc)),
        out_shape=jax.ShapeDtypeStruct((B, C, P), f32),
        grid=(B,),
        in_specs=[
            pl.BlockSpec((None, C, P), lambda b: (b, 0, 0)),
            pl.BlockSpec((hc, hc), lambda b: (0, 0)),
            pl.BlockSpec((3 * hc, hc), lambda b: (0, 0)),
            pl.BlockSpec((hc, C), lambda b: (0, 0)),
            pl.BlockSpec((2, hc, 1), lambda b: (0, 0, 0)),
            pl.BlockSpec((hc, hc), lambda b: (0, 0)),
            pl.BlockSpec((2, hc, 1), lambda b: (0, 0, 0)),
            pl.BlockSpec((C, C), lambda b: (0, 0)),
            pl.BlockSpec((2, C, 1), lambda b: (0, 0, 0)),
        ],
        out_specs=pl.BlockSpec((None, C, P), lambda b: (b, 0, 0)),
        compiler_params=pltpu.CompilerParams(
            dimension_semantics=("parallel",), vmem_limit_bytes=_VMEM_LIMIT),
    )(x_cp, p['ln1_w'].astype(bf16), p['ln2_w'].astype(bf16),
      p['out2_w'].astype(bf16), gb(p['out2_g'], p['out2_b']),
      p['out1_w'].astype(bf16), gb(p['out1_g'], p['out1_b']),
      p['out_w'].astype(bf16), gb(p['out_g'], p['out_b']))


def upscaling_forward(x1_nchw, x2_nchw, p):
    """UpScaling.forward(x1, x2) with NCHW inputs/output (PyTorch convention)."""
    B = x1_nchw.shape[0]
    H, W = x2_nchw.shape[2], x2_nchw.shape[3]

    # ConvTranspose2d(in, in//2, kernel_size=2, stride=2)
    x1u = conv_transpose2x2(x1_nchw, p['up_w'], p['up_b'])      # (B, in//2, 2h, 2w) bf16

    # F.pad deltas to match the skip connection (folded into the conv padding below)
    dh = H - x1u.shape[2]
    dw = W - x1u.shape[3]

    # concat + DoubleConv -> channel-major (B, cout, Hp*Wp) bf16 with zero frame
    h = double_conv(x2_nchw, x1u, p,
                    pad_h=(dh // 2, dh - dh // 2), pad_w=(dw // 2, dw - dw // 2))

    # EFB on the same padded flat grid (frame columns are zero and stay inert)
    y = efb(h, p, h_img=H, w_img=W)                             # (B, cout, Hp*Wp) f32

    cout = y.shape[1]
    return y.reshape(B, cout, H + 2, W + 2)[:, :, 1:-1, 1:-1]   # strip the frame -> NCHW


# ----------------------------- deterministic parameter init -----------------------------

def init_params(key, in_channel, out_channel):
    C_in, C = in_channel, out_channel
    mid = C
    hc = C // 2
    ks = jax.random.split(key, 11)
    n = lambda k, s: (0.1 * jax.random.normal(k, s)).astype(jnp.float32)
    bn_scale = lambda c: jnp.full((c,), 1.0 / jnp.sqrt(1.0 + _BN_EPS), jnp.float32)

    p = {}
    # ConvTranspose2d(C_in, C_in//2, 2, 2): weight (Cin, Cout, 2, 2), bias (Cout,)
    p['up_w'] = n(ks[0], (C_in, C_in // 2, 2, 2))
    p['up_b'] = n(ks[1], (C_in // 2,))
    # DoubleConv: torch Conv2d weight layout (Cout, Cin, 3, 3); eval-mode BN folded
    p['conv1_w'] = n(ks[2], (mid, C_in, 3, 3))
    conv1_b = n(ks[3], (mid,))
    p['bn1_scale'] = bn_scale(mid)
    p['bn1_shift'] = conv1_b * p['bn1_scale']
    p['conv2_w'] = n(ks[4], (C, mid, 3, 3))
    conv2_b = n(ks[5], (C,))
    p['bn2_scale'] = bn_scale(C)
    p['bn2_shift'] = conv2_b * p['bn2_scale']
    # EFB linears, torch nn.Linear weight layout (out, in); all bias-free
    p['ln1_w'] = n(ks[6], (hc, hc))
    p['ln2_w'] = n(ks[7], (3 * hc, hc))
    p['out2_w'] = n(ks[8], (hc, C))
    p['out2_g'] = jnp.ones((hc,), jnp.float32)
    p['out2_b'] = jnp.zeros((hc,), jnp.float32)
    p['out1_w'] = n(ks[9], (hc, hc))
    p['out1_g'] = jnp.ones((hc,), jnp.float32)
    p['out1_b'] = jnp.zeros((hc,), jnp.float32)
    p['out_w'] = n(ks[10], (C, C))
    p['out_g'] = jnp.ones((C,), jnp.float32)
    p['out_b'] = jnp.zeros((C,), jnp.float32)
    return p


# ----------------------------- driver -----------------------------

if __name__ == "__main__":
    key = jax.random.PRNGKey(0)
    k1, k2, kp = jax.random.split(key, 3)

    in_channel, out_channel = 8, 4
    B, H1, W1 = 2, 8, 8                     # x1 is the low-res decoder feature
    x1 = jax.random.normal(k1, (B, in_channel, H1, W1), jnp.float32)                 # NCHW
    x2 = jax.random.normal(k2, (B, in_channel // 2, 2 * H1, 2 * W1), jnp.float32)    # skip

    params = init_params(kp, in_channel, out_channel)

    out = jax.jit(upscaling_forward)(x1, x2, params)
    out = jax.block_until_ready(out)

    assert out.shape == (B, out_channel, 2 * H1, 2 * W1), out.shape
    assert bool(jnp.all(jnp.isfinite(out)))
    print("KERNEL_OK")
</pallas_src>

<mosaic_0001>
module attributes {stable_mosaic.version = 11 : i64} {
  func.func @_conv_transpose_kernel(%arg0: i32, %arg1: i32, %arg2: memref<1x8x64xbf16, #tpu.memory_space<vmem>>, %arg3: memref<16x8xbf16, #tpu.memory_space<vmem>>, %arg4: memref<16x1xf32, #tpu.memory_space<vmem>>, %arg5: memref<1x16x64xbf16, #tpu.memory_space<vmem>>) attributes {dimension_semantics = [#tpu.dimension_semantics<parallel>, #tpu.dimension_semantics<parallel>], iteration_bounds = array<i64: 2, 1>, scalar_prefetch = 0 : i64, scratch_operands = 0 : i64, tpu.core_type = #tpu.core_type<tc>, window_params = [{transform_indices = @transform_0, window_bounds = array<i64: 1, 8, 64>}, {pipeline_mode = #tpu.pipeline_mode<synchronous>, transform_indices = @transform_1, window_bounds = array<i64: 16, 8>}, {pipeline_mode = #tpu.pipeline_mode<synchronous>, transform_indices = @transform_2, window_bounds = array<i64: 16, 1>}, {transform_indices = @transform_3, window_bounds = array<i64: 1, 16, 64>}]} {
    %c0 = arith.constant 0 : index
    %c0_0 = arith.constant 0 : index
    %0 = vector.load %arg3[%c0, %c0_0] : memref<16x8xbf16, #tpu.memory_space<vmem>>, vector<16x8xbf16>
    %c0_1 = arith.constant 0 : index
    %c0_2 = arith.constant 0 : index
    %c0_3 = arith.constant 0 : index
    %1 = vector.load %arg2[%c0_1, %c0_2, %c0_3] : memref<1x8x64xbf16, #tpu.memory_space<vmem>>, vector<1x8x64xbf16>
    %2 = vector.shape_cast %1 : vector<1x8x64xbf16> to vector<8x64xbf16>
    %cst = arith.constant dense<0.000000e+00> : vector<16x64xf32>
    %3 = tpu.matmul %0, %2, %cst {dimension_numbers = #tpu.dot_dimension_numbers<[1], [0], [0], [1], [0, 0, 1, 1], [], []>} : vector<16x8xbf16>, vector<8x64xbf16>, vector<16x64xf32> -> vector<16x64xf32>
    %c0_4 = arith.constant 0 : index
    %c0_5 = arith.constant 0 : index
    %4 = vector.load %arg4[%c0_4, %c0_5] : memref<16x1xf32, #tpu.memory_space<vmem>>, vector<16x1xf32>
    %5 = vector.broadcast %4 : vector<16x1xf32> to vector<16x64xf32>
    %6 = arith.addf %3, %5 : vector<16x64xf32>
    %7 = arith.truncf %6 : vector<16x64xf32> to vector<16x64xbf16>
    %c0_6 = arith.constant 0 : index
    %c0_7 = arith.constant 0 : index
    %c0_8 = arith.constant 0 : index
    %8 = vector.load %arg5[%c0_6, %c0_7, %c0_8] : memref<1x16x64xbf16, #tpu.memory_space<vmem>>, vector<1x16x64xbf16>
    %9 = vector.shape_cast %8 : vector<1x16x64xbf16> to vector<16x64xbf16>
    %10 = vector.shape_cast %7 : vector<16x64xbf16> to vector<1x16x64xbf16>
    tpu.vector_store %arg5[%c0_6, %c0_7, %c0_8], %10 {strides = array<i32>} : memref<1x16x64xbf16, #tpu.memory_space<vmem>>, vector<1x16x64xbf16>,
    return
  }
  func.func @transform_0(%arg0: i32, %arg1: i32) -> (i32, i32, i32) {
    %c0_i32 = arith.constant 0 : i32
    %c0_i32_0 = arith.constant 0 : i32
    return %arg0, %c0_i32, %arg1 : i32, i32, i32
  }
  func.func @transform_1(%arg0: i32, %arg1: i32) -> (i32, i32) {
    %c0_i32 = arith.constant 0 : i32
    %c0_i32_0 = arith.constant 0 : i32
    %c0_i32_1 = arith.constant 0 : i32
    return %c0_i32, %c0_i32_0 : i32, i32
  }
  func.func @transform_2(%arg0: i32, %arg1: i32) -> (i32, i32) {
    %c0_i32 = arith.constant 0 : i32
    %c0_i32_0 = arith.constant 0 : i32
    %c0_i32_1 = arith.constant 0 : i32
    return %c0_i32, %c0_i32_0 : i32, i32
  }
  func.func @transform_3(%arg0: i32, %arg1: i32) -> (i32, i32, i32) {
    %c0_i32 = arith.constant 0 : i32
    %c0_i32_0 = arith.constant 0 : i32
    return %arg0, %c0_i32, %arg1 : i32, i32, i32
  }
}

module attributes {stable_mosaic.version = 11 : i64} {
  func.func @_double_conv_kernel(%arg0: i32, %arg1: memref<1x8x362xbf16, #tpu.memory_space<vmem>>, %arg2: memref<4x72xbf16, #tpu.memory_space<vmem>>, %arg3: memref<4x1xf32, #tpu.memory_space<vmem>>, %arg4: memref<4x1xf32, #tpu.memory_space<vmem>>, %arg5: memref<1x324xf32, #tpu.memory_space<vmem>>, %arg6: memref<4x36xbf16, #tpu.memory_space<vmem>>, %arg7: memref<4x1xf32, #tpu.memory_space<vmem>>, %arg8: memref<4x1xf32, #tpu.memory_space<vmem>>, %arg9: memref<1x4x324xbf16, #tpu.memory_space<vmem>>, %arg10: memref<4x362xbf16, #tpu.memory_space<vmem>>) attributes {dimension_semantics = [#tpu.dimension_semantics<parallel>], iteration_bounds = array<i64: 2>, scalar_prefetch = 0 : i64, scratch_operands = 1 : i64, tpu.core_type = #tpu.core_type<tc>, window_params = [{transform_indices = @transform_0, window_bounds = array<i64: 1, 8, 362>}, {pipeline_mode = #tpu.pipeline_mode<synchronous>, transform_indices = @transform_1, window_bounds = array<i64: 4, 72>}, {pipeline_mode = #tpu.pipeline_mode<synchronous>, transform_indices = @transform_2, window_bounds = array<i64: 4, 1>}, {pipeline_mode = #tpu.pipeline_mode<synchronous>, transform_indices = @transform_3, window_bounds = array<i64: 4, 1>}, {pipeline_mode = #tpu.pipeline_mode<synchronous>, transform_indices = @transform_4, window_bounds = array<i64: 1, 324>}, {pipeline_mode = #tpu.pipeline_mode<synchronous>, transform_indices = @transform_5, window_bounds = array<i64: 4, 36>}, {pipeline_mode = #tpu.pipeline_mode<synchronous>, transform_indices = @transform_6, window_bounds = array<i64: 4, 1>}, {pipeline_mode = #tpu.pipeline_mode<synchronous>, transform_indices = @transform_7, window_bounds = array<i64: 4, 1>}, {transform_indices = @transform_8, window_bounds = array<i64: 1, 4, 324>}]} {
    %c0 = arith.constant 0 : index
    %c0_0 = arith.constant 0 : index
    %c0_1 = arith.constant 0 : index
    %0 = vector.load %arg1[%c0, %c0_0, %c0_1] : memref<1x8x362xbf16, #tpu.memory_space<vmem>>, vector<1x8x324xbf16>
    %1 = vector.shape_cast %0 : vector<1x8x324xbf16> to vector<8x324xbf16>
    %c0_2 = arith.constant 0 : index
    %c0_3 = arith.constant 0 : index
    %c1 = arith.constant 1 : index
    %2 = vector.load %arg1[%c0_2, %c0_3, %c1] : memref<1x8x362xbf16, #tpu.memory_space<vmem>>, vector<1x8x324xbf16>
    %3 = vector.shape_cast %2 : vector<1x8x324xbf16> to vector<8x324xbf16>
    %c0_4 = arith.constant 0 : index
    %c0_5 = arith.constant 0 : index
    %c2 = arith.constant 2 : index
    %4 = vector.load %arg1[%c0_4, %c0_5, %c2] : memref<1x8x362xbf16, #tpu.memory_space<vmem>>, vector<1x8x324xbf16>
    %5 = vector.shape_cast %4 : vector<1x8x324xbf16> to vector<8x324xbf16>
    %c0_6 = arith.constant 0 : index
    %c0_7 = arith.constant 0 : index
    %c18 = arith.constant 18 : index
    %6 = vector.load %arg1[%c0_6, %c0_7, %c18] : memref<1x8x362xbf16, #tpu.memory_space<vmem>>, vector<1x8x324xbf16>
    %7 = vector.shape_cast %6 : vector<1x8x324xbf16> to vector<8x324xbf16>
    %c0_8 = arith.constant 0 : index
    %c0_9 = arith.constant 0 : index
    %c19 = arith.constant 19 : index
    %8 = vector.load %arg1[%c0_8, %c0_9, %c19] : memref<1x8x362xbf16, #tpu.memory_space<vmem>>, vector<1x8x324xbf16>
    %9 = vector.shape_cast %8 : vector<1x8x324xbf16> to vector<8x324xbf16>
    %c0_10 = arith.constant 0 : index
    %c0_11 = arith.constant 0 : index
    %c20 = arith.constant 20 : index
    %10 = vector.load %arg1[%c0_10, %c0_11, %c20] : memref<1x8x362xbf16, #tpu.memory_space<vmem>>, vector<1x8x324xbf16>
    %11 = vector.shape_cast %10 : vector<1x8x324xbf16> to vector<8x324xbf16>
    %c0_12 = arith.constant 0 : index
    %c0_13 = arith.constant 0 : index
    %c36 = arith.constant 36 : index
    %12 = vector.load %arg1[%c0_12, %c0_13, %c36] : memref<1x8x362xbf16, #tpu.memory_space<vmem>>, vector<1x8x324xbf16>
    %13 = vector.shape_cast %12 : vector<1x8x324xbf16> to vector<8x324xbf16>
    %c0_14 = arith.constant 0 : index
    %c0_15 = arith.constant 0 : index
    %c37 = arith.constant 37 : index
    %14 = vector.load %arg1[%c0_14, %c0_15, %c37] : memref<1x8x362xbf16, #tpu.memory_space<vmem>>, vector<1x8x324xbf16>
    %15 = vector.shape_cast %14 : vector<1x8x324xbf16> to vector<8x324xbf16>
    %c0_16 = arith.constant 0 : index
    %c0_17 = arith.constant 0 : index
    %c38 = arith.constant 38 : index
    %16 = vector.load %arg1[%c0_16, %c0_17, %c38] : memref<1x8x362xbf16, #tpu.memory_space<vmem>>, vector<1x8x324xbf16>
    %17 = vector.shape_cast %16 : vector<1x8x324xbf16> to vector<8x324xbf16>
    %18 = tpu.concatenate %1, %3, %5, %7, %9, %11, %13, %15, %17 in 0 : vector<8x324xbf16>, vector<8x324xbf16>, vector<8x324xbf16>, vector<8x324xbf16>, vector<8x324xbf16>, vector<8x324xbf16>, vector<8x324xbf16>, vector<8x324xbf16>, vector<8x324xbf16> -> vector<72x324xbf16>
    %c0_18 = arith.constant 0 : index
    %c0_19 = arith.constant 0 : index
    %19 = vector.load %arg2[%c0_18, %c0_19] : memref<4x72xbf16, #tpu.memory_space<vmem>>, vector<4x72xbf16>
    %cst = arith.constant dense<0.000000e+00> : vector<4x324xf32>
    %20 = tpu.matmul %19, %18, %cst {dimension_numbers = #tpu.dot_dimension_numbers<[1], [0], [0], [1], [0, 0, 1, 1], [], []>} : vector<4x72xbf16>, vector<72x324xbf16>, vector<4x324xf32> -> vector<4x324xf32>
    %c0_20 = arith.constant 0 : index
    %c0_21 = arith.constant 0 : index
    %21 = vector.load %arg3[%c0_20, %c0_21] : memref<4x1xf32, #tpu.memory_space<vmem>>, vector<4x1xf32>
    %22 = vector.broadcast %21 : vector<4x1xf32> to vector<4x324xf32>
    %23 = arith.mulf %20, %22 : vector<4x324xf32>
    %c0_22 = arith.constant 0 : index
    %c0_23 = arith.constant 0 : index
    %24 = vector.load %arg4[%c0_22, %c0_23] : memref<4x1xf32, #tpu.memory_space<vmem>>, vector<4x1xf32>
    %25 = vector.broadcast %24 : vector<4x1xf32> to vector<4x324xf32>
    %26 = arith.addf %23, %25 : vector<4x324xf32>
    %cst_24 = arith.constant 0.000000e+00 : f32
    %27 = vector.broadcast %cst_24 : f32 to vector<4x324xf32>
    %28 = arith.maximumf %26, %27 : vector<4x324xf32>
    %c0_25 = arith.constant 0 : index
    %c0_26 = arith.constant 0 : index
    %29 = vector.load %arg5[%c0_25, %c0_26] : memref<1x324xf32, #tpu.memory_space<vmem>>, vector<1x324xf32>
    %30 = vector.broadcast %29 : vector<1x324xf32> to vector<4x324xf32>
    %31 = arith.mulf %28, %30 : vector<4x324xf32>
    %cst_27 = arith.constant 0.000000e+00 : bf16
    %32 = vector.broadcast %cst_27 : bf16 to vector<4x19xbf16>
    %c0_28 = arith.constant 0 : index
    %c0_29 = arith.constant 0 : index
    %33 = vector.load %arg10[%c0_28, %c0_29] : memref<4x362xbf16, #tpu.memory_space<vmem>>, vector<4x19xbf16>
    tpu.vector_store %arg10[%c0_28, %c0_29], %32 {strides = array<i32>} : memref<4x362xbf16, #tpu.memory_space<vmem>>, vector<4x19xbf16>,
    %c0_30 = arith.constant 0 : index
    %c343 = arith.constant 343 : index
    %34 = vector.load %arg10[%c0_30, %c343] : memref<4x362xbf16, #tpu.memory_space<vmem>>, vector<4x19xbf16>
    tpu.vector_store %arg10[%c0_30, %c343], %32 {strides = array<i32>} : memref<4x362xbf16, #tpu.memory_space<vmem>>, vector<4x19xbf16>,
    %35 = arith.truncf %31 : vector<4x324xf32> to vector<4x324xbf16>
    %c0_31 = arith.constant 0 : index
    %c19_32 = arith.constant 19 : index
    %36 = vector.load %arg10[%c0_31, %c19_32] : memref<4x362xbf16, #tpu.memory_space<vmem>>, vector<4x324xbf16>
    tpu.vector_store %arg10[%c0_31, %c19_32], %35 {strides = array<i32>} : memref<4x362xbf16, #tpu.memory_space<vmem>>, vector<4x324xbf16>,
    %c0_33 = arith.constant 0 : index
    %c0_34 = arith.constant 0 : index
    %37 = vector.load %arg10[%c0_33, %c0_34] : memref<4x362xbf16, #tpu.memory_space<vmem>>, vector<4x324xbf16>
    %c0_35 = arith.constant 0 : index
    %c1_36 = arith.constant 1 : index
    %38 = vector.load %arg10[%c0_35, %c1_36] : memref<4x362xbf16, #tpu.memory_space<vmem>>, vector<4x324xbf16>
    %c0_37 = arith.constant 0 : index
    %c2_38 = arith.constant 2 : index
    %39 = vector.load %arg10[%c0_37, %c2_38] : memref<4x362xbf16, #tpu.memory_space<vmem>>, vector<4x324xbf16>
    %c0_39 = arith.constant 0 : index
    %c18_40 = arith.constant 18 : index
    %40 = vector.load %arg10[%c0_39, %c18_40] : memref<4x362xbf16, #tpu.memory_space<vmem>>, vector<4x324xbf16>
    %c0_41 = arith.constant 0 : index
    %c19_42 = arith.constant 19 : index
    %41 = vector.load %arg10[%c0_41, %c19_42] : memref<4x362xbf16, #tpu.memory_space<vmem>>, vector<4x324xbf16>
    %c0_43 = arith.constant 0 : index
    %c20_44 = arith.constant 20 : index
    %42 = vector.load %arg10[%c0_43, %c20_44] : memref<4x362xbf16, #tpu.memory_space<vmem>>, vector<4x324xbf16>
    %c0_45 = arith.constant 0 : index
    %c36_46 = arith.constant 36 : index
    %43 = vector.load %arg10[%c0_45, %c36_46] : memref<4x362xbf16, #tpu.memory_space<vmem>>, vector<4x324xbf16>
    %c0_47 = arith.constant 0 : index
    %c37_48 = arith.constant 37 : index
    %44 = vector.load %arg10[%c0_47, %c37_48] : memref<4x362xbf16, #tpu.memory_space<vmem>>, vector<4x324xbf16>
    %c0_49 = arith.constant 0 : index
    %c38_50 = arith.constant 38 : index
    %45 = vector.load %arg10[%c0_49, %c38_50] : memref<4x362xbf16, #tpu.memory_space<vmem>>, vector<4x324xbf16>
    %46 = tpu.concatenate %37, %38, %39, %40, %41, %42, %43, %44, %45 in 0 : vector<4x324xbf16>, vector<4x324xbf16>, vector<4x324xbf16>, vector<4x324xbf16>, vector<4x324xbf16>, vector<4x324xbf16>, vector<4x324xbf16>, vector<4x324xbf16>, vector<4x324xbf16> -> vector<36x324xbf16>
    %c0_51 = arith.constant 0 : index
    %c0_52 = arith.constant 0 : index
    %47 = vector.load %arg6[%c0_51, %c0_52] : memref<4x36xbf16, #tpu.memory_space<vmem>>, vector<4x36xbf16>
    %cst_53 = arith.constant dense<0.000000e+00> : vector<4x324xf32>
    %48 = tpu.matmul %47, %46, %cst_53 {dimension_numbers = #tpu.dot_dimension_numbers<[1], [0], [0], [1], [0, 0, 1, 1], [], []>} : vector<4x36xbf16>, vector<36x324xbf16>, vector<4x324xf32> -> vector<4x324xf32>
    %c0_54 = arith.constant 0 : index
    %c0_55 = arith.constant 0 : index
    %49 = vector.load %arg7[%c0_54, %c0_55] : memref<4x1xf32, #tpu.memory_space<vmem>>, vector<4x1xf32>
    %50 = vector.broadcast %49 : vector<4x1xf32> to vector<4x324xf32>
    %51 = arith.mulf %48, %50 : vector<4x324xf32>
    %c0_56 = arith.constant 0 : index
    %c0_57 = arith.constant 0 : index
    %52 = vector.load %arg8[%c0_56, %c0_57] : memref<4x1xf32, #tpu.memory_space<vmem>>, vector<4x1xf32>
    %53 = vector.broadcast %52 : vector<4x1xf32> to vector<4x324xf32>
    %54 = arith.addf %51, %53 : vector<4x324xf32>
    %cst_58 = arith.constant 0.000000e+00 : f32
    %55 = vector.broadcast %cst_58 : f32 to vector<4x324xf32>
    %56 = arith.maximumf %54, %55 : vector<4x324xf32>
    %c0_59 = arith.constant 0 : index
    %c0_60 = arith.constant 0 : index
    %57 = vector.load %arg5[%c0_59, %c0_60] : memref<1x324xf32, #tpu.memory_space<vmem>>, vector<1x324xf32>
    %58 = vector.broadcast %57 : vector<1x324xf32> to vector<4x324xf32>
    %59 = arith.mulf %56, %58 : vector<4x324xf32>
    %60 = arith.truncf %59 : vector<4x324xf32> to vector<4x324xbf16>
    %c0_61 = arith.constant 0 : index
    %c0_62 = arith.constant 0 : index
    %c0_63 = arith.constant 0 : index
    %61 = vector.load %arg9[%c0_61, %c0_62, %c0_63] : memref<1x4x324xbf16, #tpu.memory_space<vmem>>, vector<1x4x324xbf16>
    %62 = vector.shape_cast %61 : vector<1x4x324xbf16> to vector<4x324xbf16>
    %63 = vector.shape_cast %60 : vector<4x324xbf16> to vector<1x4x324xbf16>
    tpu.vector_store %arg9[%c0_61, %c0_62, %c0_63], %63 {strides = array<i32>} : memref<1x4x324xbf16, #tpu.memory_space<vmem>>, vector<1x4x324xbf16>,
    return
  }
  func.func @transform_0(%arg0: i32) -> (i32, i32, i32) {
    %c0_i32 = arith.constant 0 : i32
    %c0_i32_0 = arith.constant 0 : i32
    %c0_i32_1 = arith.constant 0 : i32
    return %arg0, %c0_i32, %c0_i32_0 : i32, i32, i32
  }
  func.func @transform_1(%arg0: i32) -> (i32, i32) {
    %c0_i32 = arith.constant 0 : i32
    %c0_i32_0 = arith.constant 0 : i32
    %c0_i32_1 = arith.constant 0 : i32
    return %c0_i32, %c0_i32_0 : i32, i32
  }
  func.func @transform_2(%arg0: i32) -> (i32, i32) {
    %c0_i32 = arith.constant 0 : i32
    %c0_i32_0 = arith.constant 0 : i32
    %c0_i32_1 = arith.constant 0 : i32
    return %c0_i32, %c0_i32_0 : i32, i32
  }
  func.func @transform_3(%arg0: i32) -> (i32, i32) {
    %c0_i32 = arith.constant 0 : i32
    %c0_i32_0 = arith.constant 0 : i32
    %c0_i32_1 = arith.constant 0 : i32
    return %c0_i32, %c0_i32_0 : i32, i32
  }
  func.func @transform_4(%arg0: i32) -> (i32, i32) {
    %c0_i32 = arith.constant 0 : i32
    %c0_i32_0 = arith.constant 0 : i32
    %c0_i32_1 = arith.constant 0 : i32
    return %c0_i32, %c0_i32_0 : i32, i32
  }
  func.func @transform_5(%arg0: i32) -> (i32, i32) {
    %c0_i32 = arith.constant 0 : i32
    %c0_i32_0 = arith.constant 0 : i32
    %c0_i32_1 = arith.constant 0 : i32
    return %c0_i32, %c0_i32_0 : i32, i32
  }
  func.func @transform_6(%arg0: i32) -> (i32, i32) {
    %c0_i32 = arith.constant 0 : i32
    %c0_i32_0 = arith.constant 0 : i32
    %c0_i32_1 = arith.constant 0 : i32
    return %c0_i32, %c0_i32_0 : i32, i32
  }
  func.func @transform_7(%arg0: i32) -> (i32, i32) {
    %c0_i32 = arith.constant 0 : i32
    %c0_i32_0 = arith.constant 0 : i32
    %c0_i32_1 = arith.constant 0 : i32
    return %c0_i32, %c0_i32_0 : i32, i32
  }
  func.func @transform_8(%arg0: i32) -> (i32, i32, i32) {
    %c0_i32 = arith.constant 0 : i32
    %c0_i32_0 = arith.constant 0 : i32
    %c0_i32_1 = arith.constant 0 : i32
    return %arg0, %c0_i32, %c0_i32_0 : i32, i32, i32
  }
}

module attributes {stable_mosaic.version = 11 : i64} {
  func.func @_efb_kernel(%arg0: i32, %arg1: memref<1x4x324xbf16, #tpu.memory_space<vmem>>, %arg2: memref<2x2xbf16, #tpu.memory_space<vmem>>, %arg3: memref<6x2xbf16, #tpu.memory_space<vmem>>, %arg4: memref<2x4xbf16, #tpu.memory_space<vmem>>, %arg5: memref<2x2x1xf32, #tpu.memory_space<vmem>>, %arg6: memref<2x2xbf16, #tpu.memory_space<vmem>>, %arg7: memref<2x2x1xf32, #tpu.memory_space<vmem>>, %arg8: memref<4x4xbf16, #tpu.memory_space<vmem>>, %arg9: memref<2x4x1xf32, #tpu.memory_space<vmem>>, %arg10: memref<1x4x324xf32, #tpu.memory_space<vmem>>) attributes {dimension_semantics = [#tpu.dimension_semantics<parallel>], iteration_bounds = array<i64: 2>, scalar_prefetch = 0 : i64, scratch_operands = 0 : i64, tpu.core_type = #tpu.core_type<tc>, window_params = [{transform_indices = @transform_0, window_bounds = array<i64: 1, 4, 324>}, {pipeline_mode = #tpu.pipeline_mode<synchronous>, transform_indices = @transform_1, window_bounds = array<i64: 2, 2>}, {pipeline_mode = #tpu.pipeline_mode<synchronous>, transform_indices = @transform_2, window_bounds = array<i64: 6, 2>}, {pipeline_mode = #tpu.pipeline_mode<synchronous>, transform_indices = @transform_3, window_bounds = array<i64: 2, 4>}, {pipeline_mode = #tpu.pipeline_mode<synchronous>, transform_indices = @transform_4, window_bounds = array<i64: 2, 2, 1>}, {pipeline_mode = #tpu.pipeline_mode<synchronous>, transform_indices = @transform_5, window_bounds = array<i64: 2, 2>}, {pipeline_mode = #tpu.pipeline_mode<synchronous>, transform_indices = @transform_6, window_bounds = array<i64: 2, 2, 1>}, {pipeline_mode = #tpu.pipeline_mode<synchronous>, transform_indices = @transform_7, window_bounds = array<i64: 4, 4>}, {pipeline_mode = #tpu.pipeline_mode<synchronous>, transform_indices = @transform_8, window_bounds = array<i64: 2, 4, 1>}, {transform_indices = @transform_9, window_bounds = array<i64: 1, 4, 324>}]} {
    %c0 = arith.constant 0 : index
    %c0_0 = arith.constant 0 : index
    %c0_1 = arith.constant 0 : index
    %0 = vector.load %arg1[%c0, %c0_0, %c0_1] : memref<1x4x324xbf16, #tpu.memory_space<vmem>>, vector<1x2x324xbf16>
    %1 = vector.shape_cast %0 : vector<1x2x324xbf16> to vector<2x324xbf16>
    %c0_2 = arith.constant 0 : index
    %c2 = arith.constant 2 : index
    %c0_3 = arith.constant 0 : index
    %2 = vector.load %arg1[%c0_2, %c2, %c0_3] : memref<1x4x324xbf16, #tpu.memory_space<vmem>>, vector<1x2x324xbf16>
    %3 = vector.shape_cast %2 : vector<1x2x324xbf16> to vector<2x324xbf16>
    %c0_4 = arith.constant 0 : index
    %c0_5 = arith.constant 0 : index
    %4 = vector.load %arg2[%c0_4, %c0_5] : memref<2x2xbf16, #tpu.memory_space<vmem>>, vector<2x2xbf16>
    %cst = arith.constant dense<0.000000e+00> : vector<2x324xf32>
    %5 = tpu.matmul %4, %1, %cst {dimension_numbers = #tpu.dot_dimension_numbers<[1], [0], [0], [1], [0, 0, 1, 1], [], []>} : vector<2x2xbf16>, vector<2x324xbf16>, vector<2x324xf32> -> vector<2x324xf32>
    %c0_6 = arith.constant 0 : index
    %c0_7 = arith.constant 0 : index
    %6 = vector.load %arg3[%c0_6, %c0_7] : memref<6x2xbf16, #tpu.memory_space<vmem>>, vector<6x2xbf16>
    %cst_8 = arith.constant dense<0.000000e+00> : vector<6x324xf32>
    %7 = tpu.matmul %6, %3, %cst_8 {dimension_numbers = #tpu.dot_dimension_numbers<[1], [0], [0], [1], [0, 0, 1, 1], [], []>} : vector<6x2xbf16>, vector<2x324xbf16>, vector<6x324xf32> -> vector<6x324xf32>
    %8 = vector.extract_strided_slice %7 {offsets = [0, 0], sizes = [2, 324], strides = [1, 1]} : vector<6x324xf32> to vector<2x324xf32>
    %9 = vector.extract_strided_slice %7 {offsets = [2, 0], sizes = [2, 324], strides = [1, 1]} : vector<6x324xf32> to vector<2x324xf32>
    %10 = vector.extract_strided_slice %7 {offsets = [4, 0], sizes = [2, 324], strides = [1, 1]} : vector<6x324xf32> to vector<2x324xf32>
    %11 = arith.truncf %8 : vector<2x324xf32> to vector<2x324xbf16>
    %12 = arith.truncf %9 : vector<2x324xf32> to vector<2x324xbf16>
    %cst_9 = arith.constant dense<0.000000e+00> : vector<2x2xf32>
    %13 = tpu.matmul %11, %12, %cst_9 {dimension_numbers = #tpu.dot_dimension_numbers<[1], [1], [0], [0], [0, 0, 1, 0], [], []>} : vector<2x324xbf16>, vector<2x324xbf16>, vector<2x2xf32> -> vector<2x2xf32>
    %cst_10 = arith.constant 0.001953125 : f32
    %14 = vector.broadcast %cst_10 : f32 to vector<2x2xf32>
    %15 = arith.mulf %13, %14 : vector<2x2xf32>
    %cst_11 = arith.constant dense<0xFF800000> : vector<2xf32>
    %16 = vector.multi_reduction <maximumf>, %15, %cst_11 [1] : vector<2x2xf32> to vector<2xf32>
    %17 = vector.shape_cast %16 : vector<2xf32> to vector<2x1xf32>
    %18 = vector.broadcast %17 : vector<2x1xf32> to vector<2x2xf32>
    %19 = arith.subf %15, %18 : vector<2x2xf32>
    %20 = math.exp %19 : vector<2x2xf32>
    %cst_12 = arith.constant dense<0.000000e+00> : vector<2xf32>
    %21 = vector.multi_reduction <add>, %20, %cst_12 [1] : vector<2x2xf32> to vector<2xf32>
    %22 = vector.shape_cast %21 : vector<2xf32> to vector<2x1xf32>
    %23 = vector.broadcast %22 : vector<2x1xf32> to vector<2x2xf32>
    %24 = arith.divf %20, %23 : vector<2x2xf32>
    %25 = arith.truncf %24 : vector<2x2xf32> to vector<2x2xbf16>
    %26 = arith.truncf %10 : vector<2x324xf32> to vector<2x324xbf16>
    %cst_13 = arith.constant dense<0.000000e+00> : vector<2x324xf32>
    %27 = tpu.matmul %25, %26, %cst_13 {dimension_numbers = #tpu.dot_dimension_numbers<[1], [0], [0], [1], [0, 0, 1, 1], [], []>} : vector<2x2xbf16>, vector<2x324xbf16>, vector<2x324xf32> -> vector<2x324xf32>
    %c0_14 = arith.constant 0 : index
    %c0_15 = arith.constant 0 : index
    %28 = vector.load %arg4[%c0_14, %c0_15] : memref<2x4xbf16, #tpu.memory_space<vmem>>, vector<2x4xbf16>
    %29 = arith.truncf %27 : vector<2x324xf32> to vector<2x324xbf16>
    %30 = tpu.concatenate %3, %29 in 0 : vector<2x324xbf16>, vector<2x324xbf16> -> vector<4x324xbf16>
    %cst_16 = arith.constant dense<0.000000e+00> : vector<2x324xf32>
    %31 = tpu.matmul %28, %30, %cst_16 {dimension_numbers = #tpu.dot_dimension_numbers<[1], [0], [0], [1], [0, 0, 1, 1], [], []>} : vector<2x4xbf16>, vector<4x324xbf16>, vector<2x324xf32> -> vector<2x324xf32>
    %c0_17 = arith.constant 0 : index
    %c0_18 = arith.constant 0 : index
    %c0_19 = arith.constant 0 : index
    %32 = vector.load %arg5[%c0_17, %c0_18, %c0_19] : memref<2x2x1xf32, #tpu.memory_space<vmem>>, vector<1x2x1xf32>
    %33 = vector.shape_cast %32 : vector<1x2x1xf32> to vector<2x1xf32>
    %c1 = arith.constant 1 : index
    %c0_20 = arith.constant 0 : index
    %c0_21 = arith.constant 0 : index
    %34 = vector.load %arg5[%c1, %c0_20, %c0_21] : memref<2x2x1xf32, #tpu.memory_space<vmem>>, vector<1x2x1xf32>
    %35 = vector.shape_cast %34 : vector<1x2x1xf32> to vector<2x1xf32>
    %cst_22 = arith.constant dense<0.000000e+00> : vector<324xf32>
    %36 = vector.multi_reduction <add>, %31, %cst_22 [0] : vector<2x324xf32> to vector<324xf32>
    %37 = vector.shape_cast %36 : vector<324xf32> to vector<1x324xf32>
    %cst_23 = arith.constant 2.000000e+00 : f32
    %38 = vector.broadcast %cst_23 : f32 to vector<1x324xf32>
    %39 = arith.divf %37, %38 : vector<1x324xf32>
    %40 = vector.broadcast %39 : vector<1x324xf32> to vector<2x324xf32>
    %41 = arith.subf %31, %40 : vector<2x324xf32>
    %42 = arith.mulf %41, %41 : vector<2x324xf32>
    %cst_24 = arith.constant dense<0.000000e+00> : vector<324xf32>
    %43 = vector.multi_reduction <add>, %42, %cst_24 [0] : vector<2x324xf32> to vector<324xf32>
    %44 = vector.shape_cast %43 : vector<324xf32> to vector<1x324xf32>
    %cst_25 = arith.constant 2.000000e+00 : f32
    %45 = vector.broadcast %cst_25 : f32 to vector<1x324xf32>
    %46 = arith.divf %44, %45 : vector<1x324xf32>
    %47 = vector.broadcast %39 : vector<1x324xf32> to vector<2x324xf32>
    %48 = arith.subf %31, %47 : vector<2x324xf32>
    %cst_26 = arith.constant 9.99999974E-6 : f32
    %49 = vector.broadcast %cst_26 : f32 to vector<1x324xf32>
    %50 = arith.addf %46, %49 : vector<1x324xf32>
    %51 = math.rsqrt %50 : vector<1x324xf32>
    %52 = vector.broadcast %51 : vector<1x324xf32> to vector<2x324xf32>
    %53 = arith.mulf %48, %52 : vector<2x324xf32>
    %54 = vector.broadcast %33 : vector<2x1xf32> to vector<2x324xf32>
    %55 = arith.mulf %53, %54 : vector<2x324xf32>
    %56 = vector.broadcast %35 : vector<2x1xf32> to vector<2x324xf32>
    %57 = arith.addf %55, %56 : vector<2x324xf32>
    %58 = arith.truncf %57 : vector<2x324xf32> to vector<2x324xbf16>
    %59 = arith.truncf %5 : vector<2x324xf32> to vector<2x324xbf16>
    %cst_27 = arith.constant dense<0.000000e+00> : vector<2x2xf32>
    %60 = tpu.matmul %59, %58, %cst_27 {dimension_numbers = #tpu.dot_dimension_numbers<[1], [1], [0], [0], [0, 0, 1, 0], [], []>} : vector<2x324xbf16>, vector<2x324xbf16>, vector<2x2xf32> -> vector<2x2xf32>
    %cst_28 = arith.constant 0.001953125 : f32
    %61 = vector.broadcast %cst_28 : f32 to vector<2x2xf32>
    %62 = arith.mulf %60, %61 : vector<2x2xf32>
    %cst_29 = arith.constant dense<0xFF800000> : vector<2xf32>
    %63 = vector.multi_reduction <maximumf>, %62, %cst_29 [1] : vector<2x2xf32> to vector<2xf32>
    %64 = vector.shape_cast %63 : vector<2xf32> to vector<2x1xf32>
    %65 = vector.broadcast %64 : vector<2x1xf32> to vector<2x2xf32>
    %66 = arith.subf %62, %65 : vector<2x2xf32>
    %67 = math.exp %66 : vector<2x2xf32>
    %cst_30 = arith.constant dense<0.000000e+00> : vector<2xf32>
    %68 = vector.multi_reduction <add>, %67, %cst_30 [1] : vector<2x2xf32> to vector<2xf32>
    %69 = vector.shape_cast %68 : vector<2xf32> to vector<2x1xf32>
    %70 = vector.broadcast %69 : vector<2x1xf32> to vector<2x2xf32>
    %71 = arith.divf %67, %70 : vector<2x2xf32>
    %72 = arith.truncf %71 : vector<2x2xf32> to vector<2x2xbf16>
    %cst_31 = arith.constant dense<0.000000e+00> : vector<2x324xf32>
    %73 = tpu.matmul %72, %58, %cst_31 {dimension_numbers = #tpu.dot_dimension_numbers<[1], [0], [0], [1], [0, 0, 1, 1], [], []>} : vector<2x2xbf16>, vector<2x324xbf16>, vector<2x324xf32> -> vector<2x324xf32>
    %74 = arith.negf %73 : vector<2x324xf32>
    %75 = math.exp %74 : vector<2x324xf32>
    %cst_32 = arith.constant 1.000000e+00 : f32
    %76 = vector.broadcast %cst_32 : f32 to vector<2x324xf32>
    %77 = arith.addf %76, %75 : vector<2x324xf32>
    %78 = arith.divf %76, %77 : vector<2x324xf32>
    %79 = arith.extf %1 : vector<2x324xbf16> to vector<2x324xf32>
    %80 = arith.mulf %79, %78 : vector<2x324xf32>
    %81 = arith.addf %80, %79 : vector<2x324xf32>
    %c0_33 = arith.constant 0 : index
    %c0_34 = arith.constant 0 : index
    %82 = vector.load %arg6[%c0_33, %c0_34] : memref<2x2xbf16, #tpu.memory_space<vmem>>, vector<2x2xbf16>
    %83 = arith.truncf %81 : vector<2x324xf32> to vector<2x324xbf16>
    %cst_35 = arith.constant dense<0.000000e+00> : vector<2x324xf32>
    %84 = tpu.matmul %82, %83, %cst_35 {dimension_numbers = #tpu.dot_dimension_numbers<[1], [0], [0], [1], [0, 0, 1, 1], [], []>} : vector<2x2xbf16>, vector<2x324xbf16>, vector<2x324xf32> -> vector<2x324xf32>
    %c0_36 = arith.constant 0 : index
    %c0_37 = arith.constant 0 : index
    %c0_38 = arith.constant 0 : index
    %85 = vector.load %arg7[%c0_36, %c0_37, %c0_38] : memref<2x2x1xf32, #tpu.memory_space<vmem>>, vector<1x2x1xf32>
    %86 = vector.shape_cast %85 : vector<1x2x1xf32> to vector<2x1xf32>
    %c1_39 = arith.constant 1 : index
    %c0_40 = arith.constant 0 : index
    %c0_41 = arith.constant 0 : index
    %87 = vector.load %arg7[%c1_39, %c0_40, %c0_41] : memref<2x2x1xf32, #tpu.memory_space<vmem>>, vector<1x2x1xf32>
    %88 = vector.shape_cast %87 : vector<1x2x1xf32> to vector<2x1xf32>
    %cst_42 = arith.constant dense<0.000000e+00> : vector<324xf32>
    %89 = vector.multi_reduction <add>, %84, %cst_42 [0] : vector<2x324xf32> to vector<324xf32>
    %90 = vector.shape_cast %89 : vector<324xf32> to vector<1x324xf32>
    %cst_43 = arith.constant 2.000000e+00 : f32
    %91 = vector.broadcast %cst_43 : f32 to vector<1x324xf32>
    %92 = arith.divf %90, %91 : vector<1x324xf32>
    %93 = vector.broadcast %92 : vector<1x324xf32> to vector<2x324xf32>
    %94 = arith.subf %84, %93 : vector<2x324xf32>
    %95 = arith.mulf %94, %94 : vector<2x324xf32>
    %cst_44 = arith.constant dense<0.000000e+00> : vector<324xf32>
    %96 = vector.multi_reduction <add>, %95, %cst_44 [0] : vector<2x324xf32> to vector<324xf32>
    %97 = vector.shape_cast %96 : vector<324xf32> to vector<1x324xf32>
    %cst_45 = arith.constant 2.000000e+00 : f32
    %98 = vector.broadcast %cst_45 : f32 to vector<1x324xf32>
    %99 = arith.divf %97, %98 : vector<1x324xf32>
    %100 = vector.broadcast %92 : vector<1x324xf32> to vector<2x324xf32>
    %101 = arith.subf %84, %100 : vector<2x324xf32>
    %cst_46 = arith.constant 9.99999974E-6 : f32
    %102 = vector.broadcast %cst_46 : f32 to vector<1x324xf32>
    %103 = arith.addf %99, %102 : vector<1x324xf32>
    %104 = math.rsqrt %103 : vector<1x324xf32>
    %105 = vector.broadcast %104 : vector<1x324xf32> to vector<2x324xf32>
    %106 = arith.mulf %101, %105 : vector<2x324xf32>
    %107 = vector.broadcast %86 : vector<2x1xf32> to vector<2x324xf32>
    %108 = arith.mulf %106, %107 : vector<2x324xf32>
    %109 = vector.broadcast %88 : vector<2x1xf32> to vector<2x324xf32>
    %110 = arith.addf %108, %109 : vector<2x324xf32>
    %c0_47 = arith.constant 0 : index
    %c0_48 = arith.constant 0 : index
    %111 = vector.load %arg8[%c0_47, %c0_48] : memref<4x4xbf16, #tpu.memory_space<vmem>>, vector<4x4xbf16>
    %112 = arith.truncf %110 : vector<2x324xf32> to vector<2x324xbf16>
    %113 = tpu.concatenate %112, %58 in 0 : vector<2x324xbf16>, vector<2x324xbf16> -> vector<4x324xbf16>
    %cst_49 = arith.constant dense<0.000000e+00> : vector<4x324xf32>
    %114 = tpu.matmul %111, %113, %cst_49 {dimension_numbers = #tpu.dot_dimension_numbers<[1], [0], [0], [1], [0, 0, 1, 1], [], []>} : vector<4x4xbf16>, vector<4x324xbf16>, vector<4x324xf32> -> vector<4x324xf32>
    %c0_50 = arith.constant 0 : index
    %c0_51 = arith.constant 0 : index
    %c0_52 = arith.constant 0 : index
    %115 = vector.load %arg9[%c0_50, %c0_51, %c0_52] : memref<2x4x1xf32, #tpu.memory_space<vmem>>, vector<1x4x1xf32>
    %116 = vector.shape_cast %115 : vector<1x4x1xf32> to vector<4x1xf32>
    %c1_53 = arith.constant 1 : index
    %c0_54 = arith.constant 0 : index
    %c0_55 = arith.constant 0 : index
    %117 = vector.load %arg9[%c1_53, %c0_54, %c0_55] : memref<2x4x1xf32, #tpu.memory_space<vmem>>, vector<1x4x1xf32>
    %118 = vector.shape_cast %117 : vector<1x4x1xf32> to vector<4x1xf32>
    %cst_56 = arith.constant dense<0.000000e+00> : vector<324xf32>
    %119 = vector.multi_reduction <add>, %114, %cst_56 [0] : vector<4x324xf32> to vector<324xf32>
    %120 = vector.shape_cast %119 : vector<324xf32> to vector<1x324xf32>
    %cst_57 = arith.constant 4.000000e+00 : f32
    %121 = vector.broadcast %cst_57 : f32 to vector<1x324xf32>
    %122 = arith.divf %120, %121 : vector<1x324xf32>
    %123 = vector.broadcast %122 : vector<1x324xf32> to vector<4x324xf32>
    %124 = arith.subf %114, %123 : vector<4x324xf32>
    %125 = arith.mulf %124, %124 : vector<4x324xf32>
    %cst_58 = arith.constant dense<0.000000e+00> : vector<324xf32>
    %126 = vector.multi_reduction <add>, %125, %cst_58 [0] : vector<4x324xf32> to vector<324xf32>
    %127 = vector.shape_cast %126 : vector<324xf32> to vector<1x324xf32>
    %cst_59 = arith.constant 4.000000e+00 : f32
    %128 = vector.broadcast %cst_59 : f32 to vector<1x324xf32>
    %129 = arith.divf %127, %128 : vector<1x324xf32>
    %130 = vector.broadcast %122 : vector<1x324xf32> to vector<4x324xf32>
    %131 = arith.subf %114, %130 : vector<4x324xf32>
    %cst_60 = arith.constant 9.99999974E-6 : f32
    %132 = vector.broadcast %cst_60 : f32 to vector<1x324xf32>
    %133 = arith.addf %129, %132 : vector<1x324xf32>
    %134 = math.rsqrt %133 : vector<1x324xf32>
    %135 = vector.broadcast %134 : vector<1x324xf32> to vector<4x324xf32>
    %136 = arith.mulf %131, %135 : vector<4x324xf32>
    %137 = vector.broadcast %116 : vector<4x1xf32> to vector<4x324xf32>
    %138 = arith.mulf %136, %137 : vector<4x324xf32>
    %139 = vector.broadcast %118 : vector<4x1xf32> to vector<4x324xf32>
    %140 = arith.addf %138, %139 : vector<4x324xf32>
    %cst_61 = arith.constant 0.000000e+00 : f32
    %141 = vector.broadcast %cst_61 : f32 to vector<4x324xf32>
    %142 = arith.maximumf %140, %141 : vector<4x324xf32>
    %c0_62 = arith.constant 0 : index
    %c0_63 = arith.constant 0 : index
    %c0_64 = arith.constant 0 : index
    %143 = vector.load %arg1[%c0_62, %c0_63, %c0_64] : memref<1x4x324xbf16, #tpu.memory_space<vmem>>, vector<1x4x324xbf16>
    %144 = vector.shape_cast %143 : vector<1x4x324xbf16> to vector<4x324xbf16>
    %145 = arith.extf %144 : vector<4x324xbf16> to vector<4x324xf32>
    %146 = arith.addf %142, %145 : vector<4x324xf32>
    %c0_65 = arith.constant 0 : index
    %c0_66 = arith.constant 0 : index
    %c0_67 = arith.constant 0 : index
    %147 = vector.load %arg10[%c0_65, %c0_66, %c0_67] : memref<1x4x324xf32, #tpu.memory_space<vmem>>, vector<1x4x324xf32>
    %148 = vector.shape_cast %147 : vector<1x4x324xf32> to vector<4x324xf32>
    %149 = vector.shape_cast %146 : vector<4x324xf32> to vector<1x4x324xf32>
    tpu.vector_store %arg10[%c0_65, %c0_66, %c0_67], %149 {strides = array<i32>} : memref<1x4x324xf32, #tpu.memory_space<vmem>>, vector<1x4x324xf32>,
    return
  }
  func.func @transform_0(%arg0: i32) -> (i32, i32, i32) {
    %c0_i32 = arith.constant 0 : i32
    %c0_i32_0 = arith.constant 0 : i32
    %c0_i32_1 = arith.constant 0 : i32
    return %arg0, %c0_i32, %c0_i32_0 : i32, i32, i32
  }
  func.func @transform_1(%arg0: i32) -> (i32, i32) {
    %c0_i32 = arith.constant 0 : i32
    %c0_i32_0 = arith.constant 0 : i32
    %c0_i32_1 = arith.constant 0 : i32
    return %c0_i32, %c0_i32_0 : i32, i32
  }
  func.func @transform_2(%arg0: i32) -> (i32, i32) {
    %c0_i32 = arith.constant 0 : i32
    %c0_i32_0 = arith.constant 0 : i32
    %c0_i32_1 = arith.constant 0 : i32
    return %c0_i32, %c0_i32_0 : i32, i32
  }
  func.func @transform_3(%arg0: i32) -> (i32, i32) {
    %c0_i32 = arith.constant 0 : i32
    %c0_i32_0 = arith.constant 0 : i32
    %c0_i32_1 = arith.constant 0 : i32
    return %c0_i32, %c0_i32_0 : i32, i32
  }
  func.func @transform_4(%arg0: i32) -> (i32, i32, i32) {
    %c0_i32 = arith.constant 0 : i32
    %c0_i32_0 = arith.constant 0 : i32
    %c0_i32_1 = arith.constant 0 : i32
    %c0_i32_2 = arith.constant 0 : i32
    return %c0_i32, %c0_i32_0, %c0_i32_1 : i32, i32, i32
  }
  func.func @transform_5(%arg0: i32) -> (i32, i32) {
    %c0_i32 = arith.constant 0 : i32
    %c0_i32_0 = arith.constant 0 : i32
    %c0_i32_1 = arith.constant 0 : i32
    return %c0_i32, %c0_i32_0 : i32, i32
  }
  func.func @transform_6(%arg0: i32) -> (i32, i32, i32) {
    %c0_i32 = arith.constant 0 : i32
    %c0_i32_0 = arith.constant 0 : i32
    %c0_i32_1 = arith.constant 0 : i32
    %c0_i32_2 = arith.constant 0 : i32
    return %c0_i32, %c0_i32_0, %c0_i32_1 : i32, i32, i32
  }
  func.func @transform_7(%arg0: i32) -> (i32, i32) {
    %c0_i32 = arith.constant 0 : i32
    %c0_i32_0 = arith.constant 0 : i32
    %c0_i32_1 = arith.constant 0 : i32
    return %c0_i32, %c0_i32_0 : i32, i32
  }
  func.func @transform_8(%arg0: i32) -> (i32, i32, i32) {
    %c0_i32 = arith.constant 0 : i32
    %c0_i32_0 = arith.constant 0 : i32
    %c0_i32_1 = arith.constant 0 : i32
    %c0_i32_2 = arith.constant 0 : i32
    return %c0_i32, %c0_i32_0, %c0_i32_1 : i32, i32, i32
  }
  func.func @transform_9(%arg0: i32) -> (i32, i32, i32) {
    %c0_i32 = arith.constant 0 : i32
    %c0_i32_0 = arith.constant 0 : i32
    %c0_i32_1 = arith.constant 0 : i32
    return %arg0, %c0_i32, %c0_i32_0 : i32, i32, i32
  }
}

</mosaic_0001>

<bundles_post_ra>
// kernel: tile.8
= control target key start
LH: loop header
LB: loop body
LE: loop exit
PB: predicated region body
PF: predicated region fallthrough
CT: control target
= control target key end

     0   :  { %s22_s0 = inlined_call_operand.vmem [shape: f32[4], index: 0, kind: input, shape index: {}]   ;;  %s23_s1 = inlined_call_operand.vmem [shape: f32[4,4], index: 1, kind: output, shape index: {}]  }
   0x1   :  { %v4_v0 = vld [vmem:[%s22_s0] ss:$0 sm:$0xff] }
   0x2   :  { %5 = vst [vmem:[%s23_s1] sm:$0xf] %v4_v0 }

// kernel: tile.0
= control target key start
LH: loop header
LB: loop body
LE: loop exit
PB: predicated region body
PF: predicated region fallthrough
CT: control target
= control target key end

     0   :  { %s95_s0 = inlined_call_operand.vmem [shape: f32[4,4], index: 0, kind: input, shape index: {}]   ;;  %s96_s1 = inlined_call_operand.hbm [shape: f32[16,1], index: 1, kind: output, shape index: {}]  }
   0x1   :  { %v5_v0 = vld [vmem:[%s95_s0] sm:$0xf] }
   0x2   :  { %6 = vst [vmem:[#allocation2] sm:$0xf] %v5_v0 }
   0x3   :  { %2 = vsyncpa [#allocation1], 0  ;;  %s66_s0 = smov 127   ;;  %s67_s8 = smov 125   ;;  %vm8_vm0 = vcmask 7168  }
   0x4   :  { %s68_s9 = smov 126   ;;  %s69_s10 = smov [#allocation0]  }
   0x5   :  { %s32_s11 = sshll.u32 %s69_s10, 4  ;;  %s33_s11 = int_to_ptr.vmem [resolvable:$true] %s32_s11 }
   0x6   :  { %s42_s12 = scalar_lea.vmem %s33_s11, 256  ;;  %p47_p1 = scmp.lt.s32.totalorder %s33_s11, %s33_s11 }
   0x7   :  { %p43_p0 = scmp.ne.s32.totalorder %s33_s11, %s42_s12  ;;  %p48_p2 = scmp.lt.s32.totalorder %s42_s12, %s42_s12 }
   0x9   :  { %v10_v1 = vld [vmem:[#allocation2] sm:$0xf]   ;;  %p49_p3 = por %p48_p2, %p47_p1 }
   0xa   :  { %v22_v2 = vld [vmem:[#allocation2] sm:$0xf]   ;;  %11 = vrot.lane.b32.xlu0 %v10_v1, %s66_s0 }
   0xb   :  { %23 = vrot.lane.b32.xlu1 %v22_v2, %s67_s8  ;;  %v7_v3 = vld [vmem:[#allocation2] sm:$0xf]   ;;  %p50_p4 = pnand %p49_p3, %p43_p0 }
   0xc   :  { %v16_v4 = vld [vmem:[#allocation2] sm:$0xf]   ;;  %9 = vst.msk [vmem:[#allocation0] ss:$4 sm:$0xf] %vm8_vm0, %v7_v3  }
   0xe   :  { %17 = vrot.lane.b32.xlu0 %v16_v4, %s68_s9 }
  0x7c   :  { %v12_v5 = vpop.permute.xlu0 %11  }
  0x7d   :  { %v24_v6 = vpop.permute.xlu1 %23   ;;  %15 = vst.msk [vmem:[#allocation0 + $0x1] ss:$4 sm:$0xf] %vm8_vm0, %v12_v5  }
  0x7e   :  { %27 = vst.msk [vmem:[#allocation0 + $0x3] ss:$4 sm:$0xf] %vm8_vm0, %v24_v6  }
  0x80   :  { %v18_v7 = vpop.permute.xlu0 %17  }
  0x81   :  { %21 = vst.msk [vmem:[#allocation0 + $0x2] ss:$4 sm:$0xf] %vm8_vm0, %v18_v7  }
  0x82   :  { %53 = shalt.err (!%p50_p4)
}
  0x83   :  { %s54_s15 = scalar_lea.hbm %s96_s1, 256 }
  0x84   :  { %p55_p5 = scmp.ne.s32.totalorder %s96_s1, %s54_s15  ;;  %p58_p6 = scmp.lt.u32.totalorder %s54_s15, %s96_s1 }
  0x86   :  { %p60_p7 = pnand %p58_p6, %p55_p5 }
  0x88   :  { %63 = shalt.err (!%p60_p7)
}
  0x89   :  { %35 = dma.vmem_to_hbm [thread:$0]  %s33_s11, 256, %s96_s1, [#allocation1]  }
  0x8a   :  { %64 = dma.done.wait [#allocation1], 256  }
  0x8b   :  { %65 = vsyncadd [#allocation1], 4294967040 }
  0x8c   :  { %37 = vsyncpa [#allocation1], 1 }

// kernel: upscaling_forward.3
= control target key start
LH: loop header
LB: loop body
LE: loop exit
PB: predicated region body
PF: predicated region fallthrough
CT: control target
= control target key end

     0   :  { %8 = vsyncpa [#allocation3], 0  ;;  %s1018_s0 = inlined_call_operand.hbm [shape: bf16[2,8,64], index: 0, kind: input, shape index: {}]   ;;  %s1019_s1 = inlined_call_operand.hbm [shape: bf16[16,8], index: 1, kind: input, shape index: {}]   ;;  %s1020_s2 = inlined_call_operand.hbm [shape: f32[16,1], index: 2, kind: input, shape index: {}]   ;;  %s1021_s3 = inlined_call_operand.hbm [shape: bf16[2,16,64], index: 3, kind: output, shape index: {}]  }
   0x1   :  { %10 = vsyncpa [#allocation3 + $0x1], 0 }
   0x2   :  { %11 = vsyncpa [#allocation6], 0 }
   0x3   :  { %12 = vsyncpa [#allocation4], 0 }
   0x4   :  { %14 = vsyncpa [#allocation4 + $0x1], 0  ;;  %s765_s12 = smov 0   ;;  %s767_s13 = smov 0  }
   0x5   :  { %s769_s14 = smov 0   ;;  %s771_s15 = smov 0  }
   0x6   :  { %s773_s16 = smov 0   ;;  %s775_s17 = smov 0  }
   0x7 LB: > { %s431_s18 = sadd.s32 4294967295, %s730_s17   ;;  %s432_s19 = sadd.s32 4294967294, %s730_s17   ;;  %s730_s17 = sphi %s775_s17, %s20_s17   ;;  %s726_s16 = sphi %s773_s16, %s1043_s16   ;;  %s722_s15 = sphi %s771_s15, %s1042_s15   ;;  %s718_s14 = sphi %s769_s14, %s1041_s14   ;;  %s714_s13 = sphi %s767_s13, %s1040_s13   ;;  %s710_s12 = sphi %s765_s12, %s1039_s12  }
   0x8   : > { %p54_p0 = scmp.ne.s32.totalorder %s714_s13, %s710_s12  ;;  %p799_p1 = scmp.eq.s32.totalorder %s431_s18, 0 }
   0x9   : > { %p803_p2 = scmp.eq.s32.totalorder %s431_s18, 1  ;;  %p128_p3 = scmp.eq.s32.totalorder %s432_s19, 1 }
   0xa   : > { %s1026_s20 = scalar_select %p799_p1, 1, 0 }
   0xb   : > { %p809_p4 = por %p799_p1, %p54_p0  ;;  %p433_p5 = scmp.ge.s32.totalorder %s730_s17, 1 }
   0xc   : > { %p814_p6 = por %p128_p3, %p54_p0  ;;  %p135_p7 = scmp.lt.s32.totalorder %s730_s17, 3 }
   0xd   : > { %s1028_s22 = scalar_select %p809_p4, 1, 0 }
   0xe   : > { %s1029_s23 = scalar_select %p814_p6, 1, 0 }
   0xf   : > { %p819_p8 = pnand %p433_p5, %p135_p7  ;;  %s732_s25 = smov [#allocation5]  }
  0x10   : > { %s147_s26 = sshll.u32 %s732_s25, 4  ;;  %s733_s28 = smov [#allocation7]   ;;  %s823_s26 = int_to_ptr.vmem [resolvable:$true] %s147_s26 }
  0x11   : > { %p476_p9 = pneg %p819_p8  ;;  %s160_s29 = sshll.u32 %s733_s28, 4  ;;  %s834_s29 = int_to_ptr.vmem [resolvable:$true] %s160_s29 }
  0x12   : > { %s558_s5 = scalar_lea.hbm %s1019_s1, 128 }
  0x13   : > { %p830_p11 = pnand %p476_p9, %p799_p1  ;;  %p559_p12 = scmp.ne.s32.totalorder %s1019_s1, %s558_s5 }
  0x14   : > { %p565_p5 = scmp.lt.u32.totalorder %s558_s5, %s1019_s1 }
  0x15   : > { %p560_p13 = pneg %p830_p11 }
  0x17   : > { %p561_p0 = pnand %p560_p13, %p559_p12 }
  0x19   : > { %p562_p3 = pneg %p561_p0 }
  0x1b   : > { %p567_p7 = pnand %p565_p5, %p562_p3 }
  0x1d   : > { %570 = shalt.err (!%p567_p7)
}
  0x1e   : > { %s571_s10 = scalar_lea.vmem %s823_s26, 128  ;;  %p579_p1 = scmp.lt.s32.totalorder %s823_s26, %s823_s26 }
  0x1f   : > { %p572_p9 = scmp.ne.s32.totalorder %s823_s26, %s571_s10  ;;  %p580_p12 = scmp.lt.s32.totalorder %s571_s10, %s571_s10 }
  0x21   : > { %p574_p10 = pnand %p572_p9, %p560_p13  ;;  %p581_p0 = por %p580_p12, %p579_p1 }
  0x23   : > { %p575_p6 = pneg %p574_p10 }
  0x25   : > { %p582_p4 = pnand %p581_p0, %p575_p6 }
  0x27   : > { %585 = shalt.err (!%p582_p4)
}
  0x28   : > { %s734_s11 = smov 64   ;;  %s735_s18 = smov 4  }
  0x29   : > { %479 = dma.hbm_to_vmem [thread:$0]  (!%p830_p11), %s1019_s1, 128, %s823_s26, [#allocation6], %s734_s11, %s734_s11, %s735_s18  }
  0x2a   : > { %s586_s4 = scalar_lea.hbm %s1020_s2, 256 }
  0x2b   : > { %p587_p1 = scmp.ne.s32.totalorder %s1020_s2, %s586_s4  ;;  %p593_p10 = scmp.lt.u32.totalorder %s586_s4, %s1020_s2 }
  0x2d   : > { %p589_p4 = pnand %p587_p1, %p560_p13 }
  0x2f   : > { %p590_p6 = pneg %p589_p4 }
  0x31   : > { %p595_p3 = pnand %p593_p10, %p590_p6 }
  0x33   : > { %598 = shalt.err (!%p595_p3)
}
  0x34   : > { %s599_s26 = scalar_lea.vmem %s834_s29, 256  ;;  %p607_p12 = scmp.lt.s32.totalorder %s834_s29, %s834_s29 }
  0x35   : > { %p600_p5 = scmp.ne.s32.totalorder %s834_s29, %s599_s26  ;;  %p608_p0 = scmp.lt.s32.totalorder %s599_s26, %s599_s26 }
  0x37   : > { %p602_p7 = pnand %p600_p5, %p560_p13  ;;  %p609_p1 = por %p608_p0, %p607_p12 }
  0x39   : > { %p603_p9 = pneg %p602_p7 }
  0x3b   : > { %p610_p4 = pnand %p609_p1, %p603_p9 }
  0x3d   : > { %613 = shalt.err (!%p610_p4)
}
  0x3e   : > { %s736_s9 = smov 128   ;;  %s737_s10 = smov 8  }
  0x3f   : > { %482 = dma.hbm_to_vmem [thread:$0]  (!%p830_p11), %s1020_s2, 256, %s834_s29, [#allocation6], %s736_s9, %s736_s9, %s737_s10  }
  0x40   : > { %s32_s19 = sadd.s32 1, %s726_s16  ;;  %s41_s25 = sadd.s32 1, %s718_s14 }
  0x41   : > { %p34_p13 = scmp.ge.s32.totalorder %s32_s19, 2  ;;  %p48_p6 = scmp.ne.s32.totalorder %s718_s14, %s714_s13 }
  0x42   : > { %p49_p10 = scmp.eq.s32.totalorder %s730_s17, 0  ;;  %p493_p3 = scmp.lt.s32.totalorder %s730_s17, 2 }
  0x43   : > { %s1045_s19 = smov (%p34_p13, %s32_s19), 0  ;;  %p898_p7 = por %p803_p2, %p48_p6 }
  0x44   : > { %p50_p5 = por %p49_p10, %p48_p6  ;;  %s36_s27 = ssub.s32 %s726_s16, %s1045_s19 }
  0x45   : > { %s1032_s28 = scalar_select %p898_p7, 1, 0 }
  0x46   : > { %s174_s30 = sand.u32 1, %s718_s14   ;;  %p39_p9 = scmp.eq.s32.totalorder %s36_s27, 0 }
  0x47   : > { %s437_s29 = sshll.u32 %s174_s30, 2  ;;  %s438_s4 = sshll.u32 %s726_s16, 6 }
  0x48   : > { %s907_s5 = scalar_select %p39_p9, %s718_s14, %s41_s25  }
  0x49   : > { %s912_s8 = scalar_lea.hbm %s1018_s0, %s438_s4  ;;  %s178_s21 = scalar_lea.vmem [#allocation2], %s437_s29 }
  0x4a   : > { %s186_s26 = sshll.u32 %s178_s21, 4  ;;  %p916_p2 = pnand %p493_p3, %p50_p5  ;;  %s920_s26 = int_to_ptr.vmem [resolvable:$true] %s186_s26 }
  0x4b   : > { %s175_s10 = scalar_lea.sflag [#allocation3], %s174_s30  ;;  %s614_s11 = scalar_lea.hbm %s912_s8, 64 }
  0x4c   : > { %p615_p11 = scmp.ne.s32.totalorder %s912_s8, %s614_s11  ;;  %p616_p12 = pneg %p916_p2 }
  0x4d   : > { %s619_s27 = scalar_lea.hbm %s1018_s0, 128  ;;  %p620_p4 = scmp.lt.u32.totalorder %s912_s8, %s1018_s0 }
  0x4e   : > { %p617_p0 = pnand %p616_p12, %p615_p11  ;;  %p621_p13 = scmp.lt.u32.totalorder %s619_s27, %s614_s11 }
  0x4f   : > { %p623_p10 = scmp.lt.u32.totalorder %s614_s11, %s912_s8 }
  0x50   : > { %p618_p1 = pneg %p617_p0  ;;  %p622_p6 = por %p621_p13, %p620_p4 }
  0x52   : > { %p624_p3 = por %p623_p10, %p622_p6 }
  0x54   : > { %p625_p5 = pnand %p624_p3, %p618_p1 }
  0x56   : > { %628 = shalt.err (!%p625_p5)
}
  0x57   : > { %s629_s30 = scalar_lea.vmem %s920_s26, 64  ;;  %s738_s6 = smov [#allocation2]  }
  0x58   : > { %p630_p9 = scmp.ne.s32.totalorder %s920_s26, %s629_s30  ;;  %s634_s7 = sshll.u32 %s738_s6, 4  ;;  %s635_s7 = int_to_ptr.vmem [resolvable:$false] %s634_s7 }
  0x59   : > { %s636_s21 = scalar_lea.vmem %s635_s7, 128  ;;  %p637_p7 = scmp.lt.s32.totalorder %s920_s26, %s635_s7 }
  0x5a   : > { %p632_p11 = pnand %p630_p9, %p616_p12  ;;  %p638_p4 = scmp.lt.s32.totalorder %s636_s21, %s629_s30 }
  0x5c   : > { %p633_p0 = pneg %p632_p11  ;;  %p639_p13 = por %p638_p4, %p637_p7 }
  0x5e   : > { %p640_p6 = pnand %p639_p13, %p633_p0 }
  0x60   : > { %643 = shalt.err (!%p640_p6)
}
  0x61   : > { %486 = dma.hbm_to_vmem [thread:$0]  (!%p916_p2), %s912_s8, 64, %s920_s26, %s175_s10  }
  0x62   : > { %195 = sbr.rel (%p819_p8) target bundleno = 348 (0x15c), region = 32  ;;  %s950_s11 = sand.u32 (!%p819_p8), 1, %s714_s13  }
  0x63   : > { %s440_s18 = sshll.u32 (!%p819_p8), %s950_s11, 2  ;;  %s198_s25 = scalar_lea.sflag (!%p819_p8), [#allocation3], %s950_s11 }
  0x64   : > { %s201_s27 = scalar_lea.vmem (!%p819_p8), [#allocation2], %s440_s18  ;;  %p1034_p7 = scmp.ne.s32.totalorder (!%p819_p8), %s1028_s22, 0 }
  0x69   : > { %697 = dma.done.wait (%p1034_p7), %s198_s25, 64  }
  0x6a   : > { %699 = vsyncadd (%p1034_p7), %s198_s25, 4294967232  ;;  %p1035_p12 = scmp.ne.s32.totalorder %s1026_s20, 0 }
  0x6c   : > { %701 = dma.done.wait (%p1035_p12), [#allocation6], 384  }
  0x6d   : > { %703 = vsyncadd (%p1035_p12), [#allocation6], 4294966912  ;;  %v739_v0 = vmov 0.0   ;;  %vm740_vm0 = vmmov 0   ;;  %v741_v1 = vmov 0   ;;  %vm257_vm1 = vcmask 1043456  }
  0x6e   : > { %458 = vmatprep.subr.bf16.mxu0 %v739_v0  ;;  %460 = vmatprep.mubr.msk.bf16.mxu0 %vm740_vm0, %v739_v0  ;;  %v235_v2 = vld [vmem:[%s201_s27] sm:$0xf]  ;;  %v557_v4 = vld [vmem:[#allocation5] sm:$0xff]   ;;  %v236_v5 = vld [vmem:[#allocation7] sm:$0xff]  ;;  %vm253_vm2 = vcmask 64512   ;;  %s443_s20 = sshll.u32 %s950_s11, 3 }
  0x6f   : > { %556 = vset.pattern.permute.xlu0 %v741_v1  ;;  %v259_v3 = vsel %vm257_vm1, %v235_v2, 0  ;;  %v237_v6 = vld [vmem:[#allocation7 + $0x8] sm:$0xff]  ;;  %s231_s22 = scalar_lea.vmem [#allocation8], %s443_s20  ;;  %s455_s8 = sshll.u32 %s722_s15, 7  ;;  %vm310_vm3 = vcmask 519168  }
  0x70   : > { %459 = vmatpush3.bf16.msra.mxu0 %v259_v3  ;;  %240 = vperm.xlu0 %556, %v236_v5   ;;  %s328_s24 = sshll.u32 %s231_s22, 4  ;;  %s967_s10 = scalar_lea.hbm %s1021_s3, %s455_s8  ;;  %s969_s24 = int_to_ptr.vmem [resolvable:$true] %s328_s24 }
  0x71   : > { %s314_s15 = scalar_lea.sflag [#allocation4], %s950_s11  ;;  %s644_s29 = scalar_lea.vmem %s969_s24, 128 }
  0x72   : > { %p645_p8 = scmp.ne.s32.totalorder %s969_s24, %s644_s29  ;;  %p1036_p2 = scmp.ne.s32.totalorder %s1032_s28, 0 }
  0x73   : > { %461 = vmatmul.mubr.msk.bf16.vlgmr.msra.gmra.mrb[0].mxu0 %vm253_vm2, %v557_v4  ;;  %s742_s4 = smov [#allocation8]  }
  0x74   : > { %245 = vperm.xlu0 %556, %v237_v6   ;;  %p646_p1 = pnand %p645_p8, %p1036_p2  ;;  %s648_s30 = sshll.u32 %s742_s4, 4  ;;  %s649_s30 = int_to_ptr.vmem [resolvable:$false] %s648_s30 }
  0x75   : > { %s650_s6 = scalar_lea.vmem %s649_s30, 256  ;;  %p651_p3 = scmp.lt.s32.totalorder %s969_s24, %s649_s30 }
  0x76   : > { %p647_p10 = pneg %p646_p1  ;;  %p652_p5 = scmp.lt.s32.totalorder %s650_s6, %s644_s29 }
  0x78   : > { %p653_p9 = por %p652_p5, %p651_p3 }
  0x7a   : > { %p654_p11 = pnand %p653_p9, %p647_p10 }
  0xef   : > { %v241_v7 = vpop.permute.xlu0 %240 }
  0xf3   : > { %v246_v11 = vpop.permute.xlu0 %245 }
 0x146   : > { %v295_v8 = vpop.f32.mrb[0].mxu0 }
 0x147   : > { %v296_v9 = vadd.f32 %v295_v8, %v241_v7  ;;  %v462_v10 = vpop.f32.mrb[1].mxu0 }
 0x148   : > { %v298_v12 = vpop.f32.mrb[2].mxu0 }
 0x149   : > { %v453_v13 = vpack.c.bf16 %v296_v9, %v296_v9  ;;  %v299_v14 = vadd.f32 %v298_v12, %v246_v11  ;;  %v463_v15 = vpop.f32.mrb[3].mxu0 }
 0x14b   : > { %311 = vst.msk [vmem:[%s231_s22] sm:$0xf] %vm310_vm3, %v453_v13  ;;  %v454_v16 = vpack.c.bf16 %v299_v14, %v299_v14 }
 0x14d   : > { %312 = vst.msk [vmem:[%s231_s22 + $0x4] sm:$0xf] %vm310_vm3, %v454_v16 }
 0x14e   : > { %657 = shalt.err (!%p654_p11)
}
 0x14f   : > { %s658_s7 = scalar_lea.hbm %s967_s10, 128  ;;  %s662_s25 = scalar_lea.hbm %s1021_s3, 256 }
 0x150   : > { %p659_p0 = scmp.ne.s32.totalorder %s967_s10, %s658_s7  ;;  %p663_p6 = scmp.lt.u32.totalorder %s967_s10, %s1021_s3 }
 0x151   : > { %p664_p7 = scmp.lt.u32.totalorder %s662_s25, %s658_s7  ;;  %p666_p8 = scmp.lt.u32.totalorder %s658_s7, %s967_s10 }
 0x152   : > { %p660_p4 = pnand %p659_p0, %p1036_p2 }
 0x153   : > { %p665_p12 = por %p664_p7, %p663_p6 }
 0x154   : > { %p661_p13 = pneg %p660_p4 }
 0x155   : > { %p667_p1 = por %p666_p8, %p665_p12 }
 0x157   : > { %p668_p10 = pnand %p667_p1, %p661_p13 }
 0x159   : > { %671 = shalt.err (!%p668_p10)
}
 0x15a   : > { %s743_s22 = smov 64   ;;  %s744_s8 = smov 4  }
 0x15b   : > { %474 = dma.vmem_to_hbm [thread:$0]  (%p1036_p2), %s969_s24, 128, %s967_s10, %s314_s15, %s743_s22, %s743_s22, %s744_s8  }
 0x15c PF: > { %s343_s26 = sand.u32 1, %s710_s12   ;;  %p1037_p3 = scmp.ne.s32.totalorder %s1029_s23, 0 }
 0x15d   : > { %p1038_p5 = scmp.ge.s32.totalorder %s730_s17, 2  ;;  %s344_s9 = scalar_lea.sflag [#allocation4], %s343_s26 }
 0x15f   : > { %p488_p9 = pnand %p1038_p5, %p1037_p3 }
 0x161   : > { %705 = dma.done.wait (!%p488_p9), %s344_s9, 128  }
 0x162   : > { %707 = vsyncadd (!%p488_p9), %s344_s9, 4294967168  ;;  %s20_s17 = sadd.s32 1, %s730_s17   ;;  %s1039_s12 = smov %s714_s13 }
 0x163   : > { %p17_p11 = scmp.ge.s32.totalorder %s20_s17, 4   ;;  %s1040_s13 = smov %s718_s14 }
 0x164   : > { %s1041_s14 = smov %s907_s5  ;;  %s1042_s15 = smov %s726_s16 }
 0x165   : > { %s1043_s16 = smov %s1045_s19  ;;  %19 = sbr.rel (!%p17_p11) target bundleno = 7 (0x7), region = 85 }
 0x16c   :  { %349 = vsyncpa [#allocation3], 1 }
 0x16d   :  { %351 = vsyncpa [#allocation3 + $0x1], 1 }
 0x16e   :  { %352 = vsyncpa [#allocation6], 1 }
 0x16f   :  { %353 = vsyncpa [#allocation4], 1 }
 0x170   :  { %355 = vsyncpa [#allocation4 + $0x1], 1 }

// kernel: upscaling_forward.4
= control target key start
LH: loop header
LB: loop body
LE: loop exit
PB: predicated region body
PF: predicated region fallthrough
CT: control target
= control target key end

     0   :  { %s2278_s0 = inlined_call_operand.hbm [shape: bf16[2,8,362], index: 0, kind: input, shape index: {}]   ;;  %s2279_s1 = inlined_call_operand.hbm [shape: bf16[4,72], index: 1, kind: input, shape index: {}]   ;;  %s2280_s2 = inlined_call_operand.hbm [shape: f32[4,1], index: 2, kind: input, shape index: {}]   ;;  %s2281_s3 = inlined_call_operand.hbm [shape: f32[4,1], index: 3, kind: input, shape index: {}]   ;;  %s2282_s4 = inlined_call_operand.hbm [shape: f32[1,324], index: 4, kind: input, shape index: {}]   ;;  %s2283_s5 = inlined_call_operand.hbm [shape: bf16[4,36], index: 5, kind: input, shape index: {}]   ;;  %s2284_s6 = inlined_call_operand.hbm [shape: f32[4,1], index: 6, kind: input, shape index: {}]   ;;  %s2285_s7 = inlined_call_operand.hbm [shape: f32[4,1], index: 7, kind: input, shape index: {}]   ;;  %s2286_s8 = inlined_call_operand.hbm [shape: bf16[2,4,324], index: 8, kind: output, shape index: {}]  }
   0x1   :  { %2290 = sst [smem:[#allocation24_spill]] %s2279_s1 }
   0x2   :  { %2291 = sst [smem:[#allocation25_spill]] %s2280_s2 }
   0x3   :  { %13 = vsyncpa [#allocation4], 0 }
   0x4   :  { %15 = vsyncpa [#allocation4 + $0x1], 0 }
   0x5   :  { %16 = vsyncpa [#allocation7], 0 }
   0x6   :  { %17 = vsyncpa [#allocation10], 0 }
   0x7   :  { %18 = vsyncpa [#allocation13], 0 }
   0x8   :  { %19 = vsyncpa [#allocation16], 0 }
   0x9   :  { %20 = vsyncpa [#allocation5], 0 }
   0xa   :  { %22 = vsyncpa [#allocation5 + $0x1], 0  ;;  %s1761_s27 = smov 0   ;;  %s1763_s28 = smov 0  }
   0xb   :  { %s1765_s29 = smov 0   ;;  %s1767_s30 = smov 0  }
   0xc LB: > { %s1694_s9 = smov [#allocation6]   ;;  %s1782_s11 = sadd.s32 4294967295, %s1692_s30   ;;  %s1692_s30 = sphi %s1767_s30, %s2317_s30   ;;  %s1688_s29 = sphi %s1765_s29, %s2316_s29   ;;  %s1684_s28 = sphi %s1763_s28, %s2315_s28   ;;  %s1680_s27 = sphi %s1761_s27, %s2314_s27  }
   0xd   : > { %s245_s10 = sshll.u32 %s1694_s9, 4  ;;  %p1176_p0 = scmp.ge.s32.totalorder %s1692_s30, 1  ;;  %s1787_s10 = int_to_ptr.vmem [resolvable:$true] %s245_s10 }
   0xe   : > { %p2287_p1 = scmp.eq.s32.totalorder %s1782_s11, 0  ;;  %p232_p2 = scmp.lt.s32.totalorder %s1692_s30, 3 }
   0xf   : > { %s1695_s13 = smov [#allocation9]   ;;  %s1696_s15 = smov [#allocation12]  }
  0x10   : > { %p1789_p3 = pnand %p1176_p0, %p232_p2  ;;  %s267_s14 = sshll.u32 %s1695_s13, 4  ;;  %s1796_s14 = int_to_ptr.vmem [resolvable:$true] %s267_s14 }
  0x11   : > { %s289_s16 = sshll.u32 %s1696_s15, 4  ;;  %s1697_s18 = smov [#allocation8]   ;;  %s1804_s16 = int_to_ptr.vmem [resolvable:$true] %s289_s16 }
  0x12   : > { %s2292_s12 = scalar_select %p1789_p3, 1, 0 }
  0x13   : > { %p1279_p5 = pneg %p1789_p3  ;;  %s1806_s19 = sshll.u32 %s1697_s18, 4  ;;  %s257_s19 = int_to_ptr.vmem [resolvable:$true] %s1806_s19 }
  0x14   : > { %s2294_s1 = sld [smem:[#allocation24_spill]] }
  0x15   : > { %p1800_p6 = pnand %p1279_p5, %p2287_p1 }
  0x17   : > { %p1816_p8 = pneg %p1800_p6 }
  0x1a   : > { %s1384_s22 = scalar_lea.hbm %s2294_s1, 32 }
  0x1b   : > { %p1385_p7 = scmp.ne.s32.totalorder %s2294_s1, %s1384_s22  ;;  %p1391_p11 = scmp.lt.u32.totalorder %s1384_s22, %s2294_s1 }
  0x1d   : > { %p1387_p9 = pnand %p1816_p8, %p1385_p7 }
  0x1f   : > { %p1388_p10 = pneg %p1387_p9 }
  0x21   : > { %p1393_p12 = pnand %p1391_p11, %p1388_p10 }
  0x23   : > { %1396 = shalt.err (!%p1393_p12)
}
  0x24   : > { %s1397_s13 = scalar_lea.vmem %s1787_s10, 32  ;;  %p1405_p5 = scmp.lt.s32.totalorder %s1787_s10, %s1787_s10 }
  0x25   : > { %p1398_p13 = scmp.ne.s32.totalorder %s1787_s10, %s1397_s13  ;;  %p1406_p4 = scmp.lt.s32.totalorder %s1397_s13, %s1397_s13 }
  0x27   : > { %p1400_p0 = pnand %p1398_p13, %p1816_p8  ;;  %p1407_p7 = por %p1406_p4, %p1405_p5 }
  0x29   : > { %p1401_p2 = pneg %p1400_p0 }
  0x2b   : > { %p1408_p9 = pnand %p1407_p7, %p1401_p2 }
  0x2d   : > { %1411 = shalt.err (!%p1408_p9)
}
  0x2e   : > { %1282 = dma.hbm_to_vmem [thread:$0]  (!%p1800_p6), %s2294_s1, 32, %s1787_s10, [#allocation7]  }
  0x2f   : > { %s1412_s22 = scalar_lea.hbm %s2281_s3, 64 }
  0x30   : > { %p1413_p10 = scmp.ne.s32.totalorder %s2281_s3, %s1412_s22  ;;  %p1419_p12 = scmp.lt.u32.totalorder %s1412_s22, %s2281_s3 }
  0x32   : > { %p1415_p4 = pnand %p1413_p10, %p1816_p8 }
  0x34   : > { %p1416_p11 = pneg %p1415_p4 }
  0x36   : > { %p1421_p13 = pnand %p1419_p12, %p1416_p11 }
  0x38   : > { %1424 = shalt.err (!%p1421_p13)
}
  0x39   : > { %s1425_s10 = scalar_lea.vmem %s1796_s14, 64  ;;  %p1433_p7 = scmp.lt.s32.totalorder %s1796_s14, %s1796_s14 }
  0x3a   : > { %p1426_p0 = scmp.ne.s32.totalorder %s1796_s14, %s1425_s10  ;;  %p1434_p9 = scmp.lt.s32.totalorder %s1425_s10, %s1425_s10 }
  0x3c   : > { %p1428_p2 = pnand %p1426_p0, %p1816_p8  ;;  %p1435_p10 = por %p1434_p9, %p1433_p7 }
  0x3e   : > { %p1429_p5 = pneg %p1428_p2 }
  0x40   : > { %p1436_p4 = pnand %p1435_p10, %p1429_p5 }
  0x42   : > { %1439 = shalt.err (!%p1436_p4)
}
  0x43   : > { %1288 = dma.hbm_to_vmem [thread:$0]  (!%p1800_p6), %s2281_s3, 64, %s1796_s14, [#allocation10]  }
  0x44   : > { %s1440_s21 = scalar_lea.hbm %s2283_s5, 32 }
  0x45   : > { %p1441_p11 = scmp.ne.s32.totalorder %s2283_s5, %s1440_s21  ;;  %p1447_p0 = scmp.lt.u32.totalorder %s1440_s21, %s2283_s5 }
  0x47   : > { %p1443_p12 = pnand %p1441_p11, %p1816_p8 }
  0x49   : > { %p1444_p13 = pneg %p1443_p12 }
  0x4b   : > { %p1449_p2 = pnand %p1447_p0, %p1444_p13 }
  0x4d   : > { %1452 = shalt.err (!%p1449_p2)
}
  0x4e   : > { %s1453_s14 = scalar_lea.vmem %s1804_s16, 32  ;;  %p1461_p10 = scmp.lt.s32.totalorder %s1804_s16, %s1804_s16 }
  0x4f   : > { %p1454_p5 = scmp.ne.s32.totalorder %s1804_s16, %s1453_s14  ;;  %p1462_p4 = scmp.lt.s32.totalorder %s1453_s14, %s1453_s14 }
  0x51   : > { %p1456_p7 = pnand %p1454_p5, %p1816_p8  ;;  %p1463_p11 = por %p1462_p4, %p1461_p10 }
  0x53   : > { %p1457_p9 = pneg %p1456_p7 }
  0x55   : > { %p1464_p12 = pnand %p1463_p11, %p1457_p9 }
  0x57   : > { %1467 = shalt.err (!%p1464_p12)
}
  0x58   : > { %1294 = dma.hbm_to_vmem [thread:$0]  (!%p1800_p6), %s2283_s5, 32, %s1804_s16, [#allocation13]  }
  0x59   : > { %s1698_s13 = smov [#allocation11]   ;;  %s2296_s2 = sld [smem:[#allocation25_spill]] }
  0x5a   : > { %s278_s15 = sshll.u32 %s1698_s13, 4  ;;  %s279_s15 = int_to_ptr.vmem [resolvable:$true] %s278_s15 }
  0x5f   : > { %s1468_s21 = scalar_lea.hbm %s2296_s2, 64 }
  0x60   : > { %p1469_p13 = scmp.ne.s32.totalorder %s2296_s2, %s1468_s21  ;;  %p1475_p5 = scmp.lt.u32.totalorder %s1468_s21, %s2296_s2 }
  0x62   : > { %p1471_p0 = pnand %p1469_p13, %p1816_p8 }
  0x64   : > { %p1472_p2 = pneg %p1471_p0 }
  0x66   : > { %p1477_p7 = pnand %p1475_p5, %p1472_p2 }
  0x68   : > { %1480 = shalt.err (!%p1477_p7)
}
  0x69   : > { %s1481_s16 = scalar_lea.vmem %s257_s19, 64  ;;  %p1489_p11 = scmp.lt.s32.totalorder %s257_s19, %s257_s19 }
  0x6a   : > { %p1482_p9 = scmp.ne.s32.totalorder %s257_s19, %s1481_s16  ;;  %p1490_p12 = scmp.lt.s32.totalorder %s1481_s16, %s1481_s16 }
  0x6c   : > { %p1484_p10 = pnand %p1482_p9, %p1816_p8  ;;  %p1491_p1 = por %p1490_p12, %p1489_p11 }
  0x6e   : > { %p1485_p4 = pneg %p1484_p10 }
  0x70   : > { %p1492_p3 = pnand %p1491_p1, %p1485_p4 }
  0x72   : > { %1495 = shalt.err (!%p1492_p3)
}
  0x73   : > { %1285 = dma.hbm_to_vmem [thread:$0]  (!%p1800_p6), %s2296_s2, 64, %s257_s19, [#allocation7]  }
  0x74   : > { %s1496_s18 = scalar_lea.hbm %s2282_s4, 48 }
  0x75   : > { %p1497_p13 = scmp.ne.s32.totalorder %s2282_s4, %s1496_s18  ;;  %p1503_p3 = scmp.lt.u32.totalorder %s1496_s18, %s2282_s4 }
  0x77   : > { %p1499_p0 = pnand %p1497_p13, %p1816_p8 }
  0x79   : > { %p1500_p1 = pneg %p1499_p0 }
  0x7b   : > { %p1505_p2 = pnand %p1503_p3, %p1500_p1 }
  0x7d   : > { %1508 = shalt.err (!%p1505_p2)
}
  0x7e   : > { %s1509_s24 = scalar_lea.vmem %s279_s15, 48  ;;  %s1516_s19 = scalar_lea.vmem %s279_s15, 64 }
  0x7f   : > { %p1510_p5 = scmp.ne.s32.totalorder %s279_s15, %s1509_s24  ;;  %p1517_p10 = scmp.lt.s32.totalorder %s279_s15, %s279_s15 }
  0x80   : > { %p1518_p4 = scmp.lt.s32.totalorder %s1516_s19, %s1509_s24 }
  0x81   : > { %p1512_p7 = pnand %p1510_p5, %p1816_p8 }
  0x82   : > { %p1519_p11 = por %p1518_p4, %p1517_p10 }
  0x83   : > { %p1513_p9 = pneg %p1512_p7 }
  0x85   : > { %p1520_p12 = pnand %p1519_p11, %p1513_p9 }
  0x87   : > { %1523 = shalt.err (!%p1520_p12)
}
  0x88   : > { %1291 = dma.hbm_to_vmem [thread:$0]  (!%p1800_p6), %s2282_s4, 48, %s279_s15, [#allocation10]  }
  0x89   : > { %s1699_s14 = smov [#allocation14]   ;;  %s1700_s10 = smov [#allocation15]  }
  0x8a   : > { %s300_s9 = sshll.u32 %s1699_s14, 4  ;;  %s311_s13 = sshll.u32 %s1700_s10, 4  ;;  %s301_s9 = int_to_ptr.vmem [resolvable:$true] %s300_s9  ;;  %s312_s13 = int_to_ptr.vmem [resolvable:$true] %s311_s13 }
  0x8b   : > { %s1524_s21 = scalar_lea.hbm %s2284_s6, 64 }
  0x8c   : > { %p1525_p13 = scmp.ne.s32.totalorder %s2284_s6, %s1524_s21  ;;  %p1531_p3 = scmp.lt.u32.totalorder %s1524_s21, %s2284_s6 }
  0x8e   : > { %p1527_p0 = pnand %p1525_p13, %p1816_p8 }
  0x90   : > { %p1528_p1 = pneg %p1527_p0 }
  0x92   : > { %p1533_p2 = pnand %p1531_p3, %p1528_p1 }
  0x94   : > { %1536 = shalt.err (!%p1533_p2)
}
  0x95   : > { %s1537_s15 = scalar_lea.vmem %s301_s9, 64  ;;  %p1545_p10 = scmp.lt.s32.totalorder %s301_s9, %s301_s9 }
  0x96   : > { %p1538_p5 = scmp.ne.s32.totalorder %s301_s9, %s1537_s15  ;;  %p1546_p4 = scmp.lt.s32.totalorder %s1537_s15, %s1537_s15 }
  0x98   : > { %p1540_p7 = pnand %p1538_p5, %p1816_p8  ;;  %p1547_p11 = por %p1546_p4, %p1545_p10 }
  0x9a   : > { %p1541_p9 = pneg %p1540_p7 }
  0x9c   : > { %p1548_p12 = pnand %p1547_p11, %p1541_p9 }
  0x9e   : > { %1551 = shalt.err (!%p1548_p12)
}
  0x9f   : > { %1297 = dma.hbm_to_vmem [thread:$0]  (!%p1800_p6), %s2284_s6, 64, %s301_s9, [#allocation13]  }
  0xa0   : > { %s1552_s18 = scalar_lea.hbm %s2285_s7, 64 }
  0xa1   : > { %p1553_p13 = scmp.ne.s32.totalorder %s2285_s7, %s1552_s18  ;;  %p1559_p3 = scmp.lt.u32.totalorder %s1552_s18, %s2285_s7 }
  0xa3   : > { %p1555_p0 = pnand %p1553_p13, %p1816_p8 }
  0xa5   : > { %p1556_p1 = pneg %p1555_p0 }
  0xa7   : > { %p1561_p2 = pnand %p1559_p3, %p1556_p1 }
  0xa9   : > { %1564 = shalt.err (!%p1561_p2)
}
  0xaa   : > { %s1565_s24 = scalar_lea.vmem %s312_s13, 64  ;;  %p1573_p10 = scmp.lt.s32.totalorder %s312_s13, %s312_s13 }
  0xab   : > { %p1566_p5 = scmp.ne.s32.totalorder %s312_s13, %s1565_s24  ;;  %p1574_p4 = scmp.lt.s32.totalorder %s1565_s24, %s1565_s24 }
  0xad   : > { %p1568_p7 = pnand %p1566_p5, %p1816_p8  ;;  %p1575_p11 = por %p1574_p4, %p1573_p10 }
  0xaf   : > { %p1569_p9 = pneg %p1568_p7 }
  0xb1   : > { %p1576_p12 = pnand %p1575_p11, %p1569_p9 }
  0xb3   : > { %1579 = shalt.err (!%p1576_p12)
}
  0xb4   : > { %1300 = dma.hbm_to_vmem [thread:$0]  (!%p1800_p6), %s2285_s7, 64, %s312_s13, [#allocation16]  }
  0xb5   : > { %s1175_s25 = sadd.s32 4294967294, %s1692_s30   ;;  %s1958_s17 = sadd.s32 1, %s1692_s30  }
  0xb6   : > { %s35_s15 = sadd.s32 1, %s1688_s29  ;;  %s32_s26 = ssub.s32 %s1692_s30, %s1958_s17 }
  0xb7   : > { %p42_p8 = scmp.ne.s32.totalorder %s1688_s29, %s1684_s28  ;;  %p33_p13 = scmp.eq.s32.totalorder %s32_s26, 0 }
  0xb8   : > { %p43_p0 = scmp.eq.s32.totalorder %s1692_s30, 0  ;;  %p48_p1 = scmp.ne.s32.totalorder %s1684_s28, %s1680_s27 }
  0xb9   : > { %p219_p3 = scmp.eq.s32.totalorder %s1782_s11, 1  ;;  %p2297_p5 = scmp.eq.s32.totalorder %s1782_s11, 0 }
  0xba   : > { %s1970_s16 = scalar_select %p33_p13, %s1688_s29, %s35_s15  }
  0xbb   : > { %p44_p2 = por %p43_p0, %p42_p8  ;;  %p1974_p7 = por %p2297_p5, %p48_p1 }
  0xbc   : > { %p1978_p6 = por %p219_p3, %p42_p8  ;;  %p225_p9 = scmp.eq.s32.totalorder %s1175_s25, 1 }
  0xbd   : > { %p1316_p10 = scmp.lt.s32.totalorder %s1692_s30, 2  ;;  %s322_s10 = sand.u32 1, %s1688_s29  }
  0xbe   : > { %s2299_s13 = scalar_select %p1978_p6, 1, 0 }
  0xbf   : > { %p1984_p4 = por %p225_p9, %p48_p1  ;;  %s1242_s20 = smul.u32 12, %s322_s10 }
  0xc0   : > { %p1988_p11 = pnand %p1316_p10, %p44_p2  ;;  %s1243_s22 = smul.u32 192, %s1692_s30 }
  0xc1   : > { %s2300_s18 = scalar_select %p1984_p4, 1, 0 }
  0xc2   : > { %s1996_s9 = scalar_lea.hbm %s2278_s0, %s1243_s22  ;;  %s326_s19 = scalar_lea.vmem [#allocation3], %s1242_s20 }
  0xc3   : > { %s334_s25 = sshll.u32 %s326_s19, 4  ;;  %s323_s15 = scalar_lea.sflag [#allocation4], %s322_s10  ;;  %s1998_s25 = int_to_ptr.vmem [resolvable:$true] %s334_s25 }
  0xc4   : > { %s1580_s26 = scalar_lea.hbm %s1996_s9, 192  ;;  %p1582_p8 = pneg %p1988_p11 }
  0xc5   : > { %p1581_p12 = scmp.ne.s32.totalorder %s1996_s9, %s1580_s26  ;;  %s1585_s24 = scalar_lea.hbm %s2278_s0, 384 }
  0xc6   : > { %p1586_p1 = scmp.lt.u32.totalorder %s1996_s9, %s2278_s0  ;;  %p1587_p3 = scmp.lt.u32.totalorder %s1585_s24, %s1580_s26 }
  0xc7   : > { %p1583_p13 = pnand %p1582_p8, %p1581_p12  ;;  %p1589_p5 = scmp.lt.u32.totalorder %s1580_s26, %s1996_s9 }
  0xc8   : > { %p1588_p2 = por %p1587_p3, %p1586_p1 }
  0xc9   : > { %p1584_p0 = pneg %p1583_p13 }
  0xca   : > { %p1590_p9 = por %p1589_p5, %p1588_p2 }
  0xcc   : > { %p1591_p10 = pnand %p1590_p9, %p1584_p0 }
  0xce   : > { %1594 = shalt.err (!%p1591_p10)
}
  0xcf   : > { %s1595_s10 = scalar_lea.vmem %s1998_s25, 192  ;;  %s1701_s20 = smov [#allocation3]  }
  0xd0   : > { %p1596_p12 = scmp.ne.s32.totalorder %s1998_s25, %s1595_s10  ;;  %s1600_s19 = sshll.u32 %s1701_s20, 4  ;;  %s1601_s19 = int_to_ptr.vmem [resolvable:$false] %s1600_s19 }
  0xd1   : > { %s1602_s1 = scalar_lea.vmem %s1601_s19, 384  ;;  %p1603_p6 = scmp.lt.s32.totalorder %s1998_s25, %s1601_s19 }
  0xd2   : > { %p1598_p13 = pnand %p1596_p12, %p1582_p8  ;;  %p1604_p1 = scmp.lt.s32.totalorder %s1602_s1, %s1595_s10 }
  0xd4   : > { %p1599_p4 = pneg %p1598_p13  ;;  %p1605_p3 = por %p1604_p1, %p1603_p6 }
  0xd6   : > { %p1606_p2 = pnand %p1605_p3, %p1599_p4 }
  0xd8   : > { %1609 = shalt.err (!%p1606_p2)
}
  0xd9   : > { %1304 = dma.hbm_to_vmem [thread:$0]  (!%p1988_p11), %s1996_s9, 192, %s1998_s25, %s323_s15  }
  0xda   : > { %p2302_p0 = scmp.ne.s32.totalorder %s2292_s12, 0 }
  0xdb   : > { %s2028_s2 = sand.u32 (!%p2302_p0), 1, %s1684_s28  }
  0xdc   : > { %343 = sbr.rel (%p2302_p0) target bundleno = 1168 (0x490), region = 52  ;;  %s346_s23 = scalar_lea.sflag (!%p2302_p0), [#allocation4], %s2028_s2 }
  0xdd   : > { %s1244_s26 = smul.u32 (!%p2302_p0), 12, %s2028_s2 }
  0xdf   : > { %s349_s22 = scalar_lea.vmem (!%p2302_p0), [#allocation3], %s1244_s26 }
  0xe3   : > { %1655 = dma.done.wait (%p1974_p7), %s346_s23, 192  }
  0xe4   : > { %1657 = vsyncadd (%p1974_p7), %s346_s23, 4294967104  ;;  %p2303_p6 = scmp.eq.s32.totalorder %s1782_s11, 0 }
  0xe6   : > { %1659 = dma.done.wait (%p2303_p6), [#allocation7], 96   ;;  %p2304_p4 = pmov %p2303_p6 }
  0xe8   : > { %1661 = vsyncadd (%p2304_p4), [#allocation7], 4294967200  ;;  %p2305_p11 = pmov %p2304_p4 }
  0xe9   : > { %p2306_p8 = pmov %p2304_p4 }
  0xea   : > { %1663 = dma.done.wait (%p2305_p11), [#allocation10], 112  }
  0xeb   : > { %1665 = vsyncadd (%p2306_p8), [#allocation10], 4294967184  ;;  %p2307_p5 = pmov %p2304_p4 }
  0xec   : > { %p2308_p9 = pmov %p2304_p4 }
  0xed   : > { %1667 = dma.done.wait (%p2307_p5), [#allocation13], 96  }
  0xee   : > { %1669 = vsyncadd (%p2308_p9), [#allocation13], 4294967200  ;;  %p2309_p7 = pmov %p2304_p4 }
  0xef   : > { %p2310_p10 = pmov %p2304_p4 }
  0xf0   : > { %1671 = dma.done.wait (%p2309_p7), [#allocation16], 64  }
  0xf1   : > { %1673 = vsyncadd (%p2310_p10), [#allocation16], 4294967232  ;;  %v1702_v0 = vmov 0.0   ;;  %v411_v1 = vld [vmem:[%s349_s22] sm:$0xff]  ;;  %s1703_s12 = smov 127   ;;  %s1704_s14 = smov 126   ;;  %v660_v63 = vlaneseq }
  0xf2   : > { %1218 = vmatprep.subr.bf16.mxu1 %v1702_v0  ;;  %v1195_v2 = vcombine.high %v411_v1, %v411_v1  ;;  %v1194_v3 = vcombine.low %v411_v1, %v411_v1  ;;  %v1381_v4 = vld [vmem:[%s349_s22 + $0x8] ss:$0 sps:$4 sm:$0xff]   ;;  %s1705_s21 = smov 110   ;;  %s1706_s9 = smov 109   ;;  %vm1710_vm0 = vmmov 0   ;;  %v1711_v5 = vmov 0  }
  0xf3   : > { %s1707_s25 = smov 108   ;;  %s1708_s15 = smov 92   ;;  %1228 = vmatprep.mubr.msk.bf16.mxu1 %vm1710_vm0, %v1702_v0  ;;  %588 = vmatprep.mubr.bf16.mxu0 %v1711_v5  ;;  %v637_v6 = vld [vmem:[#allocation8] sm:$0xf]  ;;  %v646_v7 = vld [vmem:[#allocation9] sm:$0xf] }
  0xf4   : > { %423 = vrot.lane.b32.xlu0 %v1195_v2, %s1703_s12  ;;  %421 = vrot.lane.b32.xlu1 %v1194_v3, %s1703_s12  ;;  %s1709_s24 = smov 91   ;;  %s1712_s10 = smov 90   ;;  %vm427_vm1 = vcmask 1039360   ;;  %vm493_vm2 = vcmask 1043456   ;;  %vm436_vm3 = vcmask 1031168   ;;  %vm445_vm4 = vcmask 900096  }
  0xf5   : > { %1377 = vset.pattern.permute.xlu0 %v1711_v5  ;;  %1378 = vset.pattern.permute.xlu1 %v1711_v5  ;;  %vm454_vm5 = vcmask 891904   ;;  %vm463_vm6 = vcmask 883712   ;;  %vm472_vm7 = vcmask 752640   ;;  %vm481_vm8 = vcmask 744448   ;;  %v542_v62 = vld [vmem:[#allocation6] sm:$0x3] }
  0xf6   : > { %vm490_vm9 = vcmask 736256   ;;  %vm543_vm10 = vcmask 588800   ;;  %vm678_vm11 = vcmask 148480   ;;  %vm680_vm12 = vcmask 861880   ;;  %s1714_s20 = smov 19   ;;  %s1245_s19 = smul.u32 6, %s2028_s2 }
  0xf7   : > { %679 = vst.msk [vmem:[#allocation2] sm:$0x3] %vm678_vm11, %v1711_v5  ;;  %v2123_v1 = vshrl.u32 %v660_v63, 7  ;;  %vm710_vm13 = vcmask 1041560   ;;  %vm711_vm14 = vcmask 1043458   ;;  %s1246_s1 = smul.u32 96, %s1782_s11 }
  0xf8   : > { %425 = vrot.lane.b32.xlu0 %v1381_v4, %s1703_s12  ;;  %432 = vrot.lane.b32.xlu1 %v1195_v2, %s1704_s14  ;;  %681 = vst.msk [vmem:[#allocation2 + $0x4] sm:$0x3] %vm680_vm12, %v1711_v5  ;;  %vm712_vm15 = vmor %vm711_vm14, %vm710_vm13  ;;  %vm810_vm12 = vcmask 1041408   ;;  %vm826_vm13 = vcmask 1045504   ;;  %s409_s26 = scalar_lea.vmem [#allocation17], %s1245_s19  ;;  %s1024_s11 = scalar_lea.sflag [#allocation5], %s2028_s2 }
  0xf9   : > { %s1038_s23 = sshll.u32 %s409_s26, 4  ;;  %p2311_p13 = scmp.ne.s32.totalorder %s2299_s13, 0  ;;  %s2236_s23 = int_to_ptr.vmem [resolvable:$true] %s1038_s23 }
  0xfc   : > { %434 = vrot.lane.b32.xlu0 %v1381_v4, %s1704_s14  ;;  %441 = vrot.lane.b32.xlu1 %v1195_v2, %s1705_s21 }
 0x100   : > { %443 = vrot.lane.b32.xlu0 %v1381_v4, %s1705_s21  ;;  %430 = vrot.lane.b32.xlu1 %v1194_v3, %s1704_s14 }
 0x104   : > { %439 = vrot.lane.b32.xlu0 %v1194_v3, %s1705_s21  ;;  %450 = vrot.lane.b32.xlu1 %v1195_v2, %s1706_s9 }
 0x108   : > { %452 = vrot.lane.b32.xlu0 %v1381_v4, %s1706_s9  ;;  %459 = vrot.lane.b32.xlu1 %v1195_v2, %s1707_s25 }
 0x10c   : > { %461 = vrot.lane.b32.xlu0 %v1381_v4, %s1707_s25  ;;  %448 = vrot.lane.b32.xlu1 %v1194_v3, %s1706_s9 }
 0x110   : > { %457 = vrot.lane.b32.xlu0 %v1194_v3, %s1707_s25  ;;  %468 = vrot.lane.b32.xlu1 %v1195_v2, %s1708_s15 }
 0x114   : > { %470 = vrot.lane.b32.xlu0 %v1381_v4, %s1708_s15  ;;  %477 = vrot.lane.b32.xlu1 %v1195_v2, %s1709_s24 }
 0x118   : > { %479 = vrot.lane.b32.xlu0 %v1381_v4, %s1709_s24  ;;  %466 = vrot.lane.b32.xlu1 %v1194_v3, %s1708_s15 }
 0x11c   : > { %475 = vrot.lane.b32.xlu0 %v1194_v3, %s1709_s24  ;;  %484 = vrot.lane.b32.xlu1 %v1194_v3, %s1712_s10 }
 0x120   : > { %486 = vrot.lane.b32.xlu0 %v1195_v2, %s1712_s10  ;;  %488 = vrot.lane.b32.xlu1 %v1381_v4, %s1712_s10 }
 0x124   : > { %640 = vperm.xlu0 %1377, %v637_v6   ;;  %649 = vperm.xlu1 %1378, %v646_v7  }
 0x166   : > { %v424_v8 = vpop.permute.xlu0 %423  ;;  %v422_v9 = vpop.permute.xlu1 %421 }
 0x167   : > { %v428_v10 = vsel %vm427_vm1, %v422_v9, %v424_v8  ;;  %v662_v9 = vsub.s32 0, %v2123_v1 }
 0x168   : > { %v496_v16 = vsel %vm493_vm2, %v1194_v3, %v428_v10  ;;  %v670_v3 = vsub.s32 2, %v2123_v1 }
 0x16a   : > { %v426_v11 = vpop.permute.xlu0 %425  ;;  %v433_v12 = vpop.permute.xlu1 %432 }
 0x16b   : > { %v429_v13 = vsel %vm427_vm1, %v424_v8, %v426_v11  ;;  %v504_v14 = vsel %vm493_vm2, %v1381_v4, %v426_v11  ;;  %v1713_v4 = vmov 1983009808   ;;  %v658_v8 = vld [vmem:[#allocation11] sm:$0x7] }
 0x16c   : > { %1219 = vmatpush3.bf16.msra.mxu1 %v504_v14  ;;  %v500_v15 = vsel %vm493_vm2, %v1195_v2, %v429_v13  ;;  %v690_v6 = vunpack.c.l.s4 %v1713_v4  ;;  %v666_v14 = vsub.s32 1, %v2123_v1 }
 0x16d   : > { %556 = vmatprep.subr.bf16.mxu0 %v500_v15  ;;  %1220 = vmatprep.subr.bf16.mxu1 %v1702_v0 }
 0x16e   : > { %v435_v17 = vpop.permute.xlu0 %434  ;;  %557 = vmatpush1.bf16.msra.mxu0 %v496_v16  ;;  %v442_v18 = vpop.permute.xlu1 %441 }
 0x16f   : > { %v438_v21 = vsel %vm436_vm3, %v433_v12, %v435_v17 }
 0x172   : > { %v444_v19 = vpop.permute.xlu0 %443  ;;  %v431_v20 = vpop.permute.xlu1 %430 }
 0x173   : > { %v447_v22 = vsel %vm445_vm4, %v442_v18, %v444_v19  ;;  %v516_v23 = vsel %vm493_vm2, %v435_v17, %v444_v19  ;;  %v437_v27 = vsel %vm436_vm3, %v431_v20, %v433_v12  ;;  %v671_v20 = vrot.slane %v658_v8, %v670_v3 }
 0x174   : > { %1221 = vmatpush3.bf16.msra.mxu1 %v516_v23  ;;  %v512_v24 = vsel %vm493_vm2, %v438_v21, %v447_v22  ;;  %v691_v21 = vunpack.c.0.s8 %v690_v6  ;;  %v663_v23 = vrot.slane %v658_v8, %v662_v9 }
 0x175   : > { %558 = vmatprep.subr.bf16.mxu0 %v512_v24  ;;  %1222 = vmatprep.subr.bf16.mxu1 %v1702_v0 }
 0x176   : > { %v440_v25 = vpop.permute.xlu0 %439  ;;  %v451_v26 = vpop.permute.xlu1 %450 }
 0x177   : > { %v446_v28 = vsel %vm445_vm4, %v440_v25, %v442_v18 }
 0x178   : > { %v508_v29 = vsel %vm493_vm2, %v437_v27, %v446_v28 }
 0x179   : > { %559 = vmatpush1.bf16.msra.mxu0 %v508_v29 }
 0x17a   : > { %v453_v30 = vpop.permute.xlu0 %452  ;;  %v460_v31 = vpop.permute.xlu1 %459 }
 0x17b   : > { %v456_v34 = vsel %vm454_vm5, %v451_v26, %v453_v30 }
 0x17e   : > { %v462_v32 = vpop.permute.xlu0 %461  ;;  %v449_v33 = vpop.permute.xlu1 %448 }
 0x17f   : > { %v465_v35 = vsel %vm463_vm6, %v460_v31, %v462_v32  ;;  %v528_v36 = vsel %vm493_vm2, %v453_v30, %v462_v32  ;;  %v455_v40 = vsel %vm454_vm5, %v449_v33, %v451_v26  ;;  %v667_v26 = vrot.slane %v658_v8, %v666_v14 }
 0x180   : > { %1223 = vmatpush3.bf16.msra.mxu1 %v528_v36  ;;  %v524_v37 = vsel %vm493_vm2, %v456_v34, %v465_v35  ;;  %v2135_v30 = vsub.s32 %v691_v21, %v2123_v1 }
 0x181   : > { %560 = vmatprep.subr.bf16.mxu0 %v524_v37  ;;  %1224 = vmatprep.subr.bf16.mxu1 %v1702_v0 }
 0x182   : > { %v458_v38 = vpop.permute.xlu0 %457  ;;  %v469_v39 = vpop.permute.xlu1 %468 }
 0x183   : > { %v464_v41 = vsel %vm463_vm6, %v458_v38, %v460_v31 }
 0x184   : > { %v520_v42 = vsel %vm493_vm2, %v455_v40, %v464_v41 }
 0x185   : > { %561 = vmatpush1.bf16.msra.mxu0 %v520_v42 }
 0x186   : > { %v471_v43 = vpop.permute.xlu0 %470  ;;  %v478_v44 = vpop.permute.xlu1 %477 }
 0x187   : > { %v474_v47 = vsel %vm472_vm7, %v469_v39, %v471_v43 }
 0x18a   : > { %v480_v45 = vpop.permute.xlu0 %479  ;;  %v467_v46 = vpop.permute.xlu1 %466 }
 0x18b   : > { %v483_v48 = vsel %vm481_vm8, %v478_v44, %v480_v45  ;;  %v540_v49 = vsel %vm493_vm2, %v471_v43, %v480_v45  ;;  %v473_v53 = vsel %vm472_vm7, %v467_v46, %v469_v39 }
 0x18c   : > { %1225 = vmatpush3.bf16.msra.mxu1 %v540_v49  ;;  %v536_v50 = vsel %vm493_vm2, %v474_v47, %v483_v48 }
 0x18d   : > { %562 = vmatprep.subr.bf16.mxu0 %v536_v50  ;;  %1226 = vmatprep.subr.bf16.mxu1 %v1702_v0 }
 0x18e   : > { %v476_v51 = vpop.permute.xlu0 %475  ;;  %v485_v52 = vpop.permute.xlu1 %484 }
 0x18f   : > { %v482_v54 = vsel %vm481_vm8, %v476_v51, %v478_v44 }
 0x190   : > { %v532_v55 = vsel %vm493_vm2, %v473_v53, %v482_v54  ;;  %v964_v54 = vld [vmem:[#allocation15] sm:$0xf] }
 0x191   : > { %563 = vmatpush1.bf16.msra.mxu0 %v532_v55  ;;  %v955_v55 = vld [vmem:[#allocation14] sm:$0xf] }
 0x192   : > { %v487_v56 = vpop.permute.xlu0 %486  ;;  %v489_v57 = vpop.permute.xlu1 %488 }
 0x193   : > { %v491_v58 = vsel %vm490_vm9, %v485_v52, %v487_v56  ;;  %v492_v59 = vsel %vm490_vm9, %v487_v56, %v489_v57  ;;  %v554_v60 = vsel %vm493_vm2, %v489_v57, 0 }
 0x194   : > { %1197 = vmatprep.subr.msk.bf16.mxu0 %vm493_vm2, %v492_v59  ;;  %1227 = vmatpush3.bf16.msra.mxu1 %v554_v60  ;;  %v548_v61 = vsel %vm493_vm2, %v491_v58, 0 }
 0x195   : > { %565 = vmatpush1.bf16.msra.mxu0 %v548_v61  ;;  %1232 = vmatprep.subr.bf16.mxu1 %v1702_v0 }
 0x197   : > { %1229 = vmatmul.mubr.msk.bf16.vlgmr.msra.gmra.mrb[0].mxu1 %vm543_vm10, %v542_v62 }
 0x198   : > { %1198 = vmatmul.mubr.msk.bf16.vlgmr.msra.gmra.mrb[0].mxu0 %vm543_vm10, %v542_v62  ;;  %1238 = vmatprep.mubr.msk.bf16.mxu1 %vm1710_vm0, %v1702_v0  ;;  %vm713_vm0 = vcmask 709636   ;;  %vm707_vm10 = vcmask 154624  }
 0x199   : > { %906 = vmatprep.mubr.bf16.mxu0 %v1711_v5  ;;  %vm714_vm11 = vmor %vm713_vm0, %vm712_vm15 }
 0x1a3   : > { %v641_v2 = vpop.permute.xlu0 %640  ;;  %v650_v10 = vpop.permute.xlu1 %649 }
 0x26a   : > { %v631_v7 = vpop.f32.mrb[0].mxu1 }
 0x26b   : > { %v645_v11 = vmul.f32 %v641_v2, %v631_v7  ;;  %v590_v12 = vpop.f32.mrb[0].mxu0  ;;  %v1230_v13 = vpop.f32.mrb[1].mxu1 }
 0x26c   : > { %v643_v15 = vmul.f32 %v641_v2, %v590_v12  ;;  %v592_v5 = vpop.f32.mrb[1].mxu0  ;;  %v634_v16 = vpop.f32.mrb[2].mxu1 }
 0x26d   : > { %v644_v17 = vmul.f32 %v641_v2, %v592_v5  ;;  %v594_v18 = vpop.f32.mrb[2].mxu0  ;;  %v1231_v19 = vpop.f32.mrb[3].mxu1  ;;  %v654_v22 = vadd.f32 %v650_v10, %v645_v11 }
 0x26e   : > { %v652_v24 = vadd.f32 %v650_v10, %v643_v15  ;;  %v595_v25 = vpop.f32.mrb[3].mxu0 }
 0x26f   : > { %v653_v27 = vadd.f32 %v650_v10, %v644_v17  ;;  %v657_v28 = vmax.f32 %v654_v22, 0.0 }
 0x270   : > { %v655_v29 = vmax.f32 %v652_v24, 0.0 }
 0x271   : > { %v656_v31 = vmax.f32 %v653_v27, 0.0  ;;  %v677_v32 = vmul.f32 %v671_v20, %v657_v28 }
 0x272   : > { %v675_v33 = vmul.f32 %v663_v23, %v655_v29 }
 0x273   : > { %v676_v34 = vmul.f32 %v667_v26, %v656_v31  ;;  %v684_v35 = vpack.c.bf16 %v677_v32, %v677_v32 }
 0x275   : > { %v1200_v36 = vpack.c.bf16 %v676_v34, %v675_v33  ;;  %v702_v37 = vrot.slane %v684_v35, %v2135_v30 }
 0x277   : > { %v695_v38 = vrot.slane %v1200_v36, %v2135_v30 }
 0x279   : > { %v703_v39 = vcombine.low %v695_v38, %v702_v37 }
 0x27b   : > { %704 = vrot.lane.b32.xlu1 %v703_v39, %s1714_s20 }
 0x2ed   : > { %v705_v40 = vpop.permute.xlu1 %704 }
 0x2ee   : > { %v706_v41 = vrot.slane %v705_v40, 6 }
 0x2f0   : > { %v708_v42 = vsel %vm707_vm10, %v706_v41, %v705_v40 }
 0x2f1   : > { %715 = vst.msk [vmem:[#allocation2] sm:$0x3f] %vm714_vm11, %v708_v42 }
 0x2f8   : > { %v716_v43 = vld [vmem:[#allocation2] sm:$0x3f] }
 0x2f9   : > { %v2141_v44 = vrot.slane %v716_v43, %v2135_v30  ;;  %v734_v45 = vcombine.low %v716_v43, %v716_v43  ;;  %v718_v47 = vcombine.high %v716_v43, %v716_v43 }
 0x2fb   : > { %782 = vrot.lane.b32.xlu0 %v2141_v44, %s1707_s25  ;;  %747 = vrot.lane.b32.xlu1 %v2141_v44, %s1703_s12  ;;  %v741_v46 = vrot.slane %v734_v45, %v2135_v30  ;;  %v732_v48 = vrot.slane %v718_v47, %v2135_v30  ;;  %v751_v49 = vcombine.low %v2141_v44, %v2141_v44 }
 0x2fc   : > { %v733_v50 = vcombine.high %v2141_v44, %v2141_v44 }
 0x2fd   : > { %v742_v51 = vcombine.high %v741_v46, %v741_v46  ;;  %v752_v52 = vcombine.low %v732_v48, %v732_v48  ;;  %v761_v53 = vcombine.low %v741_v46, %v741_v46 }
 0x2ff   : > { %743 = vrot.lane.b32.xlu0 %v741_v46, %s1703_s12  ;;  %755 = vrot.lane.b32.xlu1 %v2141_v44, %s1704_s14 }
 0x303   : > { %764 = vrot.lane.b32.xlu0 %v741_v46, %s1705_s21  ;;  %770 = vrot.lane.b32.xlu1 %v2141_v44, %s1706_s9 }
 0x307   : > { %788 = vrot.lane.b32.xlu1 %v2141_v44, %s1708_s15  ;;  %774 = vrot.lane.b32.xlu0 %v732_v48, %s1706_s9 }
 0x30b   : > { %753 = vrot.lane.b32.xlu1 %v751_v49, %s1704_s14  ;;  %778 = vrot.lane.b32.xlu0 %v741_v46, %s1707_s25 }
 0x30f   : > { %766 = vrot.lane.b32.xlu1 %v751_v49, %s1705_s21  ;;  %796 = vrot.lane.b32.xlu0 %v741_v46, %s1709_s24 }
 0x313   : > { %772 = vrot.lane.b32.xlu1 %v733_v50, %s1706_s9  ;;  %745 = vrot.lane.b32.xlu0 %v742_v51, %s1703_s12  ;;  %s1715_s9 = smov [#allocation17]  }
 0x317   : > { %786 = vrot.lane.b32.xlu1 %v751_v49, %s1708_s15  ;;  %757 = vrot.lane.b32.xlu0 %v752_v52, %s1704_s14  ;;  %s2234_s14 = scalar_lea.hbm %s2286_s8, %s1246_s1 }
 0x31b   : > { %798 = vrot.lane.b32.xlu1 %v751_v49, %s1709_s24  ;;  %762 = vrot.lane.b32.xlu0 %v761_v53, %s1705_s21  ;;  %s1610_s21 = scalar_lea.vmem %s2236_s23, 96 }
 0x31c   : > { %p1611_p12 = scmp.ne.s32.totalorder %s2236_s23, %s1610_s21 }
 0x31e   : > { %p1612_p1 = pnand %p1611_p12, %p2311_p13 }
 0x31f   : > { %780 = vrot.lane.b32.xlu1 %v742_v51, %s1707_s25  ;;  %790 = vrot.lane.b32.xlu0 %v752_v52, %s1708_s15  ;;  %s1614_s25 = sshll.u32 %s1715_s9, 4  ;;  %s1615_s25 = int_to_ptr.vmem [resolvable:$false] %s1614_s25 }
 0x320   : > { %p1613_p3 = pneg %p1612_p1  ;;  %s1616_s15 = scalar_lea.vmem %s1615_s25, 192 }
 0x321   : > { %p1617_p2 = scmp.lt.s32.totalorder %s2236_s23, %s1615_s25  ;;  %p1618_p0 = scmp.lt.s32.totalorder %s1616_s15, %s1610_s21 }
 0x323   : > { %802 = vrot.lane.b32.xlu1 %v2141_v44, %s1712_s10  ;;  %794 = vrot.lane.b32.xlu0 %v761_v53, %s1709_s24  ;;  %p1619_p6 = por %p1618_p0, %p1617_p2 }
 0x325   : > { %p1620_p4 = pnand %p1619_p6, %p1613_p3 }
 0x327   : > { %806 = vrot.lane.b32.xlu1 %v732_v48, %s1712_s10  ;;  %804 = vrot.lane.b32.xlu0 %v733_v50, %s1712_s10 }
 0x32b   : > { %967 = vperm.xlu1 %1378, %v964_v54   ;;  %958 = vperm.xlu0 %1377, %v955_v55  }
 0x36d   : > { %v783_v56 = vpop.permute.xlu0 %782  ;;  %v748_v57 = vpop.permute.xlu1 %747 }
 0x36e   : > { %v819_v13 = vsel %vm810_vm12, %v732_v48, %v748_v57 }
 0x371   : > { %v744_v58 = vpop.permute.xlu0 %743  ;;  %v756_v59 = vpop.permute.xlu1 %755 }
 0x375   : > { %v765_v60 = vpop.permute.xlu0 %764  ;;  %v771_v61 = vpop.permute.xlu1 %770 }
 0x379   : > { %v789_v62 = vpop.permute.xlu1 %788  ;;  %v775_v63 = vpop.permute.xlu0 %774 }
 0x37a   : > { %v844_v31 = vsel %vm810_vm12, %v775_v63, %v783_v56 }
 0x37d   : > { %v754_v2 = vpop.permute.xlu1 %753  ;;  %v779_v4 = vpop.permute.xlu0 %778 }
 0x37e   : > { %v759_v24 = vsel %vm436_vm3, %v754_v2, %v756_v59 }
 0x381   : > { %v767_v6 = vpop.permute.xlu1 %766  ;;  %v797_v7 = vpop.permute.xlu0 %796 }
 0x382   : > { %v769_v19 = vsel %vm445_vm4, %v765_v60, %v767_v6 }
 0x385   : > { %v773_v8 = vpop.permute.xlu1 %772  ;;  %v746_v10 = vpop.permute.xlu0 %745 }
 0x386   : > { %v750_v11 = vsel %vm427_vm1, %v746_v10, %v748_v57  ;;  %v749_v12 = vsel %vm427_vm1, %v744_v58, %v746_v10  ;;  %v776_v32 = vsel %vm454_vm5, %v771_v61, %v773_v8  ;;  %v777_v33 = vsel %vm454_vm5, %v773_v8, %v775_v63  ;;  %v976_v61 = vld [vmem:[#allocation11] sm:$0x7] }
 0x387   : > { %v816_v16 = vsel %vm810_vm12, %v733_v50, %v750_v11  ;;  %v813_v20 = vsel %vm810_vm12, %v2141_v44, %v749_v12  ;;  %vm861_vm1 = vcmask 293888   ;;  %v989_v10 = vrot.slane %v976_v61, %v670_v3 }
 0x388   : > { %v821_v28 = vsel %vm493_vm2, %v813_v20, %v759_v24 }
 0x389   : > { %v787_v15 = vpop.permute.xlu1 %786  ;;  %v758_v5 = vpop.permute.xlu0 %757 }
 0x38a   : > { %v760_v17 = vsel %vm436_vm3, %v756_v59, %v758_v5  ;;  %v825_v18 = vsel %vm493_vm2, %v819_v13, %v758_v5  ;;  %v792_v45 = vsel %vm472_vm7, %v787_v15, %v789_v62  ;;  %v981_v5 = vrot.slane %v976_v61, %v662_v9 }
 0x38b   : > { %v834_v21 = vsel %vm826_vm13, %v825_v18, %v767_v6  ;;  %v823_v22 = vsel %vm493_vm2, %v816_v16, %v760_v17  ;;  %vm1020_vm3 = vcmask 553988  }
 0x38c   : > { %1233 = vmatpush3.bf16.msra.mxu1 %v834_v21  ;;  %v831_v23 = vsel %vm826_vm13, %v823_v22, %v769_v19  ;;  %v985_v19 = vrot.slane %v976_v61, %v666_v14 }
 0x38d   : > { %v799_v25 = vpop.permute.xlu1 %798  ;;  %874 = vmatprep.subr.bf16.mxu0 %v831_v23  ;;  %v763_v26 = vpop.permute.xlu0 %762  ;;  %1234 = vmatprep.subr.bf16.mxu1 %v1702_v0 }
 0x38e   : > { %v768_v27 = vsel %vm445_vm4, %v763_v26, %v765_v60  ;;  %v801_v43 = vsel %vm481_vm8, %v797_v7, %v799_v25 }
 0x38f   : > { %v828_v29 = vsel %vm826_vm13, %v821_v28, %v768_v27 }
 0x390   : > { %875 = vmatpush1.bf16.msra.mxu0 %v828_v29 }
 0x391   : > { %v781_v34 = vpop.permute.xlu1 %780  ;;  %v791_v35 = vpop.permute.xlu0 %790 }
 0x392   : > { %v784_v36 = vsel %vm463_vm6, %v779_v4, %v781_v34  ;;  %v785_v37 = vsel %vm463_vm6, %v781_v34, %v783_v56  ;;  %v793_v38 = vsel %vm472_vm7, %v789_v62, %v791_v35  ;;  %v850_v39 = vsel %vm493_vm2, %v844_v31, %v791_v35 }
 0x393   : > { %v838_v40 = vsel %vm810_vm12, %v776_v32, %v784_v36  ;;  %v841_v41 = vsel %vm810_vm12, %v777_v33, %v785_v37  ;;  %v858_v42 = vsel %vm826_vm13, %v850_v39, %v799_v25 }
 0x394   : > { %1235 = vmatpush3.bf16.msra.mxu1 %v858_v42  ;;  %v848_v44 = vsel %vm493_vm2, %v841_v41, %v793_v38  ;;  %v846_v50 = vsel %vm493_vm2, %v838_v40, %v792_v45  ;;  %vm1019_vm2 = vmor %vm711_vm14, %vm810_vm12 }
 0x395   : > { %v803_v46 = vpop.permute.xlu1 %802  ;;  %v795_v47 = vpop.permute.xlu0 %794  ;;  %v855_v48 = vsel %vm826_vm13, %v848_v44, %v801_v43  ;;  %1236 = vmatprep.subr.bf16.mxu1 %v1702_v0  ;;  %v860_v0 = vld [vmem:[#allocation12] sm:$0x3]  ;;  %vm1021_vm4 = vmor %vm1020_vm3, %vm1019_vm2 }
 0x396   : > { %v800_v49 = vsel %vm481_vm8, %v795_v47, %v797_v7  ;;  %876 = vmatprep.subr.bf16.mxu0 %v855_v48 }
 0x397   : > { %v852_v51 = vsel %vm826_vm13, %v846_v50, %v800_v49 }
 0x398   : > { %877 = vmatpush1.bf16.msra.mxu0 %v852_v51 }
 0x399   : > { %v807_v52 = vpop.permute.xlu1 %806  ;;  %v805_v53 = vpop.permute.xlu0 %804 }
 0x39a   : > { %v872_v54 = vsel %vm810_vm12, %v807_v52, 0  ;;  %v808_v55 = vsel %vm490_vm9, %v803_v46, %v805_v53  ;;  %v809_v56 = vsel %vm490_vm9, %v805_v53, %v807_v52 }
 0x39b   : > { %v866_v57 = vsel %vm810_vm12, %v808_v55, 0  ;;  %1201 = vmatprep.subr.msk.bf16.mxu0 %vm810_vm12, %v809_v56  ;;  %1237 = vmatpush3.bf16.msra.mxu1 %v872_v54 }
 0x39c   : > { %879 = vmatpush1.bf16.msra.mxu0 %v866_v57 }
 0x39e   : > { %1239 = vmatmul.mubr.msk.bf16.vlgmr.msra.gmra.mrb[4].mxu1 %vm861_vm1, %v860_v0 }
 0x39f   : > { %1202 = vmatmul.mubr.msk.bf16.vlgmr.msra.gmra.mrb[4].mxu0 %vm861_vm1, %v860_v0 }
 0x3aa   : > { %v968_v58 = vpop.permute.xlu1 %967  ;;  %v959_v59 = vpop.permute.xlu0 %958 }
 0x471   : > { %v949_v60 = vpop.f32.mrb[4].mxu1 }
 0x472   : > { %v963_v62 = vmul.f32 %v959_v59, %v949_v60  ;;  %v908_v63 = vpop.f32.mrb[4].mxu0  ;;  %v1240_v2 = vpop.f32.mrb[5].mxu1 }
 0x473   : > { %v961_v4 = vmul.f32 %v959_v59, %v908_v63  ;;  %v910_v6 = vpop.f32.mrb[5].mxu0  ;;  %v952_v7 = vpop.f32.mrb[6].mxu1 }
 0x474   : > { %v972_v8 = vadd.f32 %v968_v58, %v963_v62  ;;  %v962_v11 = vmul.f32 %v959_v59, %v910_v6  ;;  %v912_v12 = vpop.f32.mrb[6].mxu0  ;;  %v1241_v13 = vpop.f32.mrb[7].mxu1 }
 0x475   : > { %v970_v15 = vadd.f32 %v968_v58, %v961_v4  ;;  %v913_v16 = vpop.f32.mrb[7].mxu0 }
 0x476   : > { %v975_v17 = vmax.f32 %v972_v8, 0.0  ;;  %v971_v18 = vadd.f32 %v968_v58, %v962_v11 }
 0x477   : > { %v973_v20 = vmax.f32 %v970_v15, 0.0 }
 0x478   : > { %v995_v21 = vmul.f32 %v989_v10, %v975_v17  ;;  %v974_v22 = vmax.f32 %v971_v18, 0.0 }
 0x479   : > { %v993_v23 = vmul.f32 %v981_v5, %v973_v20 }
 0x47a   : > { %v998_v3 = vpack.c.bf16 %v995_v21, %v995_v21  ;;  %v994_v24 = vmul.f32 %v985_v19, %v974_v22 }
 0x47c   : > { %v1204_v25 = vpack.c.bf16 %v994_v24, %v993_v23  ;;  %v1016_v1 = vrot.slane %v998_v3, %v2135_v30 }
 0x47e   : > { %v1009_v9 = vrot.slane %v1204_v25, %v2135_v30 }
 0x480   : > { %v1017_v14 = vcombine.low %v1009_v9, %v1016_v1 }
 0x482   : > { %1022 = vst.msk [vmem:[%s409_s26] sm:$0x3f] %vm1021_vm4, %v1017_v14 }
 0x483   : > { %1623 = shalt.err (!%p1620_p4)
}
 0x484   : > { %s1624_s2 = scalar_lea.hbm %s2234_s14, 96  ;;  %s1628_s20 = scalar_lea.hbm %s2286_s8, 192 }
 0x485   : > { %p1625_p11 = scmp.ne.s32.totalorder %s2234_s14, %s1624_s2  ;;  %p1629_p9 = scmp.lt.u32.totalorder %s2234_s14, %s2286_s8 }
 0x486   : > { %p1630_p7 = scmp.lt.u32.totalorder %s1628_s20, %s1624_s2  ;;  %p1632_p12 = scmp.lt.u32.totalorder %s1624_s2, %s2234_s14 }
 0x487   : > { %p1626_p8 = pnand %p1625_p11, %p2311_p13 }
 0x488   : > { %p1631_p10 = por %p1630_p7, %p1629_p9 }
 0x489   : > { %p1627_p5 = pneg %p1626_p8 }
 0x48a   : > { %p1633_p1 = por %p1632_p12, %p1631_p10 }
 0x48c   : > { %p1634_p3 = pnand %p1633_p1, %p1627_p5 }
 0x48e   : > { %1637 = shalt.err (!%p1634_p3)
}
 0x48f   : > { %1277 = dma.vmem_to_hbm [thread:$0]  (%p2311_p13), %s2236_s23, 96, %s2234_s14, %s1024_s11  }
 0x490 PF: > { %s1050_s26 = sand.u32 1, %s1680_s27   ;;  %p2312_p2 = scmp.ne.s32.totalorder %s2300_s18, 0 }
 0x491   : > { %p2313_p0 = scmp.ge.s32.totalorder %s1692_s30, 2  ;;  %s1051_s22 = scalar_lea.sflag [#allocation5], %s1050_s26 }
 0x493   : > { %p1306_p6 = pnand %p2313_p0, %p2312_p2 }
 0x495   : > { %1675 = dma.done.wait (!%p1306_p6), %s1051_s22, 96  }
 0x496   : > { %1677 = vsyncadd (!%p1306_p6), %s1051_s22, 4294967200  ;;  %p25_p4 = scmp.ge.s32.totalorder %s1958_s17, 4   ;;  %s2314_s27 = smov %s1684_s28 }
 0x497   : > { %s2315_s28 = smov %s1688_s29  ;;  %s2316_s29 = smov %s1970_s16 }
 0x498   : > { %s2317_s30 = smov %s1958_s17  ;;  %27 = sbr.rel (!%p25_p4) target bundleno = 12 (0xc), region = 125 }
 0x49f   :  { %1056 = vsyncpa [#allocation4], 1 }
 0x4a0   :  { %1058 = vsyncpa [#allocation4 + $0x1], 1 }
 0x4a1   :  { %1059 = vsyncpa [#allocation7], 1 }
 0x4a2   :  { %1060 = vsyncpa [#allocation10], 1 }
 0x4a3   :  { %1061 = vsyncpa [#allocation13], 1 }
 0x4a4   :  { %1062 = vsyncpa [#allocation16], 1 }
 0x4a5   :  { %1063 = vsyncpa [#allocation5], 1 }
 0x4a6   :  { %1065 = vsyncpa [#allocation5 + $0x1], 1 }

// kernel: upscaling_forward.5
= control target key start
LH: loop header
LB: loop body
LE: loop exit
PB: predicated region body
PF: predicated region fallthrough
CT: control target
= control target key end

     0   :  { %s3114_s0 = inlined_call_operand.hbm [shape: bf16[2,4,324], index: 0, kind: input, shape index: {}]   ;;  %s3115_s1 = inlined_call_operand.hbm [shape: bf16[2,2], index: 1, kind: input, shape index: {}]   ;;  %s3116_s2 = inlined_call_operand.hbm [shape: bf16[6,2], index: 2, kind: input, shape index: {}]   ;;  %s3117_s3 = inlined_call_operand.hbm [shape: bf16[2,4], index: 3, kind: input, shape index: {}]   ;;  %s3118_s4 = inlined_call_operand.hbm [shape: f32[2,2,1], index: 4, kind: input, shape index: {}]   ;;  %s3119_s5 = inlined_call_operand.hbm [shape: bf16[2,2], index: 5, kind: input, shape index: {}]   ;;  %s3120_s6 = inlined_call_operand.hbm [shape: f32[2,2,1], index: 6, kind: input, shape index: {}]   ;;  %s3121_s7 = inlined_call_operand.hbm [shape: bf16[4,4], index: 7, kind: input, shape index: {}]   ;;  %s3122_s8 = inlined_call_operand.hbm [shape: f32[2,4,1], index: 8, kind: input, shape index: {}]   ;;  %s3123_s9 = inlined_call_operand.hbm [shape: f32[2,4,324], index: 9, kind: output, shape index: {}]  }
   0x1   :  { %3127 = sst [smem:[#allocation24_spill]] %s3115_s1 }
   0x2   :  { %3128 = sst [smem:[#allocation25_spill]] %s3116_s2 }
   0x3   :  { %3129 = sst [smem:[#allocation26_spill]] %s3117_s3 }
   0x4   :  { %14 = vsyncpa [#allocation3], 0 }
   0x5   :  { %16 = vsyncpa [#allocation3 + $0x1], 0 }
   0x6   :  { %17 = vsyncpa [#allocation6], 0 }
   0x7   :  { %18 = vsyncpa [#allocation9], 0 }
   0x8   :  { %19 = vsyncpa [#allocation12], 0 }
   0x9   :  { %20 = vsyncpa [#allocation15], 0 }
   0xa   :  { %21 = vsyncpa [#allocation4], 0 }
   0xb   :  { %23 = vsyncpa [#allocation4 + $0x1], 0  ;;  %s2583_s30 = smov 0   ;;  %s2585_s10 = smov 0  }
   0xc   :  { %s2587_s11 = smov 0   ;;  %s2589_s12 = smov 0  }
   0xd LB: > { %s2515_s13 = smov [#allocation5]   ;;  %s2604_s15 = sadd.s32 4294967295, %s2513_s12   ;;  %s2513_s12 = sphi %s2589_s12, %s3156_s12   ;;  %s2509_s11 = sphi %s2587_s11, %s3155_s11   ;;  %s2505_s10 = sphi %s2585_s10, %s3154_s10   ;;  %s2501_s30 = sphi %s2583_s30, %s3153_s30  }
   0xe   : > { %s267_s14 = sshll.u32 %s2515_s13, 4  ;;  %p1866_p0 = scmp.ge.s32.totalorder %s2513_s12, 1  ;;  %s2609_s14 = int_to_ptr.vmem [resolvable:$true] %s267_s14 }
   0xf   : > { %p3124_p1 = scmp.eq.s32.totalorder %s2604_s15, 0  ;;  %p254_p2 = scmp.lt.s32.totalorder %s2513_s12, 3 }
  0x10   : > { %s2516_s17 = smov [#allocation8]   ;;  %s2517_s19 = smov [#allocation11]  }
  0x11   : > { %p2611_p3 = pnand %p1866_p0, %p254_p2  ;;  %s289_s18 = sshll.u32 %s2516_s17, 4  ;;  %s2618_s18 = int_to_ptr.vmem [resolvable:$true] %s289_s18 }
  0x12   : > { %s313_s20 = sshll.u32 %s2517_s19, 4  ;;  %s2518_s22 = smov [#allocation14]   ;;  %s2626_s20 = int_to_ptr.vmem [resolvable:$true] %s313_s20 }
  0x13   : > { %s3130_s16 = scalar_select %p2611_p3, 1, 0 }
  0x14   : > { %p2036_p5 = pneg %p2611_p3  ;;  %s2628_s23 = sshll.u32 %s2518_s22, 4  ;;  %s338_s23 = int_to_ptr.vmem [resolvable:$true] %s2628_s23 }
  0x15   : > { %s3132_s1 = sld [smem:[#allocation24_spill]] }
  0x16   : > { %p2622_p6 = pnand %p2036_p5, %p3124_p1 }
  0x18   : > { %p2638_p8 = pneg %p2622_p6 }
  0x1b   : > { %s2177_s26 = scalar_lea.hbm %s3132_s1, 16 }
  0x1c   : > { %p2178_p7 = scmp.ne.s32.totalorder %s3132_s1, %s2177_s26  ;;  %p2184_p11 = scmp.lt.u32.totalorder %s2177_s26, %s3132_s1 }
  0x1e   : > { %p2180_p9 = pnand %p2638_p8, %p2178_p7 }
  0x20   : > { %p2181_p10 = pneg %p2180_p9 }
  0x22   : > { %p2186_p12 = pnand %p2184_p11, %p2181_p10 }
  0x24   : > { %2189 = shalt.err (!%p2186_p12)
}
  0x25   : > { %s2190_s19 = scalar_lea.vmem %s2609_s14, 16  ;;  %s2197_s22 = scalar_lea.vmem %s2609_s14, 32 }
  0x26   : > { %p2191_p13 = scmp.ne.s32.totalorder %s2609_s14, %s2190_s19  ;;  %p2198_p5 = scmp.lt.s32.totalorder %s2609_s14, %s2609_s14 }
  0x27   : > { %p2199_p7 = scmp.lt.s32.totalorder %s2197_s22, %s2190_s19 }
  0x28   : > { %p2193_p0 = pnand %p2191_p13, %p2638_p8 }
  0x29   : > { %p2200_p9 = por %p2199_p7, %p2198_p5 }
  0x2a   : > { %p2194_p2 = pneg %p2193_p0 }
  0x2c   : > { %p2201_p4 = pnand %p2200_p9, %p2194_p2 }
  0x2e   : > { %2204 = shalt.err (!%p2201_p4)
}
  0x2f   : > { %2039 = dma.hbm_to_vmem [thread:$0]  (!%p2622_p6), %s3132_s1, 16, %s2609_s14, [#allocation6]  }
  0x30   : > { %s3134_s3 = sld [smem:[#allocation26_spill]] }
  0x36   : > { %s2205_s28 = scalar_lea.hbm %s3134_s3, 16 }
  0x37   : > { %p2206_p10 = scmp.ne.s32.totalorder %s3134_s3, %s2205_s28  ;;  %p2212_p4 = scmp.lt.u32.totalorder %s2205_s28, %s3134_s3 }
  0x39   : > { %p2208_p11 = pnand %p2206_p10, %p2638_p8 }
  0x3b   : > { %p2209_p12 = pneg %p2208_p11 }
  0x3d   : > { %p2214_p13 = pnand %p2212_p4, %p2209_p12 }
  0x3f   : > { %2217 = shalt.err (!%p2214_p13)
}
  0x40   : > { %s2218_s14 = scalar_lea.vmem %s2618_s18, 16  ;;  %s2225_s24 = scalar_lea.vmem %s2618_s18, 32 }
  0x41   : > { %p2219_p0 = scmp.ne.s32.totalorder %s2618_s18, %s2218_s14  ;;  %p2226_p7 = scmp.lt.s32.totalorder %s2618_s18, %s2618_s18 }
  0x42   : > { %p2227_p9 = scmp.lt.s32.totalorder %s2225_s24, %s2218_s14 }
  0x43   : > { %p2221_p2 = pnand %p2219_p0, %p2638_p8 }
  0x44   : > { %p2228_p10 = por %p2227_p9, %p2226_p7 }
  0x45   : > { %p2222_p5 = pneg %p2221_p2 }
  0x47   : > { %p2229_p11 = pnand %p2228_p10, %p2222_p5 }
  0x49   : > { %2232 = shalt.err (!%p2229_p11)
}
  0x4a   : > { %2045 = dma.hbm_to_vmem [thread:$0]  (!%p2622_p6), %s3134_s3, 16, %s2618_s18, [#allocation9]  }
  0x4b   : > { %s2233_s13 = scalar_lea.hbm %s3119_s5, 16 }
  0x4c   : > { %p2234_p12 = scmp.ne.s32.totalorder %s3119_s5, %s2233_s13  ;;  %p2240_p0 = scmp.lt.u32.totalorder %s2233_s13, %s3119_s5 }
  0x4e   : > { %p2236_p4 = pnand %p2234_p12, %p2638_p8 }
  0x50   : > { %p2237_p13 = pneg %p2236_p4 }
  0x52   : > { %p2242_p2 = pnand %p2240_p0, %p2237_p13 }
  0x54   : > { %2245 = shalt.err (!%p2242_p2)
}
  0x55   : > { %s2246_s18 = scalar_lea.vmem %s2626_s20, 16  ;;  %s2253_s24 = scalar_lea.vmem %s2626_s20, 32 }
  0x56   : > { %p2247_p5 = scmp.ne.s32.totalorder %s2626_s20, %s2246_s18  ;;  %p2254_p10 = scmp.lt.s32.totalorder %s2626_s20, %s2626_s20 }
  0x57   : > { %p2255_p11 = scmp.lt.s32.totalorder %s2253_s24, %s2246_s18 }
  0x58   : > { %p2249_p7 = pnand %p2247_p5, %p2638_p8 }
  0x59   : > { %p2256_p12 = por %p2255_p11, %p2254_p10 }
  0x5a   : > { %p2250_p9 = pneg %p2249_p7 }
  0x5c   : > { %p2257_p4 = pnand %p2256_p12, %p2250_p9 }
  0x5e   : > { %2260 = shalt.err (!%p2257_p4)
}
  0x5f   : > { %2051 = dma.hbm_to_vmem [thread:$0]  (!%p2622_p6), %s3119_s5, 16, %s2626_s20, [#allocation12]  }
  0x60   : > { %s2519_s27 = smov [#allocation7]   ;;  %s2261_s19 = scalar_lea.hbm %s3121_s7, 32 }
  0x61   : > { %s278_s28 = sshll.u32 %s2519_s27, 4  ;;  %p2262_p13 = scmp.ne.s32.totalorder %s3121_s7, %s2261_s19  ;;  %s279_s28 = int_to_ptr.vmem [resolvable:$true] %s278_s28 }
  0x62   : > { %p2268_p5 = scmp.lt.u32.totalorder %s2261_s19, %s3121_s7 }
  0x63   : > { %p2264_p0 = pnand %p2262_p13, %p2638_p8 }
  0x65   : > { %p2265_p2 = pneg %p2264_p0 }
  0x67   : > { %p2270_p7 = pnand %p2268_p5, %p2265_p2 }
  0x69   : > { %2273 = shalt.err (!%p2270_p7)
}
  0x6a   : > { %s2274_s20 = scalar_lea.vmem %s338_s23, 32  ;;  %p2282_p12 = scmp.lt.s32.totalorder %s338_s23, %s338_s23 }
  0x6b   : > { %p2275_p9 = scmp.ne.s32.totalorder %s338_s23, %s2274_s20  ;;  %p2283_p4 = scmp.lt.s32.totalorder %s2274_s20, %s2274_s20 }
  0x6d   : > { %p2277_p10 = pnand %p2275_p9, %p2638_p8  ;;  %p2284_p1 = por %p2283_p4, %p2282_p12 }
  0x6f   : > { %p2278_p11 = pneg %p2277_p10 }
  0x71   : > { %p2285_p3 = pnand %p2284_p1, %p2278_p11 }
  0x73   : > { %2288 = shalt.err (!%p2285_p3)
}
  0x74   : > { %2057 = dma.hbm_to_vmem [thread:$0]  (!%p2622_p6), %s3121_s7, 32, %s338_s23, [#allocation15]  }
  0x75   : > { %s3135_s2 = sld [smem:[#allocation25_spill]] }
  0x7b   : > { %s2289_s17 = scalar_lea.hbm %s3135_s2, 64 }
  0x7c   : > { %p2290_p13 = scmp.ne.s32.totalorder %s3135_s2, %s2289_s17  ;;  %p2296_p3 = scmp.lt.u32.totalorder %s2289_s17, %s3135_s2 }
  0x7e   : > { %p2292_p0 = pnand %p2290_p13, %p2638_p8 }
  0x80   : > { %p2293_p1 = pneg %p2292_p0 }
  0x82   : > { %p2298_p2 = pnand %p2296_p3, %p2293_p1 }
  0x84   : > { %2301 = shalt.err (!%p2298_p2)
}
  0x85   : > { %s2302_s24 = scalar_lea.vmem %s279_s28, 64  ;;  %p2310_p10 = scmp.lt.s32.totalorder %s279_s28, %s279_s28 }
  0x86   : > { %p2303_p5 = scmp.ne.s32.totalorder %s279_s28, %s2302_s24  ;;  %p2311_p11 = scmp.lt.s32.totalorder %s2302_s24, %s2302_s24 }
  0x88   : > { %p2305_p7 = pnand %p2303_p5, %p2638_p8  ;;  %p2312_p12 = por %p2311_p11, %p2310_p10 }
  0x8a   : > { %p2306_p9 = pneg %p2305_p7 }
  0x8c   : > { %p2313_p4 = pnand %p2312_p12, %p2306_p9 }
  0x8e   : > { %2316 = shalt.err (!%p2313_p4)
}
  0x8f   : > { %2042 = dma.hbm_to_vmem [thread:$0]  (!%p2622_p6), %s3135_s2, 64, %s279_s28, [#allocation6]  }
  0x90   : > { %s2520_s25 = smov [#allocation10]   ;;  %s2317_s17 = scalar_lea.hbm %s3118_s4, 64 }
  0x91   : > { %s299_s26 = sshll.u32 %s2520_s25, 4  ;;  %p2318_p13 = scmp.ne.s32.totalorder %s3118_s4, %s2317_s17  ;;  %s300_s26 = int_to_ptr.vmem [resolvable:$true] %s299_s26 }
  0x92   : > { %p2324_p3 = scmp.lt.u32.totalorder %s2317_s17, %s3118_s4 }
  0x93   : > { %p2320_p0 = pnand %p2318_p13, %p2638_p8 }
  0x95   : > { %p2321_p1 = pneg %p2320_p0 }
  0x97   : > { %p2326_p2 = pnand %p2324_p3, %p2321_p1 }
  0x99   : > { %2329 = shalt.err (!%p2326_p2)
}
  0x9a   : > { %s2330_s28 = scalar_lea.vmem %s300_s26, 64  ;;  %p2338_p10 = scmp.lt.s32.totalorder %s300_s26, %s300_s26 }
  0x9b   : > { %p2331_p5 = scmp.ne.s32.totalorder %s300_s26, %s2330_s28  ;;  %p2339_p11 = scmp.lt.s32.totalorder %s2330_s28, %s2330_s28 }
  0x9d   : > { %p2333_p7 = pnand %p2331_p5, %p2638_p8  ;;  %p2340_p12 = por %p2339_p11, %p2338_p10 }
  0x9f   : > { %p2334_p9 = pneg %p2333_p7 }
  0xa1   : > { %p2341_p4 = pnand %p2340_p12, %p2334_p9 }
  0xa3   : > { %2344 = shalt.err (!%p2341_p4)
}
  0xa4   : > { %s2521_s24 = smov 32   ;;  %s2522_s23 = smov 2  }
  0xa5   : > { %2048 = dma.hbm_to_vmem [thread:$0]  (!%p2622_p6), %s3118_s4, 64, %s300_s26, [#allocation9], %s2521_s24, %s2521_s24, %s2522_s23  }
  0xa6   : > { %s2523_s27 = smov [#allocation13]   ;;  %s2524_s17 = smov [#allocation16]  }
  0xa7   : > { %s323_s13 = sshll.u32 %s2523_s27, 4  ;;  %s347_s19 = sshll.u32 %s2524_s17, 4  ;;  %s324_s13 = int_to_ptr.vmem [resolvable:$true] %s323_s13  ;;  %s2763_s19 = int_to_ptr.vmem [resolvable:$true] %s347_s19 }
  0xa8   : > { %s2345_s18 = scalar_lea.hbm %s3120_s6, 64 }
  0xa9   : > { %p2346_p13 = scmp.ne.s32.totalorder %s3120_s6, %s2345_s18  ;;  %p2352_p3 = scmp.lt.u32.totalorder %s2345_s18, %s3120_s6 }
  0xab   : > { %p2348_p0 = pnand %p2346_p13, %p2638_p8 }
  0xad   : > { %p2349_p1 = pneg %p2348_p0 }
  0xaf   : > { %p2354_p2 = pnand %p2352_p3, %p2349_p1 }
  0xb1   : > { %2357 = shalt.err (!%p2354_p2)
}
  0xb2   : > { %s2358_s25 = scalar_lea.vmem %s324_s13, 64  ;;  %p2366_p10 = scmp.lt.s32.totalorder %s324_s13, %s324_s13 }
  0xb3   : > { %p2359_p5 = scmp.ne.s32.totalorder %s324_s13, %s2358_s25  ;;  %p2367_p11 = scmp.lt.s32.totalorder %s2358_s25, %s2358_s25 }
  0xb5   : > { %p2361_p7 = pnand %p2359_p5, %p2638_p8  ;;  %p2368_p12 = por %p2367_p11, %p2366_p10 }
  0xb7   : > { %p2362_p9 = pneg %p2361_p7 }
  0xb9   : > { %p2369_p4 = pnand %p2368_p12, %p2362_p9 }
  0xbb   : > { %2372 = shalt.err (!%p2369_p4)
}
  0xbc   : > { %2054 = dma.hbm_to_vmem [thread:$0]  (!%p2622_p6), %s3120_s6, 64, %s324_s13, [#allocation12], %s2521_s24, %s2521_s24, %s2522_s23  }
  0xbd   : > { %s2373_s14 = scalar_lea.hbm %s3122_s8, 128 }
  0xbe   : > { %p2374_p13 = scmp.ne.s32.totalorder %s3122_s8, %s2373_s14  ;;  %p2380_p3 = scmp.lt.u32.totalorder %s2373_s14, %s3122_s8 }
  0xc0   : > { %p2376_p0 = pnand %p2374_p13, %p2638_p8 }
  0xc2   : > { %p2377_p1 = pneg %p2376_p0 }
  0xc4   : > { %p2382_p2 = pnand %p2380_p3, %p2377_p1 }
  0xc6   : > { %2385 = shalt.err (!%p2382_p2)
}
  0xc7   : > { %s2386_s24 = scalar_lea.vmem %s2763_s19, 128  ;;  %p2394_p10 = scmp.lt.s32.totalorder %s2763_s19, %s2763_s19 }
  0xc8   : > { %p2387_p5 = scmp.ne.s32.totalorder %s2763_s19, %s2386_s24  ;;  %p2395_p11 = scmp.lt.s32.totalorder %s2386_s24, %s2386_s24 }
  0xca   : > { %p2389_p7 = pnand %p2387_p5, %p2638_p8  ;;  %p2396_p12 = por %p2395_p11, %p2394_p10 }
  0xcc   : > { %p2390_p9 = pneg %p2389_p7 }
  0xce   : > { %p2397_p4 = pnand %p2396_p12, %p2390_p9 }
  0xd0   : > { %2400 = shalt.err (!%p2397_p4)
}
  0xd1   : > { %s2525_s23 = smov 64   ;;  %s2526_s29 = smov 4  }
  0xd2   : > { %2060 = dma.hbm_to_vmem [thread:$0]  (!%p2622_p6), %s3122_s8, 128, %s2763_s19, [#allocation15], %s2525_s23, %s2525_s23, %s2526_s29  }
  0xd3   : > { %s1865_s1 = sadd.s32 4294967294, %s2513_s12   ;;  %s2808_s27 = sadd.s32 1, %s2513_s12  }
  0xd4   : > { %s33_s17 = ssub.s32 %s2513_s12, %s2808_s27  ;;  %s36_s22 = sadd.s32 1, %s2509_s11 }
  0xd5   : > { %p34_p8 = scmp.eq.s32.totalorder %s33_s17, 0  ;;  %p43_p13 = scmp.ne.s32.totalorder %s2509_s11, %s2505_s10 }
  0xd6   : > { %p44_p0 = scmp.eq.s32.totalorder %s2513_s12, 0  ;;  %p49_p1 = scmp.ne.s32.totalorder %s2505_s10, %s2501_s30 }
  0xd7   : > { %s2819_s14 = scalar_select %p34_p8, %s2509_s11, %s36_s22  }
  0xd8   : > { %p45_p3 = por %p44_p0, %p43_p13  ;;  %p3136_p2 = scmp.eq.s32.totalorder %s2604_s15, 0 }
  0xd9   : > { %p241_p6 = scmp.eq.s32.totalorder %s2604_s15, 1  ;;  %p247_p7 = scmp.eq.s32.totalorder %s1865_s1, 1 }
  0xda   : > { %p2823_p5 = por %p3136_p2, %p49_p1  ;;  %p2077_p9 = scmp.lt.s32.totalorder %s2513_s12, 2 }
  0xdb   : > { %s361_s19 = sand.u32 1, %s2509_s11   ;;  %p2830_p10 = por %p241_p6, %p43_p13 }
  0xdc   : > { %p2834_p11 = por %p247_p7, %p49_p1  ;;  %s1995_s20 = smul.u32 6, %s361_s19 }
  0xdd   : > { %s3138_s18 = scalar_select %p2830_p10, 1, 0 }
  0xde   : > { %s3139_s28 = scalar_select %p2834_p11, 1, 0 }
  0xdf   : > { %s1996_s26 = smul.u32 96, %s2513_s12  ;;  %p2839_p12 = pnand %p2077_p9, %p45_p3 }
  0xe0   : > { %s365_s25 = scalar_lea.vmem [#allocation2], %s1995_s20  ;;  %s362_s17 = scalar_lea.sflag [#allocation3], %s361_s19 }
  0xe1   : > { %s2846_s13 = scalar_lea.hbm %s3114_s0, %s1996_s26  ;;  %s373_s1 = sshll.u32 %s365_s25, 4  ;;  %s2848_s1 = int_to_ptr.vmem [resolvable:$true] %s373_s1 }
  0xe2   : > { %s2401_s22 = scalar_lea.hbm %s2846_s13, 96  ;;  %p2403_p8 = pneg %p2839_p12 }
  0xe3   : > { %p2402_p4 = scmp.ne.s32.totalorder %s2846_s13, %s2401_s22  ;;  %s2406_s29 = scalar_lea.hbm %s3114_s0, 192 }
  0xe4   : > { %p2407_p1 = scmp.lt.u32.totalorder %s2846_s13, %s3114_s0  ;;  %p2408_p3 = scmp.lt.u32.totalorder %s2406_s29, %s2401_s22 }
  0xe5   : > { %p2404_p13 = pnand %p2403_p8, %p2402_p4  ;;  %p2410_p6 = scmp.lt.u32.totalorder %s2401_s22, %s2846_s13 }
  0xe6   : > { %p2409_p2 = por %p2408_p3, %p2407_p1 }
  0xe7   : > { %p2405_p0 = pneg %p2404_p13 }
  0xe8   : > { %p2411_p7 = por %p2410_p6, %p2409_p2 }
  0xea   : > { %p2412_p9 = pnand %p2411_p7, %p2405_p0 }
  0xec   : > { %2415 = shalt.err (!%p2412_p9)
}
  0xed   : > { %s2416_s19 = scalar_lea.vmem %s2848_s1, 96  ;;  %s2527_s20 = smov [#allocation2]  }
  0xee   : > { %p2417_p4 = scmp.ne.s32.totalorder %s2848_s1, %s2416_s19  ;;  %s2421_s25 = sshll.u32 %s2527_s20, 4  ;;  %s2422_s25 = int_to_ptr.vmem [resolvable:$false] %s2421_s25 }
  0xef   : > { %s2423_s2 = scalar_lea.vmem %s2422_s25, 192  ;;  %p2424_p10 = scmp.lt.s32.totalorder %s2848_s1, %s2422_s25 }
  0xf0   : > { %p2419_p13 = pnand %p2417_p4, %p2403_p8  ;;  %p2425_p1 = scmp.lt.s32.totalorder %s2423_s2, %s2416_s19 }
  0xf2   : > { %p2420_p11 = pneg %p2419_p13  ;;  %p2426_p3 = por %p2425_p1, %p2424_p10 }
  0xf4   : > { %p2427_p2 = pnand %p2426_p3, %p2420_p11 }
  0xf6   : > { %2430 = shalt.err (!%p2427_p2)
}
  0xf7   : > { %2064 = dma.hbm_to_vmem [thread:$0]  (!%p2839_p12), %s2846_s13, 96, %s2848_s1, %s362_s17  }
  0xf8   : > { %p3141_p0 = scmp.ne.s32.totalorder %s3130_s16, 0 }
  0xf9   : > { %s2878_s3 = sand.u32 (!%p3141_p0), 1, %s2505_s10  }
  0xfa   : > { %382 = sbr.rel (%p3141_p0) target bundleno = 2913 (0xb61), region = 56  ;;  %s385_s23 = scalar_lea.sflag (!%p3141_p0), [#allocation3], %s2878_s3 }
  0xfb   : > { %s1997_s22 = smul.u32 (!%p3141_p0), 6, %s2878_s3 }
  0xfd   : > { %s2882_s26 = scalar_lea.vmem (!%p3141_p0), [#allocation2], %s1997_s22 }
 0x101   : > { %2476 = dma.done.wait (%p2823_p5), %s385_s23, 96  }
 0x102   : > { %2478 = vsyncadd (%p2823_p5), %s385_s23, 4294967200  ;;  %p3142_p10 = scmp.eq.s32.totalorder %s2604_s15, 0 }
 0x104   : > { %2480 = dma.done.wait (%p3142_p10), [#allocation6], 80   ;;  %p3143_p11 = pmov %p3142_p10 }
 0x105   : > { %p3144_p12 = pmov %p3142_p10 }
 0x106   : > { %2482 = vsyncadd (%p3143_p11), [#allocation6], 4294967216 }
 0x107   : > { %2484 = dma.done.wait (%p3144_p12), [#allocation9], 80   ;;  %p3145_p8 = pmov %p3142_p10 }
 0x109   : > { %2486 = vsyncadd (%p3145_p8), [#allocation9], 4294967216  ;;  %p3146_p6 = pmov %p3145_p8 }
 0x10b   : > { %2488 = dma.done.wait (%p3146_p6), [#allocation12], 80   ;;  %p3147_p7 = pmov %p3146_p6 }
 0x10c   : > { %p3148_p5 = pmov %p3146_p6 }
 0x10d   : > { %2490 = vsyncadd (%p3147_p7), [#allocation12], 4294967216 }
 0x10e   : > { %2492 = dma.done.wait (%p3148_p5), [#allocation15], 160   ;;  %p3149_p9 = pmov %p3148_p5 }
 0x10f   : > { %v464_v0 = vlaneseq  ;;  %v2528_v1 = vmov 1983009808   ;;  %v2529_v3 = vmov 0   ;;  %v2530_v5 = vmov 0.0   ;;  %v2911_v8 = vld [vmem:[%s2882_s26] sm:$0x15] }
 0x110   : > { %2494 = vsyncadd (%p3149_p9), [#allocation15], 4294967136  ;;  %v462_v2 = vunpack.c.l.s4 %v2528_v1  ;;  %522 = vmatprep.mubr.bf16.mxu0 %v2529_v3  ;;  %2135 = vset.pattern.permute.xlu1 %v2529_v3  ;;  %vm2531_vm0 = vmmov 0   ;;  %vm480_vm1 = vcmask 1040384   ;;  %v457_v9 = vld [vmem:[%s2882_s26] sm:$0x2a]  ;;  %v460_v12 = vcombine.high %v2911_v8, %v2911_v8 }
 0x111   : > { %v465_v4 = vshrl.u32 %v464_v0, 7  ;;  %1933 = vmatprep.subr.bf16.mxu1 %v2530_v5  ;;  %1935 = vmatprep.mubr.msk.bf16.mxu1 %vm2531_vm0, %v2530_v5  ;;  %v573_v13 = vcombine.high %v457_v9, %v457_v9  ;;  %v458_v21 = vld [vmem:[#allocation5] sm:$0x1]  ;;  %vm476_vm2 = vcmask 15360   ;;  %v571_v26 = vld [vmem:[#allocation7] sm:$0x7] }
 0x112   : > { %v463_v6 = vunpack.c.0.s8 %v462_v2  ;;  %2136 = vset.pattern.permute.xlu0 %v2529_v3  ;;  %vm696_vm3 = vcmask 556032   ;;  %vm784_vm4 = vcmask 9216   ;;  %vm913_vm5 = vcmask 1041408   ;;  %s1998_s16 = smul.u32 12, %s2878_s3  ;;  %p3150_p13 = scmp.ne.s32.totalorder %s3138_s18, 0 }
 0x113   : > { %vm909_vm6 = vcmask 31744   ;;  %vm1018_vm7 = vcmask 549888   ;;  %vm1604_vm8 = vcmask 1043456   ;;  %vm1619_vm9 = vcmask 551936   ;;  %s1999_s21 = smul.u32 192, %s2604_s15  ;;  %s1705_s15 = scalar_lea.sflag [#allocation4], %s2878_s3 }
 0x114   : > { %v466_v7 = vsub.s32 %v463_v6, %v465_v4  ;;  %s454_s24 = scalar_lea.vmem [#allocation17], %s1998_s16  ;;  %s2532_s20 = smov [#allocation17]  }
 0x115   : > { %s1719_s13 = sshll.u32 %s454_s24, 4  ;;  %s3069_s29 = scalar_lea.hbm %s3123_s9, %s1999_s21  ;;  %s3071_s13 = int_to_ptr.vmem [resolvable:$true] %s1719_s13 }
 0x116   : > { %v467_v10 = vrot.slane %v2911_v8, %v466_v7  ;;  %v2915_v11 = vrot.slane %v457_v9, %v466_v7  ;;  %v474_v18 = vrot.slane %v460_v12, %v466_v7  ;;  %v2923_v19 = vrot.slane %v573_v13, %v466_v7  ;;  %v1001_v9 = vld [vmem:[#allocation10] sm:$0x3]  ;;  %s2431_s19 = scalar_lea.vmem %s3071_s13, 192  ;;  %s2435_s25 = sshll.u32 %s2532_s20, 4  ;;  %s2436_s25 = int_to_ptr.vmem [resolvable:$false] %s2435_s25 }
 0x117   : > { %1071 = vperm.xlu1 %2135, %v1001_v9   ;;  %p2432_p4 = scmp.ne.s32.totalorder %s3071_s13, %s2431_s19  ;;  %s2437_s2 = scalar_lea.vmem %s2436_s25, 384 }
 0x118   : > { %v475_v14 = vcombine.high %v467_v10, %v467_v10  ;;  %v482_v15 = vsel %vm480_vm1, %v467_v10, 0  ;;  %v588_v16 = vcombine.high %v2915_v11, %v2915_v11  ;;  %v589_v17 = vrot.slane %v2915_v11, 1  ;;  %v1003_v10 = vld [vmem:[#allocation10 + $0x2] sm:$0x3]  ;;  %p2438_p2 = scmp.lt.s32.totalorder %s3071_s13, %s2436_s25  ;;  %p2439_p0 = scmp.lt.s32.totalorder %s2437_s2, %s2431_s19 }
 0x119   : > { %v488_v22 = vsel %vm480_vm1, %v474_v18, 0  ;;  %v591_v23 = vrot.slane %v2923_v19, 1  ;;  %p2433_p1 = pnand %p2432_p4, %p3150_p13 }
 0x11a   : > { %1886 = vmatprep.subr.msk.bf16.mxu0 %vm480_vm1, %v475_v14  ;;  %v2926_v20 = vrot.slane %v588_v16, 1  ;;  %v596_v24 = vsel %vm480_vm1, %v589_v17, 0  ;;  %1934 = vmatpush3.bf16.msra.mxu1 %v488_v22  ;;  %p2440_p10 = por %p2439_p0, %p2438_p2 }
 0x11b   : > { %491 = vmatpush1.bf16.msra.mxu0 %v482_v15  ;;  %1939 = vmatprep.subr.bf16.mxu1 %v2530_v5  ;;  %v602_v25 = vsel %vm480_vm1, %v591_v23, 0  ;;  %p2434_p3 = pneg %p2433_p1 }
 0x11c   : > { %1889 = vmatprep.subr.msk.bf16.mxu0 %vm480_vm1, %v2926_v20  ;;  %1079 = vperm.xlu1 %2135, %v1003_v10  }
 0x11d   : > { %1936 = vmatmul.mubr.msk.bf16.vlgmr.msra.gmra.mrb[0].mxu1 %vm476_vm2, %v458_v21  ;;  %p2441_p11 = pnand %p2440_p10, %p2434_p3 }
 0x11e   : > { %1887 = vmatmul.mubr.msk.bf16.vlgmr.msra.gmra.mrb[0].mxu0 %vm476_vm2, %v458_v21  ;;  %1940 = vmatpush3.bf16.msra.mxu1 %v602_v25 }
 0x11f   : > { %605 = vmatpush1.bf16.msra.mxu0 %v596_v24  ;;  %636 = vmatprep.mubr.bf16.mxu0 %v2529_v3 }
 0x120   : > { %1941 = vmatprep.mubr.msk.bf16.mxu1 %vm2531_vm0, %v2530_v5 }
 0x125   : > { %1942 = vmatmul.mubr.msk.bf16.vlgmr.msra.gmra.mrb[4].mxu1 %vm476_vm2, %v571_v26 }
 0x126   : > { %1890 = vmatmul.mubr.msk.bf16.vlgmr.msra.gmra.mrb[4].mxu0 %vm476_vm2, %v571_v26  ;;  %844 = vmatprep.mubr.bf16.mxu1 %v2529_v3 }
 0x1f0   : > { %v2951_v30 = vpop.f32.mrb[0].mxu1 }
 0x1f1   : > { %v2947_v27 = vpop.f32.mrb[0].mxu0  ;;  %v1937_v32 = vpop.f32.mrb[1].mxu1 }
 0x1f2   : > { %v2949_v28 = vpop.f32.mrb[1].mxu0  ;;  %v568_v33 = vpop.f32.mrb[2].mxu1 }
 0x1f3   : > { %v528_v29 = vpop.f32.mrb[2].mxu0  ;;  %v1938_v34 = vpop.f32.mrb[3].mxu1 }
 0x1f4   : > { %v529_v31 = vpop.f32.mrb[3].mxu0  ;;  %v1089_v34 = vpack.c.bf16 %v2949_v28, %v2949_v28 }
 0x1f5   : > { %v893_v31 = vld [vmem:[#allocation8] sm:$0x1] }
 0x1f8   : > { %v679_v40 = vpop.f32.mrb[4].mxu1 }
 0x1f9   : > { %v638_v35 = vpop.f32.mrb[4].mxu0  ;;  %v1943_v43 = vpop.f32.mrb[5].mxu1  ;;  %v687_v46 = vpack.c.bf16 %v679_v40, %v679_v40 }
 0x1fa   : > { %v685_v36 = vpack.c.bf16 %v638_v35, %v638_v35  ;;  %v640_v37 = vpop.f32.mrb[5].mxu0  ;;  %v682_v47 = vpop.f32.mrb[6].mxu1 }
 0x1fb   : > { %v686_v38 = vpack.c.bf16 %v640_v37, %v640_v37  ;;  %v642_v39 = vpop.f32.mrb[6].mxu0  ;;  %v1944_v50 = vpop.f32.mrb[7].mxu1  ;;  %v693_v51 = vrot.slane %v687_v46, 1  ;;  %v799_v2 = vrot.slane %v687_v46, 2 }
 0x1fc   : > { %v797_v41 = vrot.slane %v685_v36, 2  ;;  %v643_v42 = vpop.f32.mrb[7].mxu0  ;;  %v691_v48 = vrot.slane %v685_v36, 1 }
 0x1fd   : > { %v798_v44 = vrot.slane %v686_v38, 2  ;;  %735 = vmatprep.mubr.bf16.mxu0 %v686_v38  ;;  %v692_v45 = vrot.slane %v686_v38, 1  ;;  %v701_v52 = vsel %vm696_vm3, %v693_v51, 0  ;;  %v810_v7 = vsel %vm480_vm1, %v799_v2, 0 }
 0x1fe   : > { %v804_v49 = vsel %vm480_vm1, %v797_v41, 0 }
 0x1ff   : > { %703 = vmatprep.subr.bf16.mxu0 %v692_v45  ;;  %1893 = vmatprep.subr.msk.bf16.mxu1 %vm480_vm1, %v798_v44 }
 0x200   : > { %704 = vmatpush1.bf16.xpose.msra.mxu0 %v691_v48  ;;  %813 = vmatpush1.bf16.msra.mxu1 %v804_v49 }
 0x201   : > { %1945 = vmatprep.subr.bf16.mxu0 %v2530_v5  ;;  %1951 = vmatprep.subr.bf16.mxu1 %v2530_v5 }
 0x207   : > { %736 = vmatmul.mubr.bf16.vlgmr.msra.gmra.mrb[8].mxu0 %v685_v36 }
 0x208   : > { %1946 = vmatpush3.bf16.xpose.msra.mxu0 %v701_v52  ;;  %1947 = vmatprep.mubr.msk.bf16.mxu0 %vm2531_vm0, %v2530_v5 }
 0x213   : > { %1948 = vmatmul.mubr.msk.bf16.vlgmr.msra.gmra.mrb[8].mxu0 %vm696_vm3, %v687_v46 }
 0x214   : > { %952 = vmatprep.mubr.bf16.mxu0 %v2529_v3 }
 0x2e6   : > { %v777_v53 = vpop.f32.mrb[8].mxu0 }
 0x2e7   : > { %v783_v54 = vmul.f32 0.001953125, %v777_v53  ;;  %v1949_v55 = vpop.f32.mrb[9].mxu0 }
 0x2e8   : > { %v780_v56 = vpop.f32.mrb[10].mxu0 }
 0x2e9   : > { %v1950_v57 = vpop.f32.mrb[11].mxu0  ;;  %v785_v58 = vsel %vm784_vm4, %v783_v54, -inf }
 0x2ea   : > { %786 = vmax.xlane.f32.xlu0 %v785_v58 }
 0x377   : > { %v787_v59 = vpop.xlane.xlu0 %786 }
 0x378   : > { %v788_v60 = vsub.f32 %v783_v54, %v787_v59 }
 0x37a   : > { %v789_v61 = vmul.f32 1.442695, %v788_v60 }
 0x37c   : > { %2139 = vpow2.f32 %v789_v61 }
 0x386   : > { %v2140_v62 = vpop.eup %2139 }
 0x387   : > { %v791_v63 = vsel %vm784_vm4, %v2140_v62, 0.0 }
 0x388   : > { %792 = vadd.xlane.f32.xlu0 %v791_v63 }
 0x415   : > { %v793_v0 = vpop.xlane.xlu0 %792 }
 0x416   : > { %2141 = vrcp.f32 %v793_v0 }
 0x420   : > { %v2142_v1 = vpop.eup %2141 }
 0x421   : > { %v795_v4 = vmul.f32 %v2142_v1, %v2140_v62 }
 0x423   : > { %v796_v6 = vpack.c.bf16 %v795_v4, %v795_v4 }
 0x425   : > { %1894 = vmatmul.mubr.msk.bf16.vlgmr.msra.gmra.mrb[8].mxu1 %vm476_vm2, %v796_v6 }
 0x426   : > { %1952 = vmatpush3.bf16.msra.mxu1 %v810_v7  ;;  %1953 = vmatprep.mubr.msk.bf16.mxu1 %vm2531_vm0, %v2530_v5 }
 0x427   : > { %1957 = vmatprep.subr.bf16.mxu1 %v2530_v5 }
 0x42d   : > { %1954 = vmatmul.mubr.msk.bf16.vlgmr.msra.gmra.mrb[12].mxu1 %vm476_vm2, %v796_v6 }
 0x42e   : > { %1959 = vmatprep.mubr.msk.bf16.mxu1 %vm2531_vm0, %v2530_v5 }
 0x4f8   : > { %v846_v12 = vpop.f32.mrb[8].mxu1 }
 0x4f9   : > { %v894_v13 = vpack.c.bf16 %v846_v12, %v846_v12  ;;  %v848_v14 = vpop.f32.mrb[9].mxu1 }
 0x4fa   : > { %v895_v15 = vpack.c.bf16 %v848_v14, %v848_v14  ;;  %v850_v16 = vpop.f32.mrb[10].mxu1 }
 0x4fb   : > { %v900_v18 = vrot.slane %v894_v13, 7  ;;  %v851_v21 = vpop.f32.mrb[11].mxu1 }
 0x4fc   : > { %v901_v22 = vrot.slane %v895_v15, 7 }
 0x4fd   : > { %v904_v24 = vsel %vm480_vm1, %v589_v17, %v900_v18 }
 0x4fe   : > { %v906_v25 = vsel %vm480_vm1, %v2926_v20, %v901_v22  ;;  %v914_v26 = vsel %vm913_vm5, %v904_v24, 0 }
 0x4ff   : > { %1896 = vmatprep.subr.msk.bf16.mxu0 %vm913_vm5, %v906_v25 }
 0x500   : > { %v887_v29 = vpop.f32.mrb[12].mxu1  ;;  %921 = vmatpush1.bf16.msra.mxu0 %v914_v26 }
 0x501   : > { %v896_v32 = vpack.c.bf16 %v887_v29, %v887_v29  ;;  %v1955_v33 = vpop.f32.mrb[13].mxu1 }
 0x502   : > { %v890_v35 = vpop.f32.mrb[14].mxu1 }
 0x503   : > { %v902_v11 = vrot.slane %v896_v32, 7  ;;  %v1956_v36 = vpop.f32.mrb[15].mxu1  ;;  %1897 = vmatmul.mubr.msk.bf16.vlgmr.msra.gmra.mrb[12].mxu0 %vm909_vm6, %v893_v31 }
 0x504   : > { %1129 = vmatprep.mubr.bf16.mxu0 %v1089_v34 }
 0x505   : > { %v908_v17 = vsel %vm480_vm1, %v591_v23, %v902_v11 }
 0x506   : > { %v918_v20 = vsel %vm913_vm5, %v908_v17, 0 }
 0x507   : > { %1958 = vmatpush3.bf16.msra.mxu1 %v918_v20 }
 0x50a   : > { %1960 = vmatmul.mubr.msk.bf16.vlgmr.msra.gmra.mrb[16].mxu1 %vm909_vm6, %v893_v31 }
 0x50b   : > { %1233 = vmatprep.mubr.bf16.mxu1 %v2529_v3 }
 0x5d6   : > { %v954_v37 = vpop.f32.mrb[12].mxu0 }
 0x5d7   : > { %v1004_v28 = vsel %vm913_vm5, %v954_v37, 0.0  ;;  %v956_v38 = vpop.f32.mrb[13].mxu0 }
 0x5d8   : > { %v1005_v39 = vrot.slane %v1004_v28, 4  ;;  %v1011_v40 = vsel %vm913_vm5, %v956_v38, 0.0  ;;  %v958_v41 = vpop.f32.mrb[14].mxu0 }
 0x5d9   : > { %v1012_v42 = vrot.slane %v1011_v40, 4  ;;  %v959_v43 = vpop.f32.mrb[15].mxu0 }
 0x5da   : > { %v1006_v19 = vadd.f32 %v1005_v39, %v1004_v28 }
 0x5db   : > { %v1013_v44 = vadd.f32 %v1012_v42, %v1011_v40  ;;  %v1072_v42 = vpop.permute.xlu1 %1071 }
 0x5dc   : > { %v1007_v23 = vrot.slane %v1006_v19, 2 }
 0x5dd   : > { %v1014_v45 = vrot.slane %v1013_v44, 2  ;;  %v995_v46 = vpop.f32.mrb[16].mxu1 }
 0x5de   : > { %v1008_v47 = vadd.f32 %v1007_v23, %v1006_v19  ;;  %v1019_v48 = vsel %vm1018_vm7, %v995_v46, 0.0  ;;  %v1961_v49 = vpop.f32.mrb[17].mxu1 }
 0x5df   : > { %v1015_v50 = vadd.f32 %v1014_v45, %v1013_v44  ;;  %v1020_v51 = vrot.slane %v1019_v48, 4  ;;  %v998_v52 = vpop.f32.mrb[18].mxu1 }
 0x5e0   : > { %v1009_v53 = vrot.slane %v1008_v47, 1  ;;  %v1962_v54 = vpop.f32.mrb[19].mxu1 }
 0x5e1   : > { %v1016_v55 = vrot.slane %v1015_v50, 1  ;;  %v1021_v56 = vadd.f32 %v1020_v51, %v1019_v48 }
 0x5e2   : > { %v1010_v57 = vadd.f32 %v1009_v53, %v1008_v47  ;;  %v1080_v47 = vpop.permute.xlu1 %1079 }
 0x5e3   : > { %v1017_v58 = vadd.f32 %v1016_v55, %v1015_v50  ;;  %v1022_v59 = vrot.slane %v1021_v56, 2 }
 0x5e4   : > { %v1027_v60 = vmul.f32 0.5, %v1010_v57 }
 0x5e5   : > { %v1028_v61 = vmul.f32 0.5, %v1017_v58  ;;  %v1023_v62 = vadd.f32 %v1022_v59, %v1021_v56  ;;  %v1088_v58 = vpack.c.bf16 %v2947_v27, %v2947_v27 }
 0x5e6   : > { %v1030_v63 = vsub.f32 %v954_v37, %v1027_v60  ;;  %v1090_v60 = vpack.c.bf16 %v2951_v30, %v2951_v30  ;;  %v1412_v30 = vld [vmem:[#allocation13 + $0x2] sm:$0x3] }
 0x5e7   : > { %v1031_v0 = vsub.f32 %v956_v38, %v1028_v61  ;;  %v1024_v1 = vrot.slane %v1023_v62, 1 }
 0x5e8   : > { %v1033_v2 = vmul.f32 %v1030_v63, %v1030_v63 }
 0x5e9   : > { %v1034_v4 = vmul.f32 %v1031_v0, %v1031_v0  ;;  %v1025_v6 = vadd.f32 %v1024_v1, %v1023_v62 }
 0x5ea   : > { %v1036_v7 = vsel %vm913_vm5, %v1033_v2, 0.0 }
 0x5eb   : > { %v1037_v9 = vrot.slane %v1036_v7, 4  ;;  %v1043_v10 = vsel %vm913_vm5, %v1034_v4, 0.0  ;;  %v1029_v12 = vmul.f32 0.5, %v1025_v6 }
 0x5ec   : > { %v1044_v13 = vrot.slane %v1043_v10, 4 }
 0x5ed   : > { %v1038_v14 = vadd.f32 %v1037_v9, %v1036_v7  ;;  %v1032_v15 = vsub.f32 %v995_v46, %v1029_v12 }
 0x5ee   : > { %v1045_v16 = vadd.f32 %v1044_v13, %v1043_v10 }
 0x5ef   : > { %v1039_v18 = vrot.slane %v1038_v14, 2  ;;  %v1035_v21 = vmul.f32 %v1032_v15, %v1032_v15 }
 0x5f0   : > { %v1046_v22 = vrot.slane %v1045_v16, 2 }
 0x5f1   : > { %v1040_v24 = vadd.f32 %v1039_v18, %v1038_v14  ;;  %v1050_v25 = vsel %vm1018_vm7, %v1035_v21, 0.0  ;;  %v1601_v18 = vld [vmem:[#allocation16] sm:$0xf]  ;;  %v1603_v21 = vld [vmem:[#allocation16 + $0x4] sm:$0xf] }
 0x5f2   : > { %v1047_v26 = vadd.f32 %v1046_v22, %v1045_v16  ;;  %v1051_v29 = vrot.slane %v1050_v25, 4  ;;  %v1410_v16 = vld [vmem:[#allocation13] sm:$0x3] }
 0x5f3   : > { %v1041_v31 = vrot.slane %v1040_v24, 1 }
 0x5f4   : > { %v1048_v32 = vrot.slane %v1047_v26, 1  ;;  %v1052_v33 = vadd.f32 %v1051_v29, %v1050_v25 }
 0x5f5   : > { %v1042_v34 = vadd.f32 %v1041_v31, %v1040_v24 }
 0x5f6   : > { %v1049_v35 = vadd.f32 %v1048_v32, %v1047_v26  ;;  %v1053_v11 = vrot.slane %v1052_v33, 2 }
 0x5f7   : > { %v1057_v36 = vmul.f32 0.5, %v1042_v34 }
 0x5f8   : > { %v1058_v17 = vmul.f32 0.5, %v1049_v35  ;;  %v1054_v20 = vadd.f32 %v1053_v11, %v1052_v33 }
 0x5f9   : > { %v1060_v37 = vadd.f32 1e-05, %v1057_v36 }
 0x5fa   : > { %v1061_v28 = vadd.f32 1e-05, %v1058_v17  ;;  %v1055_v38 = vrot.slane %v1054_v20, 1 }
 0x5fb   : > { %2143 = vrsqrt.f32 %v1060_v37 }
 0x5fc   : > { %2145 = vrsqrt.f32 %v1061_v28  ;;  %v1056_v39 = vadd.f32 %v1055_v38, %v1054_v20 }
 0x5fe   : > { %v1059_v40 = vmul.f32 0.5, %v1056_v39 }
 0x600   : > { %v1062_v41 = vadd.f32 1e-05, %v1059_v40  ;;  %v1300_v40 = vunpack.c.l.bf16 %v2911_v8 }
 0x602   : > { %2147 = vrsqrt.f32 %v1062_v41 }
 0x605   : > { %v2144_v43 = vpop.eup %2143 }
 0x606   : > { %v2146_v19 = vpop.eup %2145  ;;  %v1066_v44 = vmul.f32 %v2144_v43, %v1030_v63 }
 0x607   : > { %v1067_v23 = vmul.f32 %v2146_v19, %v1031_v0  ;;  %v1301_v19 = vunpack.c.h.bf16 %v2911_v8 }
 0x608   : > { %v1074_v45 = vmul.f32 %v1072_v42, %v1066_v44 }
 0x609   : > { %v1075_v46 = vmul.f32 %v1072_v42, %v1067_v23 }
 0x60a   : > { %v1082_v48 = vadd.f32 %v1080_v47, %v1074_v45 }
 0x60b   : > { %v1083_v49 = vadd.f32 %v1080_v47, %v1075_v46 }
 0x60c   : > { %v2148_v50 = vpop.eup %2147  ;;  %v2994_v51 = vpack.c.bf16 %v1082_v48, %v1082_v48 }
 0x60d   : > { %v1068_v52 = vmul.f32 %v2148_v50, %v1032_v15  ;;  %v2996_v53 = vpack.c.bf16 %v1083_v49, %v1083_v49 }
 0x60e   : > { %v1194_v54 = vsel %vm480_vm1, %v2994_v51, 0 }
 0x60f   : > { %v1076_v55 = vmul.f32 %v1072_v42, %v1068_v52  ;;  %1097 = vmatprep.subr.bf16.mxu0 %v2996_v53  ;;  %1900 = vmatprep.subr.msk.bf16.mxu1 %vm480_vm1, %v2996_v53  ;;  %v1310_v52 = vld [vmem:[#allocation11] sm:$0x1] }
 0x610   : > { %1098 = vmatpush1.bf16.xpose.msra.mxu0 %v2994_v51  ;;  %1202 = vmatpush1.bf16.msra.mxu1 %v1194_v54 }
 0x611   : > { %v1084_v56 = vadd.f32 %v1080_v47, %v1076_v55  ;;  %1963 = vmatprep.subr.bf16.mxu0 %v2530_v5  ;;  %1969 = vmatprep.subr.bf16.mxu1 %v2530_v5 }
 0x613   : > { %v3006_v57 = vpack.c.bf16 %v1084_v56, %v1084_v56 }
 0x615   : > { %v1095_v59 = vsel %vm696_vm3, %v3006_v57, 0  ;;  %v1199_v15 = vsel %vm480_vm1, %v3006_v57, 0 }
 0x617   : > { %1130 = vmatmul.mubr.bf16.vlgmr.msra.gmra.mrb[16].mxu0 %v1088_v58 }
 0x618   : > { %1964 = vmatpush3.bf16.xpose.msra.mxu0 %v1095_v59  ;;  %1965 = vmatprep.mubr.msk.bf16.mxu0 %vm2531_vm0, %v2530_v5 }
 0x623   : > { %1966 = vmatmul.mubr.msk.bf16.vlgmr.msra.gmra.mrb[16].mxu0 %vm696_vm3, %v1090_v60 }
 0x624   : > { %1361 = vmatprep.mubr.bf16.mxu0 %v2529_v3 }
 0x6f6   : > { %v1171_v61 = vpop.f32.mrb[16].mxu0 }
 0x6f7   : > { %v1177_v62 = vmul.f32 0.001953125, %v1171_v61  ;;  %v1967_v63 = vpop.f32.mrb[17].mxu0 }
 0x6f8   : > { %v1174_v0 = vpop.f32.mrb[18].mxu0 }
 0x6f9   : > { %v1968_v27 = vpop.f32.mrb[19].mxu0  ;;  %v1178_v1 = vsel %vm784_vm4, %v1177_v62, -inf }
 0x6fa   : > { %1179 = vmax.xlane.f32.xlu0 %v1178_v1 }
 0x710   : > { %1478 = vperm.xlu0 %2136, %v1410_v16  }
 0x714   : > { %1672 = vperm.xlu0 %2136, %v1601_v18  }
 0x718   : > { %1680 = vperm.xlu0 %2136, %v1603_v21  }
 0x787   : > { %v1180_v2 = vpop.xlane.xlu0 %1179 }
 0x788   : > { %v1181_v4 = vsub.f32 %v1177_v62, %v1180_v2 }
 0x78a   : > { %v1182_v6 = vmul.f32 1.442695, %v1181_v4 }
 0x78c   : > { %2149 = vpow2.f32 %v1182_v6 }
 0x796   : > { %v2150_v7 = vpop.eup %2149 }
 0x797   : > { %v1184_v9 = vsel %vm784_vm4, %v2150_v7, 0.0 }
 0x798   : > { %1185 = vadd.xlane.f32.xlu1 %v1184_v9 }
 0x7a9   : > { %1486 = vperm.xlu1 %2135, %v1412_v30  }
 0x825   : > { %v1186_v10 = vpop.xlane.xlu1 %1185 }
 0x826   : > { %2151 = vrcp.f32 %v1186_v10 }
 0x830   : > { %v2152_v12 = vpop.eup %2151 }
 0x831   : > { %v1188_v13 = vmul.f32 %v2152_v12, %v2150_v7 }
 0x833   : > { %v1189_v14 = vpack.c.bf16 %v1188_v13, %v1188_v13 }
 0x835   : > { %1901 = vmatmul.mubr.msk.bf16.vlgmr.msra.gmra.mrb[20].mxu1 %vm476_vm2, %v1189_v14 }
 0x836   : > { %1970 = vmatpush3.bf16.msra.mxu1 %v1199_v15  ;;  %1971 = vmatprep.mubr.msk.bf16.mxu1 %vm2531_vm0, %v2530_v5 }
 0x837   : > { %1975 = vmatprep.subr.bf16.mxu1 %v2530_v5 }
 0x83d   : > { %1972 = vmatmul.mubr.msk.bf16.vlgmr.msra.gmra.mrb[24].mxu1 %vm476_vm2, %v1189_v14 }
 0x83e   : > { %1977 = vmatprep.mubr.msk.bf16.mxu1 %vm2531_vm0, %v2530_v5 }
 0x908   : > { %v1235_v22 = vpop.f32.mrb[20].mxu1 }
 0x909   : > { %v1903_v24 = vmul.f32 -1.442695, %v1235_v22  ;;  %v1237_v25 = vpop.f32.mrb[21].mxu1 }
 0x90a   : > { %v1904_v26 = vmul.f32 -1.442695, %v1237_v25  ;;  %v1239_v29 = vpop.f32.mrb[22].mxu1 }
 0x90b   : > { %2153 = vpow2.f32 %v1903_v24  ;;  %v1240_v31 = vpop.f32.mrb[23].mxu1 }
 0x90c   : > { %2155 = vpow2.f32 %v1904_v26 }
 0x910   : > { %v1276_v32 = vpop.f32.mrb[24].mxu1 }
 0x911   : > { %v1905_v33 = vmul.f32 -1.442695, %v1276_v32  ;;  %v1973_v34 = vpop.f32.mrb[25].mxu1 }
 0x912   : > { %v1279_v35 = vpop.f32.mrb[26].mxu1 }
 0x913   : > { %2157 = vpow2.f32 %v1905_v33  ;;  %v1974_v11 = vpop.f32.mrb[27].mxu1 }
 0x915   : > { %v2154_v36 = vpop.eup %2153 }
 0x916   : > { %v2156_v17 = vpop.eup %2155  ;;  %v1291_v20 = vadd.f32 1.0, %v2154_v36 }
 0x917   : > { %v1292_v37 = vadd.f32 1.0, %v2156_v17 }
 0x918   : > { %2159 = vrcp.f32 %v1291_v20 }
 0x919   : > { %2161 = vrcp.f32 %v1292_v37 }
 0x91d   : > { %v2158_v28 = vpop.eup %2157 }
 0x91e   : > { %v1293_v38 = vadd.f32 1.0, %v2158_v28 }
 0x920   : > { %2163 = vrcp.f32 %v1293_v38 }
 0x922   : > { %v2160_v39 = vpop.eup %2159 }
 0x923   : > { %v2162_v41 = vpop.eup %2161 }
 0x924   : > { %v1304_v42 = vcombine.low %v2160_v39, %v2162_v41 }
 0x926   : > { %v1306_v43 = vmul.f32 %v1304_v42, %v1300_v40 }
 0x928   : > { %v1308_v44 = vadd.f32 %v1306_v43, %v1300_v40 }
 0x92a   : > { %v2164_v23 = vpop.eup %2163  ;;  %v1312_v45 = vcombine.high %v1308_v44, %v1308_v44  ;;  %v1314_v46 = vpack.c.bf16 %v1308_v44, %v1308_v44 }
 0x92b   : > { %v1307_v47 = vmul.f32 %v2164_v23, %v1301_v19 }
 0x92c   : > { %v1315_v48 = vpack.c.bf16 %v1312_v45, %v1312_v45  ;;  %v1321_v50 = vsel %vm480_vm1, %v1314_v46, 0 }
 0x92d   : > { %v1309_v49 = vadd.f32 %v1307_v47, %v1301_v19 }
 0x92e   : > { %1906 = vmatprep.subr.msk.bf16.mxu0 %vm480_vm1, %v1315_v48 }
 0x92f   : > { %1330 = vmatpush1.bf16.msra.mxu0 %v1321_v50  ;;  %v1316_v54 = vpack.c.bf16 %v1309_v49, %v1309_v49 }
 0x931   : > { %v1327_v55 = vsel %vm480_vm1, %v1316_v54, 0 }
 0x932   : > { %1907 = vmatmul.mubr.msk.bf16.vlgmr.msra.gmra.mrb[20].mxu0 %vm476_vm2, %v1310_v52  ;;  %1976 = vmatpush3.bf16.msra.mxu1 %v1327_v55 }
 0x933   : > { %1981 = vmatprep.subr.bf16.mxu1 %v2530_v5  ;;  %1552 = vmatprep.mubr.bf16.mxu0 %v2529_v3 }
 0x935   : > { %1978 = vmatmul.mubr.msk.bf16.vlgmr.msra.gmra.mrb[28].mxu1 %vm476_vm2, %v1310_v52 }
 0x936   : > { %1983 = vmatprep.mubr.msk.bf16.mxu1 %vm2531_vm0, %v2530_v5 }
 0xa05   : > { %v1363_v8 = vpop.f32.mrb[20].mxu0 }
 0xa06   : > { %v1413_v56 = vsel %vm913_vm5, %v1363_v8, 0.0  ;;  %v1365_v58 = vpop.f32.mrb[21].mxu0 }
 0xa07   : > { %v1414_v59 = vrot.slane %v1413_v56, 4  ;;  %v1420_v60 = vsel %vm913_vm5, %v1365_v58, 0.0  ;;  %v1367_v61 = vpop.f32.mrb[22].mxu0 }
 0xa08   : > { %v1421_v62 = vrot.slane %v1420_v60, 4  ;;  %v1368_v63 = vpop.f32.mrb[23].mxu0  ;;  %v1404_v0 = vpop.f32.mrb[28].mxu1 }
 0xa09   : > { %v1415_v27 = vadd.f32 %v1414_v59, %v1413_v56  ;;  %v1427_v1 = vsel %vm1018_vm7, %v1404_v0, 0.0  ;;  %v1979_v3 = vpop.f32.mrb[29].mxu1 }
 0xa0a   : > { %v1422_v2 = vadd.f32 %v1421_v62, %v1420_v60  ;;  %v1428_v4 = vrot.slane %v1427_v1, 4  ;;  %v1407_v6 = vpop.f32.mrb[30].mxu1  ;;  %v1487_v3 = vpop.permute.xlu1 %1486 }
 0xa0b   : > { %v1416_v7 = vrot.slane %v1415_v27, 2  ;;  %v1980_v5 = vpop.f32.mrb[31].mxu1 }
 0xa0c   : > { %v1423_v9 = vrot.slane %v1422_v2, 2  ;;  %v1429_v30 = vadd.f32 %v1428_v4, %v1427_v1 }
 0xa0d   : > { %v1417_v10 = vadd.f32 %v1416_v7, %v1415_v27 }
 0xa0e   : > { %v1424_v12 = vadd.f32 %v1423_v9, %v1422_v2  ;;  %v1430_v13 = vrot.slane %v1429_v30, 2  ;;  %v1499_v9 = vrot.slane %v2994_v51, 7  ;;  %v1492_v51 = vld [vmem:[#allocation14] sm:$0x3] }
 0xa0f   : > { %v1418_v14 = vrot.slane %v1417_v10, 1 }
 0xa10   : > { %v1425_v15 = vrot.slane %v1424_v12, 1  ;;  %v1431_v16 = vadd.f32 %v1430_v13, %v1429_v30  ;;  %v1500_v13 = vrot.slane %v2996_v53, 7 }
 0xa11   : > { %v1419_v18 = vadd.f32 %v1418_v14, %v1417_v10 }
 0xa12   : > { %v1426_v21 = vadd.f32 %v1425_v15, %v1424_v12  ;;  %v1432_v22 = vrot.slane %v1431_v16, 1  ;;  %v1501_v15 = vrot.slane %v3006_v57, 7 }
 0xa13   : > { %v1434_v24 = vmul.f32 0.5, %v1419_v18 }
 0xa14   : > { %v1435_v25 = vmul.f32 0.5, %v1426_v21  ;;  %v1433_v26 = vadd.f32 %v1432_v22, %v1431_v16 }
 0xa15   : > { %v1437_v29 = vsub.f32 %v1363_v8, %v1434_v24 }
 0xa16   : > { %v1438_v31 = vsub.f32 %v1365_v58, %v1435_v25  ;;  %v1436_v32 = vmul.f32 0.5, %v1433_v26 }
 0xa17   : > { %v1440_v33 = vmul.f32 %v1437_v29, %v1437_v29 }
 0xa18   : > { %v1441_v34 = vmul.f32 %v1438_v31, %v1438_v31  ;;  %v1439_v35 = vsub.f32 %v1404_v0, %v1436_v32  ;;  %v1479_v0 = vpop.permute.xlu0 %1478 }
 0xa19   : > { %v1443_v11 = vsel %vm913_vm5, %v1440_v33, 0.0 }
 0xa1a   : > { %v1444_v36 = vrot.slane %v1443_v11, 4  ;;  %v1450_v17 = vsel %vm913_vm5, %v1441_v34, 0.0  ;;  %v1442_v20 = vmul.f32 %v1439_v35, %v1439_v35 }
 0xa1b   : > { %v1451_v37 = vrot.slane %v1450_v17, 4 }
 0xa1c   : > { %v1445_v28 = vadd.f32 %v1444_v36, %v1443_v11  ;;  %v1457_v38 = vsel %vm1018_vm7, %v1442_v20, 0.0 }
 0xa1d   : > { %v1452_v39 = vadd.f32 %v1451_v37, %v1450_v17  ;;  %v1458_v40 = vrot.slane %v1457_v38, 4 }
 0xa1e   : > { %v1446_v41 = vrot.slane %v1445_v28, 2 }
 0xa1f   : > { %v1453_v42 = vrot.slane %v1452_v39, 2  ;;  %v1459_v43 = vadd.f32 %v1458_v40, %v1457_v38 }
 0xa20   : > { %v1447_v19 = vadd.f32 %v1446_v41, %v1445_v28 }
 0xa21   : > { %v1454_v44 = vadd.f32 %v1453_v42, %v1452_v39  ;;  %v1460_v23 = vrot.slane %v1459_v43, 2 }
 0xa22   : > { %v1448_v45 = vrot.slane %v1447_v19, 1 }
 0xa23   : > { %v1455_v46 = vrot.slane %v1454_v44, 1  ;;  %v1461_v47 = vadd.f32 %v1460_v23, %v1459_v43 }
 0xa24   : > { %v1449_v48 = vadd.f32 %v1448_v45, %v1447_v19 }
 0xa25   : > { %v1456_v49 = vadd.f32 %v1455_v46, %v1454_v44  ;;  %v1462_v50 = vrot.slane %v1461_v47, 1 }
 0xa26   : > { %v1464_v52 = vmul.f32 0.5, %v1449_v48 }
 0xa27   : > { %v1465_v54 = vmul.f32 0.5, %v1456_v49  ;;  %v1463_v55 = vadd.f32 %v1462_v50, %v1461_v47 }
 0xa28   : > { %v1467_v8 = vadd.f32 1e-05, %v1464_v52 }
 0xa29   : > { %v1468_v56 = vadd.f32 1e-05, %v1465_v54  ;;  %v1466_v58 = vmul.f32 0.5, %v1463_v55 }
 0xa2a   : > { %2165 = vrsqrt.f32 %v1467_v8 }
 0xa2b   : > { %2167 = vrsqrt.f32 %v1468_v56  ;;  %v1469_v59 = vadd.f32 1e-05, %v1466_v58 }
 0xa2d   : > { %2169 = vrsqrt.f32 %v1469_v59 }
 0xa34   : > { %v2166_v60 = vpop.eup %2165 }
 0xa35   : > { %v2168_v61 = vpop.eup %2167  ;;  %v1473_v62 = vmul.f32 %v2166_v60, %v1437_v29 }
 0xa36   : > { %v1474_v63 = vmul.f32 %v2168_v61, %v1438_v31 }
 0xa37   : > { %v2170_v27 = vpop.eup %2169  ;;  %v1481_v1 = vmul.f32 %v1479_v0, %v1473_v62 }
 0xa38   : > { %v1475_v2 = vmul.f32 %v2170_v27, %v1439_v35  ;;  %v1482_v4 = vmul.f32 %v1479_v0, %v1474_v63 }
 0xa39   : > { %v1489_v6 = vadd.f32 %v1487_v3, %v1481_v1 }
 0xa3a   : > { %v1483_v7 = vmul.f32 %v1479_v0, %v1475_v2  ;;  %v1490_v5 = vadd.f32 %v1487_v3, %v1482_v4 }
 0xa3b   : > { %v1493_v30 = vpack.c.bf16 %v1489_v6, %v1489_v6 }
 0xa3c   : > { %v1491_v10 = vadd.f32 %v1487_v3, %v1483_v7  ;;  %v1494_v12 = vpack.c.bf16 %v1490_v5, %v1490_v5 }
 0xa3d   : > { %v1504_v14 = vsel %vm480_vm1, %v1493_v30, %v1499_v9 }
 0xa3e   : > { %v1495_v16 = vpack.c.bf16 %v1491_v10, %v1491_v10  ;;  %v1507_v18 = vsel %vm480_vm1, %v1494_v12, %v1500_v13  ;;  %v1514_v21 = vsel %vm913_vm5, %v1504_v14, 0 }
 0xa3f   : > { %1909 = vmatprep.subr.msk.bf16.mxu0 %vm913_vm5, %v1507_v18 }
 0xa40   : > { %1521 = vmatpush1.bf16.msra.mxu0 %v1514_v21  ;;  %v1510_v22 = vsel %vm480_vm1, %v1495_v16, %v1501_v15 }
 0xa41   : > { %v1518_v24 = vsel %vm913_vm5, %v1510_v22, 0 }
 0xa42   : > { %1982 = vmatpush3.bf16.msra.mxu1 %v1518_v24 }
 0xa43   : > { %1910 = vmatmul.mubr.msk.bf16.vlgmr.msra.gmra.mrb[24].mxu0 %vm909_vm6, %v1492_v51 }
 0xa45   : > { %1984 = vmatmul.mubr.msk.bf16.vlgmr.msra.gmra.mrb[32].mxu1 %vm909_vm6, %v1492_v51 }
 0xb16   : > { %v1554_v53 = vpop.f32.mrb[24].mxu0 }
 0xb17   : > { %v1605_v57 = vsel %vm1604_vm8, %v1554_v53, 0.0  ;;  %v1556_v25 = vpop.f32.mrb[25].mxu0 }
 0xb18   : > { %v1606_v26 = vrot.slane %v1605_v57, 4  ;;  %v1612_v29 = vsel %vm1604_vm8, %v1556_v25, 0.0  ;;  %v1595_v31 = vpop.f32.mrb[32].mxu1  ;;  %v1558_v32 = vpop.f32.mrb[26].mxu0 }
 0xb19   : > { %v1613_v33 = vrot.slane %v1612_v29, 4  ;;  %v1620_v34 = vsel %vm1619_vm9, %v1595_v31, 0.0  ;;  %v1559_v35 = vpop.f32.mrb[27].mxu0  ;;  %v1985_v11 = vpop.f32.mrb[33].mxu1 }
 0xb1a   : > { %v1607_v36 = vadd.f32 %v1606_v26, %v1605_v57  ;;  %v1621_v17 = vrot.slane %v1620_v34, 4  ;;  %v1598_v20 = vpop.f32.mrb[34].mxu1  ;;  %v1673_v57 = vpop.permute.xlu0 %1672 }
 0xb1b   : > { %v1614_v37 = vadd.f32 %v1613_v33, %v1612_v29  ;;  %v1986_v28 = vpop.f32.mrb[35].mxu1 }
 0xb1c   : > { %v1608_v38 = vrot.slane %v1607_v36, 2  ;;  %v1622_v39 = vadd.f32 %v1621_v17, %v1620_v34 }
 0xb1d   : > { %v1615_v40 = vrot.slane %v1614_v37, 2 }
 0xb1e   : > { %v1609_v41 = vadd.f32 %v1608_v38, %v1607_v36  ;;  %v1623_v42 = vrot.slane %v1622_v39, 2  ;;  %v1681_v36 = vpop.permute.xlu0 %1680 }
 0xb1f   : > { %v1616_v43 = vadd.f32 %v1615_v40, %v1614_v37 }
 0xb20   : > { %v1610_v19 = vrot.slane %v1609_v41, 1  ;;  %v1624_v44 = vadd.f32 %v1623_v42, %v1622_v39 }
 0xb21   : > { %v1617_v23 = vrot.slane %v1616_v43, 1 }
 0xb22   : > { %v1611_v45 = vadd.f32 %v1610_v19, %v1609_v41  ;;  %v1625_v46 = vrot.slane %v1624_v44, 1 }
 0xb23   : > { %v1618_v47 = vadd.f32 %v1617_v23, %v1616_v43 }
 0xb24   : > { %v1628_v48 = vmul.f32 0.25, %v1611_v45  ;;  %v1626_v49 = vadd.f32 %v1625_v46, %v1624_v44 }
 0xb25   : > { %v1629_v50 = vmul.f32 0.25, %v1618_v47 }
 0xb26   : > { %v1631_v52 = vsub.f32 %v1554_v53, %v1628_v48  ;;  %v1630_v54 = vmul.f32 0.25, %v1626_v49 }
 0xb27   : > { %v1632_v55 = vsub.f32 %v1556_v25, %v1629_v50  ;;  %v1689_v25 = vld [vmem:[%s2882_s26] sm:$0x3f] }
 0xb28   : > { %v1634_v8 = vmul.f32 %v1631_v52, %v1631_v52  ;;  %v1633_v56 = vsub.f32 %v1595_v31, %v1630_v54  ;;  %v1690_v33 = vunpack.c.l.bf16 %v1689_v25  ;;  %v1691_v41 = vunpack.c.h.bf16 %v1689_v25 }
 0xb29   : > { %v1635_v58 = vmul.f32 %v1632_v55, %v1632_v55 }
 0xb2a   : > { %v1637_v59 = vsel %vm1604_vm8, %v1634_v8, 0.0  ;;  %v1636_v60 = vmul.f32 %v1633_v56, %v1633_v56  ;;  %v1693_v38 = vcombine.high %v1690_v33, %v1690_v33 }
 0xb2b   : > { %v1638_v61 = vrot.slane %v1637_v59, 4  ;;  %v1644_v62 = vsel %vm1604_vm8, %v1635_v58, 0.0 }
 0xb2c   : > { %v1645_v63 = vrot.slane %v1644_v62, 4  ;;  %v1651_v0 = vsel %vm1619_vm9, %v1636_v60, 0.0 }
 0xb2d   : > { %v1639_v27 = vadd.f32 %v1638_v61, %v1637_v59  ;;  %v1652_v1 = vrot.slane %v1651_v0, 4 }
 0xb2e   : > { %v1646_v3 = vadd.f32 %v1645_v63, %v1644_v62 }
 0xb2f   : > { %v1640_v2 = vrot.slane %v1639_v27, 2  ;;  %v1653_v4 = vadd.f32 %v1652_v1, %v1651_v0 }
 0xb30   : > { %v1647_v6 = vrot.slane %v1646_v3, 2 }
 0xb31   : > { %v1641_v7 = vadd.f32 %v1640_v2, %v1639_v27  ;;  %v1654_v5 = vrot.slane %v1653_v4, 2 }
 0xb32   : > { %v1648_v9 = vadd.f32 %v1647_v6, %v1646_v3 }
 0xb33   : > { %v1642_v30 = vrot.slane %v1641_v7, 1  ;;  %v1655_v10 = vadd.f32 %v1654_v5, %v1653_v4 }
 0xb34   : > { %v1649_v12 = vrot.slane %v1648_v9, 1 }
 0xb35   : > { %v1643_v13 = vadd.f32 %v1642_v30, %v1641_v7  ;;  %v1656_v14 = vrot.slane %v1655_v10, 1 }
 0xb36   : > { %v1650_v15 = vadd.f32 %v1649_v12, %v1648_v9 }
 0xb37   : > { %v1658_v16 = vmul.f32 0.25, %v1643_v13  ;;  %v1657_v18 = vadd.f32 %v1656_v14, %v1655_v10 }
 0xb38   : > { %v1659_v21 = vmul.f32 0.25, %v1650_v15 }
 0xb39   : > { %v1661_v22 = vadd.f32 1e-05, %v1658_v16  ;;  %v1660_v51 = vmul.f32 0.25, %v1657_v18 }
 0xb3a   : > { %v1662_v24 = vadd.f32 1e-05, %v1659_v21 }
 0xb3b   : > { %2171 = vrsqrt.f32 %v1661_v22  ;;  %v1663_v53 = vadd.f32 1e-05, %v1660_v51 }
 0xb3c   : > { %2173 = vrsqrt.f32 %v1662_v24 }
 0xb3d   : > { %2175 = vrsqrt.f32 %v1663_v53 }
 0xb45   : > { %v2172_v26 = vpop.eup %2171 }
 0xb46   : > { %v2174_v29 = vpop.eup %2173  ;;  %v1667_v31 = vmul.f32 %v2172_v26, %v1631_v52 }
 0xb47   : > { %v2176_v32 = vpop.eup %2175  ;;  %v1668_v34 = vmul.f32 %v2174_v29, %v1632_v55 }
 0xb48   : > { %v1675_v35 = vmul.f32 %v1673_v57, %v1667_v31  ;;  %v1669_v11 = vmul.f32 %v2176_v32, %v1633_v56 }
 0xb49   : > { %v1676_v17 = vmul.f32 %v1673_v57, %v1668_v34 }
 0xb4a   : > { %v1683_v20 = vadd.f32 %v1681_v36, %v1675_v35  ;;  %v1677_v37 = vmul.f32 %v1673_v57, %v1669_v11 }
 0xb4b   : > { %v1684_v28 = vadd.f32 %v1681_v36, %v1676_v17 }
 0xb4c   : > { %v1686_v39 = vmax.f32 %v1683_v20, 0.0  ;;  %v1685_v40 = vadd.f32 %v1681_v36, %v1677_v37 }
 0xb4d   : > { %v1687_v42 = vmax.f32 %v1684_v28, 0.0 }
 0xb4e   : > { %v1695_v43 = vadd.f32 %v1690_v33, %v1686_v39  ;;  %v1688_v19 = vmax.f32 %v1685_v40, 0.0 }
 0xb4f   : > { %v1696_v44 = vadd.f32 %v1693_v38, %v1687_v42 }
 0xb50   : > { %v1697_v23 = vadd.f32 %v1691_v41, %v1688_v19 }
 0xb51   : > { %v1700_v45 = vcombine.low %v1695_v43, %v1696_v44 }
 0xb52   : > { %1703 = vst.msk [vmem:[%s454_s24 + $0x8] sm:$0xf] %vm1619_vm9, %v1697_v23 }
 0xb53   : > { %1702 = vst [vmem:[%s454_s24] sm:$0xff] %v1700_v45 }
 0xb54   : > { %2444 = shalt.err (!%p2441_p11)
}
 0xb55   : > { %s2445_s3 = scalar_lea.hbm %s3069_s29, 192  ;;  %s2449_s26 = scalar_lea.hbm %s3123_s9, 384 }
 0xb56   : > { %p2446_p12 = scmp.ne.s32.totalorder %s3069_s29, %s2445_s3  ;;  %p2450_p7 = scmp.lt.u32.totalorder %s3069_s29, %s3123_s9 }
 0xb57   : > { %p2451_p5 = scmp.lt.u32.totalorder %s2449_s26, %s2445_s3  ;;  %p2453_p4 = scmp.lt.u32.totalorder %s2445_s3, %s3069_s29 }
 0xb58   : > { %p2447_p8 = pnand %p2446_p12, %p3150_p13 }
 0xb59   : > { %p2452_p9 = por %p2451_p5, %p2450_p7 }
 0xb5a   : > { %p2448_p6 = pneg %p2447_p8 }
 0xb5b   : > { %p2454_p1 = por %p2453_p4, %p2452_p9 }
 0xb5d   : > { %p2455_p3 = pnand %p2454_p1, %p2448_p6 }
 0xb5f   : > { %2458 = shalt.err (!%p2455_p3)
}
 0xb60   : > { %2034 = dma.vmem_to_hbm [thread:$0]  (%p3150_p13), %s3071_s13, 192, %s3069_s29, %s1705_s15  }
 0xb61 PF: > { %s1731_s24 = sand.u32 1, %s2501_s30   ;;  %p3151_p2 = scmp.ne.s32.totalorder %s3139_s28, 0 }
 0xb62   : > { %p3152_p0 = scmp.ge.s32.totalorder %s2513_s12, 2  ;;  %s1732_s1 = scalar_lea.sflag [#allocation4], %s1731_s24 }
 0xb64   : > { %p2066_p10 = pnand %p3152_p0, %p3151_p2 }
 0xb66   : > { %2496 = dma.done.wait (!%p2066_p10), %s1732_s1, 192  }
 0xb67   : > { %2498 = vsyncadd (!%p2066_p10), %s1732_s1, 4294967104  ;;  %p26_p11 = scmp.ge.s32.totalorder %s2808_s27, 4   ;;  %s3153_s30 = smov %s2505_s10 }
 0xb68   : > { %s3154_s10 = smov %s2509_s11  ;;  %s3155_s11 = smov %s2819_s14 }
 0xb69   : > { %s3156_s12 = smov %s2808_s27  ;;  %28 = sbr.rel (!%p26_p11) target bundleno = 13 (0xd), region = 136 }
 0xb70   :  { %1737 = vsyncpa [#allocation3], 1 }
 0xb71   :  { %1739 = vsyncpa [#allocation3 + $0x1], 1 }
 0xb72   :  { %1740 = vsyncpa [#allocation6], 1 }
 0xb73   :  { %1741 = vsyncpa [#allocation9], 1 }
 0xb74   :  { %1742 = vsyncpa [#allocation12], 1 }
 0xb75   :  { %1743 = vsyncpa [#allocation15], 1 }
 0xb76   :  { %1744 = vsyncpa [#allocation4], 1 }
 0xb77   :  { %1746 = vsyncpa [#allocation4 + $0x1], 1 }

</bundles_post_ra>
